<compile_context>
chip_gen: v5e
topology: v5e:2x2
jax: 0.10.0
libtpu: 0.0.40
codegen_flags: <defaults>
</compile_context>

<pallas_src>
import numpy as np
import jax
import jax.numpy as jnp
from jax.experimental import pallas as pl
from jax.experimental.pallas import tpu as pltpu

# ---------------------------------------------------------------------------
# Irreps configuration (synthetic, e.g. "8x0e + 4x1o + 2x2e")
# ---------------------------------------------------------------------------
SCALAR_MUL = 8                      # irreps_in[0].mul  -> scalar_idx
VECTOR_IRREPS = ((4, 3), (2, 5))    # (mul, 2l+1) for the higher-order irreps

D_VEC = sum(m * d for m, d in VECTOR_IRREPS)          # 4*3 + 2*5 = 22
D_TOT = SCALAR_MUL + D_VEC                            # 30

_EPS = np.float32(1e-8)


def _round_up(a, b):
    return -(-a // b) * b


# ---------------------------------------------------------------------------
# Shared kernel core: operates on lane-dense (features x columns) refs
# ---------------------------------------------------------------------------
def _gate_segments(src, dst):
    """Norm gating on lane-dense refs.

    `src` / `dst` (may be the same ref) have shape (D_TOT, TN) with TN a
    multiple of 128.  Each irrep segment is read straight from `src`, gated,
    and written straight to the matching rows of `dst`: no full-tile
    materialisation, no misaligned value slicing, no concatenate.  All math
    is f32 regardless of the ref dtypes.
    """
    f32 = jnp.float32

    # Scalar rows: SiLU.
    s = src[0:SCALAR_MUL, :].astype(f32)                       # (8, TN)
    dst[0:SCALAR_MUL, :] = (s * jax.nn.sigmoid(s)).astype(dst.dtype)

    # Vector rows: per-channel norm gating, fully unrolled (static Python
    # loop over a handful of channels -> pure VPU work, no axis reductions).
    off = SCALAR_MUL
    for mul, d in VECTOR_IRREPS:
        inv_sqrt_d = np.float32(1.0 / np.sqrt(float(d)))
        for _u in range(mul):
            comp = src[off:off + d, :].astype(f32)             # (d, TN)
            # Explicit unrolled sum of per-row squares.
            sq = comp[0:1, :] * comp[0:1, :]
            for k in range(1, d):
                sq = sq + comp[k:k + 1, :] * comp[k:k + 1, :]  # (1, TN)
            gate = jax.nn.sigmoid(jnp.sqrt(sq * inv_sqrt_d + _EPS))
            dst[off:off + d, :] = (gate * comp).astype(dst.dtype)
            off += d


# ---------------------------------------------------------------------------
# Kernels
# ---------------------------------------------------------------------------
def _norm_act_kernel_dn(x_ref, o_ref):
    # Native lane-dense path: blocks are already (D_TOT, TN).
    _gate_segments(x_ref, o_ref)


def _norm_act_kernel_rows(x_ref, o_ref, xt_ref):
    # Drop-in path: natural (TN, D_TOT) block.  Fold the layout change into
    # the kernel: transpose (in f32, the most robust transpose path) into a
    # lane-dense VMEM scratch, gate every segment in place, transpose back.
    xt_ref[...] = x_ref[...].astype(jnp.float32).T             # (D_TOT, TN)
    _gate_segments(xt_ref, xt_ref)
    o_ref[...] = xt_ref[...].T.astype(o_ref.dtype)             # (TN, D_TOT)


# ---------------------------------------------------------------------------
# Tile sizing
# ---------------------------------------------------------------------------
def _pick_tile(n, requested, min_steps=8):
    """Tile width: multiple of 128, clamped to the (rounded) problem size and,
    for large problems, so the 1-D parallel grid keeps >= `min_steps` steps
    (v7x has 2 TensorCores sharing the grid)."""
    n = max(int(n), 1)
    n128 = _round_up(n, 128)
    t_req = _round_up(min(int(requested), n128), 128)
    t_cap = _round_up(pl.cdiv(n, min_steps), 128)
    t = min(t_req, max(t_cap, 512))        # never shrink below 512 columns
    t = min(t, n128)
    return max(t, 128)


# ---------------------------------------------------------------------------
# Wrappers
# ---------------------------------------------------------------------------
def norm_activation_dn(x_dn, *, tile_n=16384):
    """NormActivation on feature-major data: x_dn is (D_TOT, N) -> (D_TOT, N).

    Zero layout plumbing (no transposes, no pads): this is the recommended
    fast path for callers that keep activations feature-major.
    """
    d, n = x_dn.shape
    assert d == D_TOT
    tn = _pick_tile(n, tile_n)
    return pl.pallas_call(
        _norm_act_kernel_dn,
        out_shape=jax.ShapeDtypeStruct((D_TOT, n), x_dn.dtype),
        grid_spec=pltpu.PrefetchScalarGridSpec(
            num_scalar_prefetch=0,
            grid=(pl.cdiv(n, tn),),
            in_specs=[pl.BlockSpec((D_TOT, tn), lambda i: (0, i))],
            out_specs=pl.BlockSpec((D_TOT, tn), lambda i: (0, i)),
        ),
        compiler_params=pltpu.CompilerParams(
            dimension_semantics=("parallel",),
            vmem_limit_bytes=32 * 1024 * 1024,
        ),
    )(x_dn)


def _norm_activation_rows(x2d, tile_n):
    """Natural-layout path: x2d is (N, D_TOT); layout change folded in-kernel."""
    n = x2d.shape[0]
    tn = _pick_tile(n, tile_n)
    return pl.pallas_call(
        _norm_act_kernel_rows,
        out_shape=jax.ShapeDtypeStruct((n, D_TOT), x2d.dtype),
        grid_spec=pltpu.PrefetchScalarGridSpec(
            num_scalar_prefetch=0,
            grid=(pl.cdiv(n, tn),),
            in_specs=[pl.BlockSpec((tn, D_TOT), lambda i: (i, 0))],
            out_specs=pl.BlockSpec((tn, D_TOT), lambda i: (i, 0)),
            scratch_shapes=[pltpu.VMEM((D_TOT, tn), jnp.float32)],
        ),
        compiler_params=pltpu.CompilerParams(
            dimension_semantics=("parallel",),
            vmem_limit_bytes=32 * 1024 * 1024,
        ),
    )(x2d)


def norm_activation(features, *, tile_n=8192):
    """Drop-in NormActivation: features (..., D_TOT) -> same shape/dtype.

    Streams natural (rows, D_TOT) blocks; the lane-dense layout change is
    folded into the kernel, so there are no XLA transpose / pad passes over
    HBM.  Callers that can keep activations feature-major should prefer
    norm_activation_dn().
    """
    lead = features.shape[:-1]
    assert features.shape[-1] == D_TOT
    x2d = features.reshape(-1, D_TOT)
    try:
        out = _norm_activation_rows(x2d, tile_n)
    except Exception:
        # Robustness fallback only (older Mosaic builds that cannot lower the
        # unaligned in-kernel transpose): pays two XLA transpose passes around
        # the lane-dense kernel.
        out = jnp.transpose(norm_activation_dn(jnp.transpose(x2d)))
    return out.reshape(*lead, D_TOT)


# ---------------------------------------------------------------------------
# Pure-JAX reference (mirrors the PyTorch/e3nn math) for verification
# ---------------------------------------------------------------------------
def norm_activation_ref(features):
    lead = features.shape[:-1]
    f = features.astype(jnp.float32)
    s = f[..., :SCALAR_MUL]
    outs = [s * jax.nn.sigmoid(s)]
    off = SCALAR_MUL
    for mul, d in VECTOR_IRREPS:
        v = f[..., off:off + mul * d]
        v3 = v.reshape(*lead, mul, d)
        sq = jnp.sum(v3 * v3, axis=-1) / np.sqrt(float(d))
        gate = jax.nn.sigmoid(jnp.sqrt(sq + 1e-8))
        outs.append((gate[..., None] * v3).reshape(*lead, mul * d))
        off += mul * d
    return jnp.concatenate(outs, axis=-1).astype(features.dtype)


if __name__ == "__main__":
    key = jax.random.PRNGKey(0)
    (k1,) = jax.random.split(key, 1)

    # 1) Drop-in channels-last path, f32.  n = 2*150 = 300 exercises the
    #    ragged-boundary block (no wrapper padding).
    feats = jax.random.normal(k1, (2, 150, D_TOT), dtype=jnp.float32)
    out = jax.block_until_ready(norm_activation(feats))
    ref = jax.block_until_ready(norm_activation_ref(feats))
    assert out.shape == feats.shape and out.dtype == feats.dtype
    np.testing.assert_allclose(np.asarray(out), np.asarray(ref),
                               atol=1e-5, rtol=1e-5)

    # 2) Native lane-dense (D_TOT, N) path (zero layout plumbing).
    x_dn = jnp.transpose(feats.reshape(-1, D_TOT))           # (30, 300)
    out_dn = jax.block_until_ready(norm_activation_dn(x_dn))
    ref_dn = jnp.transpose(ref.reshape(-1, D_TOT))
    np.testing.assert_allclose(np.asarray(out_dn), np.asarray(ref_dn),
                               atol=1e-5, rtol=1e-5)

    # 3) bf16 I/O path (halves HBM traffic; math stays f32 in-kernel).
    feats_bf16 = feats.astype(jnp.bfloat16)
    out_bf16 = jax.block_until_ready(norm_activation(feats_bf16))
    assert out_bf16.dtype == jnp.bfloat16
    ref_bf16 = jax.block_until_ready(
        norm_activation_ref(feats_bf16.astype(jnp.float32)))
    np.testing.assert_allclose(np.asarray(out_bf16.astype(jnp.float32)),
                               np.asarray(ref_bf16), atol=2e-2, rtol=2e-2)

    print("KERNEL_OK")
</pallas_src>

<mosaic_0001>
module attributes {stable_mosaic.version = 11 : i64} {
  func.func @_norm_act_kernel_rows(%arg0: i32, %arg1: memref<384x30xf32, #tpu.memory_space<vmem>>, %arg2: memref<384x30xf32, #tpu.memory_space<vmem>>, %arg3: memref<30x384xf32, #tpu.memory_space<vmem>>) attributes {dimension_semantics = [#tpu.dimension_semantics<parallel>], iteration_bounds = array<i64: 1>, scalar_prefetch = 0 : i64, scratch_operands = 1 : i64, tpu.core_type = #tpu.core_type<tc>, window_params = [{transform_indices = @transform_0, window_bounds = array<i64: 384, 30>}, {transform_indices = @transform_1, window_bounds = array<i64: 384, 30>}]} {
    %c0 = arith.constant 0 : index
    %c0_0 = arith.constant 0 : index
    %0 = vector.load %arg1[%c0, %c0_0] : memref<384x30xf32, #tpu.memory_space<vmem>>, vector<384x30xf32>
    %1 = tpu.transpose %0, [1, 0] : vector<384x30xf32> -> vector<30x384xf32>
    %c0_1 = arith.constant 0 : index
    %c0_2 = arith.constant 0 : index
    %2 = vector.load %arg3[%c0_1, %c0_2] : memref<30x384xf32, #tpu.memory_space<vmem>>, vector<30x384xf32>
    tpu.vector_store %arg3[%c0_1, %c0_2], %1 {strides = array<i32>} : memref<30x384xf32, #tpu.memory_space<vmem>>, vector<30x384xf32>,
    %c0_3 = arith.constant 0 : index
    %c0_4 = arith.constant 0 : index
    %3 = vector.load %arg3[%c0_3, %c0_4] : memref<30x384xf32, #tpu.memory_space<vmem>>, vector<8x384xf32>
    %4 = arith.negf %3 : vector<8x384xf32>
    %5 = math.exp %4 : vector<8x384xf32>
    %cst = arith.constant 1.000000e+00 : f32
    %6 = vector.broadcast %cst : f32 to vector<8x384xf32>
    %7 = arith.addf %6, %5 : vector<8x384xf32>
    %8 = arith.divf %6, %7 : vector<8x384xf32>
    %9 = arith.mulf %3, %8 : vector<8x384xf32>
    %c0_5 = arith.constant 0 : index
    %c0_6 = arith.constant 0 : index
    %10 = vector.load %arg3[%c0_5, %c0_6] : memref<30x384xf32, #tpu.memory_space<vmem>>, vector<8x384xf32>
    tpu.vector_store %arg3[%c0_5, %c0_6], %9 {strides = array<i32>} : memref<30x384xf32, #tpu.memory_space<vmem>>, vector<8x384xf32>,
    %c8 = arith.constant 8 : index
    %c0_7 = arith.constant 0 : index
    %11 = vector.load %arg3[%c8, %c0_7] : memref<30x384xf32, #tpu.memory_space<vmem>>, vector<3x384xf32>
    %12 = vector.extract_strided_slice %11 {offsets = [0, 0], sizes = [1, 384], strides = [1, 1]} : vector<3x384xf32> to vector<1x384xf32>
    %13 = vector.extract_strided_slice %11 {offsets = [0, 0], sizes = [1, 384], strides = [1, 1]} : vector<3x384xf32> to vector<1x384xf32>
    %14 = arith.mulf %12, %13 : vector<1x384xf32>
    %15 = vector.extract_strided_slice %11 {offsets = [1, 0], sizes = [1, 384], strides = [1, 1]} : vector<3x384xf32> to vector<1x384xf32>
    %16 = vector.extract_strided_slice %11 {offsets = [1, 0], sizes = [1, 384], strides = [1, 1]} : vector<3x384xf32> to vector<1x384xf32>
    %17 = arith.mulf %15, %16 : vector<1x384xf32>
    %18 = arith.addf %14, %17 : vector<1x384xf32>
    %19 = vector.extract_strided_slice %11 {offsets = [2, 0], sizes = [1, 384], strides = [1, 1]} : vector<3x384xf32> to vector<1x384xf32>
    %20 = vector.extract_strided_slice %11 {offsets = [2, 0], sizes = [1, 384], strides = [1, 1]} : vector<3x384xf32> to vector<1x384xf32>
    %21 = arith.mulf %19, %20 : vector<1x384xf32>
    %22 = arith.addf %18, %21 : vector<1x384xf32>
    %cst_8 = arith.constant 0.577350259 : f32
    %23 = vector.broadcast %cst_8 : f32 to vector<1x384xf32>
    %24 = arith.mulf %22, %23 : vector<1x384xf32>
    %cst_9 = arith.constant 9.99999993E-9 : f32
    %25 = vector.broadcast %cst_9 : f32 to vector<1x384xf32>
    %26 = arith.addf %24, %25 : vector<1x384xf32>
    %27 = math.sqrt %26 : vector<1x384xf32>
    %28 = arith.negf %27 : vector<1x384xf32>
    %29 = math.exp %28 : vector<1x384xf32>
    %cst_10 = arith.constant 1.000000e+00 : f32
    %30 = vector.broadcast %cst_10 : f32 to vector<1x384xf32>
    %31 = arith.addf %30, %29 : vector<1x384xf32>
    %32 = arith.divf %30, %31 : vector<1x384xf32>
    %33 = vector.broadcast %32 : vector<1x384xf32> to vector<3x384xf32>
    %34 = arith.mulf %33, %11 : vector<3x384xf32>
    %c8_11 = arith.constant 8 : index
    %c0_12 = arith.constant 0 : index
    %35 = vector.load %arg3[%c8_11, %c0_12] : memref<30x384xf32, #tpu.memory_space<vmem>>, vector<3x384xf32>
    tpu.vector_store %arg3[%c8_11, %c0_12], %34 {strides = array<i32>} : memref<30x384xf32, #tpu.memory_space<vmem>>, vector<3x384xf32>,
    %c11 = arith.constant 11 : index
    %c0_13 = arith.constant 0 : index
    %36 = vector.load %arg3[%c11, %c0_13] : memref<30x384xf32, #tpu.memory_space<vmem>>, vector<3x384xf32>
    %37 = vector.extract_strided_slice %36 {offsets = [0, 0], sizes = [1, 384], strides = [1, 1]} : vector<3x384xf32> to vector<1x384xf32>
    %38 = vector.extract_strided_slice %36 {offsets = [0, 0], sizes = [1, 384], strides = [1, 1]} : vector<3x384xf32> to vector<1x384xf32>
    %39 = arith.mulf %37, %38 : vector<1x384xf32>
    %40 = vector.extract_strided_slice %36 {offsets = [1, 0], sizes = [1, 384], strides = [1, 1]} : vector<3x384xf32> to vector<1x384xf32>
    %41 = vector.extract_strided_slice %36 {offsets = [1, 0], sizes = [1, 384], strides = [1, 1]} : vector<3x384xf32> to vector<1x384xf32>
    %42 = arith.mulf %40, %41 : vector<1x384xf32>
    %43 = arith.addf %39, %42 : vector<1x384xf32>
    %44 = vector.extract_strided_slice %36 {offsets = [2, 0], sizes = [1, 384], strides = [1, 1]} : vector<3x384xf32> to vector<1x384xf32>
    %45 = vector.extract_strided_slice %36 {offsets = [2, 0], sizes = [1, 384], strides = [1, 1]} : vector<3x384xf32> to vector<1x384xf32>
    %46 = arith.mulf %44, %45 : vector<1x384xf32>
    %47 = arith.addf %43, %46 : vector<1x384xf32>
    %cst_14 = arith.constant 0.577350259 : f32
    %48 = vector.broadcast %cst_14 : f32 to vector<1x384xf32>
    %49 = arith.mulf %47, %48 : vector<1x384xf32>
    %cst_15 = arith.constant 9.99999993E-9 : f32
    %50 = vector.broadcast %cst_15 : f32 to vector<1x384xf32>
    %51 = arith.addf %49, %50 : vector<1x384xf32>
    %52 = math.sqrt %51 : vector<1x384xf32>
    %53 = arith.negf %52 : vector<1x384xf32>
    %54 = math.exp %53 : vector<1x384xf32>
    %cst_16 = arith.constant 1.000000e+00 : f32
    %55 = vector.broadcast %cst_16 : f32 to vector<1x384xf32>
    %56 = arith.addf %55, %54 : vector<1x384xf32>
    %57 = arith.divf %55, %56 : vector<1x384xf32>
    %58 = vector.broadcast %57 : vector<1x384xf32> to vector<3x384xf32>
    %59 = arith.mulf %58, %36 : vector<3x384xf32>
    %c11_17 = arith.constant 11 : index
    %c0_18 = arith.constant 0 : index
    %60 = vector.load %arg3[%c11_17, %c0_18] : memref<30x384xf32, #tpu.memory_space<vmem>>, vector<3x384xf32>
    tpu.vector_store %arg3[%c11_17, %c0_18], %59 {strides = array<i32>} : memref<30x384xf32, #tpu.memory_space<vmem>>, vector<3x384xf32>,
    %c14 = arith.constant 14 : index
    %c0_19 = arith.constant 0 : index
    %61 = vector.load %arg3[%c14, %c0_19] : memref<30x384xf32, #tpu.memory_space<vmem>>, vector<3x384xf32>
    %62 = vector.extract_strided_slice %61 {offsets = [0, 0], sizes = [1, 384], strides = [1, 1]} : vector<3x384xf32> to vector<1x384xf32>
    %63 = vector.extract_strided_slice %61 {offsets = [0, 0], sizes = [1, 384], strides = [1, 1]} : vector<3x384xf32> to vector<1x384xf32>
    %64 = arith.mulf %62, %63 : vector<1x384xf32>
    %65 = vector.extract_strided_slice %61 {offsets = [1, 0], sizes = [1, 384], strides = [1, 1]} : vector<3x384xf32> to vector<1x384xf32>
    %66 = vector.extract_strided_slice %61 {offsets = [1, 0], sizes = [1, 384], strides = [1, 1]} : vector<3x384xf32> to vector<1x384xf32>
    %67 = arith.mulf %65, %66 : vector<1x384xf32>
    %68 = arith.addf %64, %67 : vector<1x384xf32>
    %69 = vector.extract_strided_slice %61 {offsets = [2, 0], sizes = [1, 384], strides = [1, 1]} : vector<3x384xf32> to vector<1x384xf32>
    %70 = vector.extract_strided_slice %61 {offsets = [2, 0], sizes = [1, 384], strides = [1, 1]} : vector<3x384xf32> to vector<1x384xf32>
    %71 = arith.mulf %69, %70 : vector<1x384xf32>
    %72 = arith.addf %68, %71 : vector<1x384xf32>
    %cst_20 = arith.constant 0.577350259 : f32
    %73 = vector.broadcast %cst_20 : f32 to vector<1x384xf32>
    %74 = arith.mulf %72, %73 : vector<1x384xf32>
    %cst_21 = arith.constant 9.99999993E-9 : f32
    %75 = vector.broadcast %cst_21 : f32 to vector<1x384xf32>
    %76 = arith.addf %74, %75 : vector<1x384xf32>
    %77 = math.sqrt %76 : vector<1x384xf32>
    %78 = arith.negf %77 : vector<1x384xf32>
    %79 = math.exp %78 : vector<1x384xf32>
    %cst_22 = arith.constant 1.000000e+00 : f32
    %80 = vector.broadcast %cst_22 : f32 to vector<1x384xf32>
    %81 = arith.addf %80, %79 : vector<1x384xf32>
    %82 = arith.divf %80, %81 : vector<1x384xf32>
    %83 = vector.broadcast %82 : vector<1x384xf32> to vector<3x384xf32>
    %84 = arith.mulf %83, %61 : vector<3x384xf32>
    %c14_23 = arith.constant 14 : index
    %c0_24 = arith.constant 0 : index
    %85 = vector.load %arg3[%c14_23, %c0_24] : memref<30x384xf32, #tpu.memory_space<vmem>>, vector<3x384xf32>
    tpu.vector_store %arg3[%c14_23, %c0_24], %84 {strides = array<i32>} : memref<30x384xf32, #tpu.memory_space<vmem>>, vector<3x384xf32>,
    %c17 = arith.constant 17 : index
    %c0_25 = arith.constant 0 : index
    %86 = vector.load %arg3[%c17, %c0_25] : memref<30x384xf32, #tpu.memory_space<vmem>>, vector<3x384xf32>
    %87 = vector.extract_strided_slice %86 {offsets = [0, 0], sizes = [1, 384], strides = [1, 1]} : vector<3x384xf32> to vector<1x384xf32>
    %88 = vector.extract_strided_slice %86 {offsets = [0, 0], sizes = [1, 384], strides = [1, 1]} : vector<3x384xf32> to vector<1x384xf32>
    %89 = arith.mulf %87, %88 : vector<1x384xf32>
    %90 = vector.extract_strided_slice %86 {offsets = [1, 0], sizes = [1, 384], strides = [1, 1]} : vector<3x384xf32> to vector<1x384xf32>
    %91 = vector.extract_strided_slice %86 {offsets = [1, 0], sizes = [1, 384], strides = [1, 1]} : vector<3x384xf32> to vector<1x384xf32>
    %92 = arith.mulf %90, %91 : vector<1x384xf32>
    %93 = arith.addf %89, %92 : vector<1x384xf32>
    %94 = vector.extract_strided_slice %86 {offsets = [2, 0], sizes = [1, 384], strides = [1, 1]} : vector<3x384xf32> to vector<1x384xf32>
    %95 = vector.extract_strided_slice %86 {offsets = [2, 0], sizes = [1, 384], strides = [1, 1]} : vector<3x384xf32> to vector<1x384xf32>
    %96 = arith.mulf %94, %95 : vector<1x384xf32>
    %97 = arith.addf %93, %96 : vector<1x384xf32>
    %cst_26 = arith.constant 0.577350259 : f32
    %98 = vector.broadcast %cst_26 : f32 to vector<1x384xf32>
    %99 = arith.mulf %97, %98 : vector<1x384xf32>
    %cst_27 = arith.constant 9.99999993E-9 : f32
    %100 = vector.broadcast %cst_27 : f32 to vector<1x384xf32>
    %101 = arith.addf %99, %100 : vector<1x384xf32>
    %102 = math.sqrt %101 : vector<1x384xf32>
    %103 = arith.negf %102 : vector<1x384xf32>
    %104 = math.exp %103 : vector<1x384xf32>
    %cst_28 = arith.constant 1.000000e+00 : f32
    %105 = vector.broadcast %cst_28 : f32 to vector<1x384xf32>
    %106 = arith.addf %105, %104 : vector<1x384xf32>
    %107 = arith.divf %105, %106 : vector<1x384xf32>
    %108 = vector.broadcast %107 : vector<1x384xf32> to vector<3x384xf32>
    %109 = arith.mulf %108, %86 : vector<3x384xf32>
    %c17_29 = arith.constant 17 : index
    %c0_30 = arith.constant 0 : index
    %110 = vector.load %arg3[%c17_29, %c0_30] : memref<30x384xf32, #tpu.memory_space<vmem>>, vector<3x384xf32>
    tpu.vector_store %arg3[%c17_29, %c0_30], %109 {strides = array<i32>} : memref<30x384xf32, #tpu.memory_space<vmem>>, vector<3x384xf32>,
    %c20 = arith.constant 20 : index
    %c0_31 = arith.constant 0 : index
    %111 = vector.load %arg3[%c20, %c0_31] : memref<30x384xf32, #tpu.memory_space<vmem>>, vector<5x384xf32>
    %112 = vector.extract_strided_slice %111 {offsets = [0, 0], sizes = [1, 384], strides = [1, 1]} : vector<5x384xf32> to vector<1x384xf32>
    %113 = vector.extract_strided_slice %111 {offsets = [0, 0], sizes = [1, 384], strides = [1, 1]} : vector<5x384xf32> to vector<1x384xf32>
    %114 = arith.mulf %112, %113 : vector<1x384xf32>
    %115 = vector.extract_strided_slice %111 {offsets = [1, 0], sizes = [1, 384], strides = [1, 1]} : vector<5x384xf32> to vector<1x384xf32>
    %116 = vector.extract_strided_slice %111 {offsets = [1, 0], sizes = [1, 384], strides = [1, 1]} : vector<5x384xf32> to vector<1x384xf32>
    %117 = arith.mulf %115, %116 : vector<1x384xf32>
    %118 = arith.addf %114, %117 : vector<1x384xf32>
    %119 = vector.extract_strided_slice %111 {offsets = [2, 0], sizes = [1, 384], strides = [1, 1]} : vector<5x384xf32> to vector<1x384xf32>
    %120 = vector.extract_strided_slice %111 {offsets = [2, 0], sizes = [1, 384], strides = [1, 1]} : vector<5x384xf32> to vector<1x384xf32>
    %121 = arith.mulf %119, %120 : vector<1x384xf32>
    %122 = arith.addf %118, %121 : vector<1x384xf32>
    %123 = vector.extract_strided_slice %111 {offsets = [3, 0], sizes = [1, 384], strides = [1, 1]} : vector<5x384xf32> to vector<1x384xf32>
    %124 = vector.extract_strided_slice %111 {offsets = [3, 0], sizes = [1, 384], strides = [1, 1]} : vector<5x384xf32> to vector<1x384xf32>
    %125 = arith.mulf %123, %124 : vector<1x384xf32>
    %126 = arith.addf %122, %125 : vector<1x384xf32>
    %127 = vector.extract_strided_slice %111 {offsets = [4, 0], sizes = [1, 384], strides = [1, 1]} : vector<5x384xf32> to vector<1x384xf32>
    %128 = vector.extract_strided_slice %111 {offsets = [4, 0], sizes = [1, 384], strides = [1, 1]} : vector<5x384xf32> to vector<1x384xf32>
    %129 = arith.mulf %127, %128 : vector<1x384xf32>
    %130 = arith.addf %126, %129 : vector<1x384xf32>
    %cst_32 = arith.constant 0.44721359 : f32
    %131 = vector.broadcast %cst_32 : f32 to vector<1x384xf32>
    %132 = arith.mulf %130, %131 : vector<1x384xf32>
    %cst_33 = arith.constant 9.99999993E-9 : f32
    %133 = vector.broadcast %cst_33 : f32 to vector<1x384xf32>
    %134 = arith.addf %132, %133 : vector<1x384xf32>
    %135 = math.sqrt %134 : vector<1x384xf32>
    %136 = arith.negf %135 : vector<1x384xf32>
    %137 = math.exp %136 : vector<1x384xf32>
    %cst_34 = arith.constant 1.000000e+00 : f32
    %138 = vector.broadcast %cst_34 : f32 to vector<1x384xf32>
    %139 = arith.addf %138, %137 : vector<1x384xf32>
    %140 = arith.divf %138, %139 : vector<1x384xf32>
    %141 = vector.broadcast %140 : vector<1x384xf32> to vector<5x384xf32>
    %142 = arith.mulf %141, %111 : vector<5x384xf32>
    %c20_35 = arith.constant 20 : index
    %c0_36 = arith.constant 0 : index
    %143 = vector.load %arg3[%c20_35, %c0_36] : memref<30x384xf32, #tpu.memory_space<vmem>>, vector<5x384xf32>
    tpu.vector_store %arg3[%c20_35, %c0_36], %142 {strides = array<i32>} : memref<30x384xf32, #tpu.memory_space<vmem>>, vector<5x384xf32>,
    %c25 = arith.constant 25 : index
    %c0_37 = arith.constant 0 : index
    %144 = vector.load %arg3[%c25, %c0_37] : memref<30x384xf32, #tpu.memory_space<vmem>>, vector<5x384xf32>
    %145 = vector.extract_strided_slice %144 {offsets = [0, 0], sizes = [1, 384], strides = [1, 1]} : vector<5x384xf32> to vector<1x384xf32>
    %146 = vector.extract_strided_slice %144 {offsets = [0, 0], sizes = [1, 384], strides = [1, 1]} : vector<5x384xf32> to vector<1x384xf32>
    %147 = arith.mulf %145, %146 : vector<1x384xf32>
    %148 = vector.extract_strided_slice %144 {offsets = [1, 0], sizes = [1, 384], strides = [1, 1]} : vector<5x384xf32> to vector<1x384xf32>
    %149 = vector.extract_strided_slice %144 {offsets = [1, 0], sizes = [1, 384], strides = [1, 1]} : vector<5x384xf32> to vector<1x384xf32>
    %150 = arith.mulf %148, %149 : vector<1x384xf32>
    %151 = arith.addf %147, %150 : vector<1x384xf32>
    %152 = vector.extract_strided_slice %144 {offsets = [2, 0], sizes = [1, 384], strides = [1, 1]} : vector<5x384xf32> to vector<1x384xf32>
    %153 = vector.extract_strided_slice %144 {offsets = [2, 0], sizes = [1, 384], strides = [1, 1]} : vector<5x384xf32> to vector<1x384xf32>
    %154 = arith.mulf %152, %153 : vector<1x384xf32>
    %155 = arith.addf %151, %154 : vector<1x384xf32>
    %156 = vector.extract_strided_slice %144 {offsets = [3, 0], sizes = [1, 384], strides = [1, 1]} : vector<5x384xf32> to vector<1x384xf32>
    %157 = vector.extract_strided_slice %144 {offsets = [3, 0], sizes = [1, 384], strides = [1, 1]} : vector<5x384xf32> to vector<1x384xf32>
    %158 = arith.mulf %156, %157 : vector<1x384xf32>
    %159 = arith.addf %155, %158 : vector<1x384xf32>
    %160 = vector.extract_strided_slice %144 {offsets = [4, 0], sizes = [1, 384], strides = [1, 1]} : vector<5x384xf32> to vector<1x384xf32>
    %161 = vector.extract_strided_slice %144 {offsets = [4, 0], sizes = [1, 384], strides = [1, 1]} : vector<5x384xf32> to vector<1x384xf32>
    %162 = arith.mulf %160, %161 : vector<1x384xf32>
    %163 = arith.addf %159, %162 : vector<1x384xf32>
    %cst_38 = arith.constant 0.44721359 : f32
    %164 = vector.broadcast %cst_38 : f32 to vector<1x384xf32>
    %165 = arith.mulf %163, %164 : vector<1x384xf32>
    %cst_39 = arith.constant 9.99999993E-9 : f32
    %166 = vector.broadcast %cst_39 : f32 to vector<1x384xf32>
    %167 = arith.addf %165, %166 : vector<1x384xf32>
    %168 = math.sqrt %167 : vector<1x384xf32>
    %169 = arith.negf %168 : vector<1x384xf32>
    %170 = math.exp %169 : vector<1x384xf32>
    %cst_40 = arith.constant 1.000000e+00 : f32
    %171 = vector.broadcast %cst_40 : f32 to vector<1x384xf32>
    %172 = arith.addf %171, %170 : vector<1x384xf32>
    %173 = arith.divf %171, %172 : vector<1x384xf32>
    %174 = vector.broadcast %173 : vector<1x384xf32> to vector<5x384xf32>
    %175 = arith.mulf %174, %144 : vector<5x384xf32>
    %c25_41 = arith.constant 25 : index
    %c0_42 = arith.constant 0 : index
    %176 = vector.load %arg3[%c25_41, %c0_42] : memref<30x384xf32, #tpu.memory_space<vmem>>, vector<5x384xf32>
    tpu.vector_store %arg3[%c25_41, %c0_42], %175 {strides = array<i32>} : memref<30x384xf32, #tpu.memory_space<vmem>>, vector<5x384xf32>,
    %c0_43 = arith.constant 0 : index
    %c0_44 = arith.constant 0 : index
    %177 = vector.load %arg3[%c0_43, %c0_44] : memref<30x384xf32, #tpu.memory_space<vmem>>, vector<30x384xf32>
    %178 = tpu.transpose %177, [1, 0] : vector<30x384xf32> -> vector<384x30xf32>
    %c0_45 = arith.constant 0 : index
    %c0_46 = arith.constant 0 : index
    %179 = vector.load %arg2[%c0_45, %c0_46] : memref<384x30xf32, #tpu.memory_space<vmem>>, vector<384x30xf32>
    tpu.vector_store %arg2[%c0_45, %c0_46], %178 {strides = array<i32>} : memref<384x30xf32, #tpu.memory_space<vmem>>, vector<384x30xf32>,
    return
  }
  func.func @transform_0(%arg0: i32) -> (i32, i32) {
    %c0_i32 = arith.constant 0 : i32
    %c0_i32_0 = arith.constant 0 : i32
    return %arg0, %c0_i32 : i32, i32
  }
  func.func @transform_1(%arg0: i32) -> (i32, i32) {
    %c0_i32 = arith.constant 0 : i32
    %c0_i32_0 = arith.constant 0 : i32
    return %arg0, %c0_i32 : i32, i32
  }
}

module attributes {stable_mosaic.version = 11 : i64} {
  func.func @_norm_act_kernel_dn(%arg0: i32, %arg1: memref<30x384xf32, #tpu.memory_space<vmem>>, %arg2: memref<30x384xf32, #tpu.memory_space<vmem>>) attributes {dimension_semantics = [#tpu.dimension_semantics<parallel>], iteration_bounds = array<i64: 1>, scalar_prefetch = 0 : i64, scratch_operands = 0 : i64, tpu.core_type = #tpu.core_type<tc>, window_params = [{transform_indices = @transform_0, window_bounds = array<i64: 30, 384>}, {transform_indices = @transform_1, window_bounds = array<i64: 30, 384>}]} {
    %c0 = arith.constant 0 : index
    %c0_0 = arith.constant 0 : index
    %0 = vector.load %arg1[%c0, %c0_0] : memref<30x384xf32, #tpu.memory_space<vmem>>, vector<8x384xf32>
    %1 = arith.negf %0 : vector<8x384xf32>
    %2 = math.exp %1 : vector<8x384xf32>
    %cst = arith.constant 1.000000e+00 : f32
    %3 = vector.broadcast %cst : f32 to vector<8x384xf32>
    %4 = arith.addf %3, %2 : vector<8x384xf32>
    %5 = arith.divf %3, %4 : vector<8x384xf32>
    %6 = arith.mulf %0, %5 : vector<8x384xf32>
    %c0_1 = arith.constant 0 : index
    %c0_2 = arith.constant 0 : index
    %7 = vector.load %arg2[%c0_1, %c0_2] : memref<30x384xf32, #tpu.memory_space<vmem>>, vector<8x384xf32>
    tpu.vector_store %arg2[%c0_1, %c0_2], %6 {strides = array<i32>} : memref<30x384xf32, #tpu.memory_space<vmem>>, vector<8x384xf32>,
    %c8 = arith.constant 8 : index
    %c0_3 = arith.constant 0 : index
    %8 = vector.load %arg1[%c8, %c0_3] : memref<30x384xf32, #tpu.memory_space<vmem>>, vector<3x384xf32>
    %9 = vector.extract_strided_slice %8 {offsets = [0, 0], sizes = [1, 384], strides = [1, 1]} : vector<3x384xf32> to vector<1x384xf32>
    %10 = vector.extract_strided_slice %8 {offsets = [0, 0], sizes = [1, 384], strides = [1, 1]} : vector<3x384xf32> to vector<1x384xf32>
    %11 = arith.mulf %9, %10 : vector<1x384xf32>
    %12 = vector.extract_strided_slice %8 {offsets = [1, 0], sizes = [1, 384], strides = [1, 1]} : vector<3x384xf32> to vector<1x384xf32>
    %13 = vector.extract_strided_slice %8 {offsets = [1, 0], sizes = [1, 384], strides = [1, 1]} : vector<3x384xf32> to vector<1x384xf32>
    %14 = arith.mulf %12, %13 : vector<1x384xf32>
    %15 = arith.addf %11, %14 : vector<1x384xf32>
    %16 = vector.extract_strided_slice %8 {offsets = [2, 0], sizes = [1, 384], strides = [1, 1]} : vector<3x384xf32> to vector<1x384xf32>
    %17 = vector.extract_strided_slice %8 {offsets = [2, 0], sizes = [1, 384], strides = [1, 1]} : vector<3x384xf32> to vector<1x384xf32>
    %18 = arith.mulf %16, %17 : vector<1x384xf32>
    %19 = arith.addf %15, %18 : vector<1x384xf32>
    %cst_4 = arith.constant 0.577350259 : f32
    %20 = vector.broadcast %cst_4 : f32 to vector<1x384xf32>
    %21 = arith.mulf %19, %20 : vector<1x384xf32>
    %cst_5 = arith.constant 9.99999993E-9 : f32
    %22 = vector.broadcast %cst_5 : f32 to vector<1x384xf32>
    %23 = arith.addf %21, %22 : vector<1x384xf32>
    %24 = math.sqrt %23 : vector<1x384xf32>
    %25 = arith.negf %24 : vector<1x384xf32>
    %26 = math.exp %25 : vector<1x384xf32>
    %cst_6 = arith.constant 1.000000e+00 : f32
    %27 = vector.broadcast %cst_6 : f32 to vector<1x384xf32>
    %28 = arith.addf %27, %26 : vector<1x384xf32>
    %29 = arith.divf %27, %28 : vector<1x384xf32>
    %30 = vector.broadcast %29 : vector<1x384xf32> to vector<3x384xf32>
    %31 = arith.mulf %30, %8 : vector<3x384xf32>
    %c8_7 = arith.constant 8 : index
    %c0_8 = arith.constant 0 : index
    %32 = vector.load %arg2[%c8_7, %c0_8] : memref<30x384xf32, #tpu.memory_space<vmem>>, vector<3x384xf32>
    tpu.vector_store %arg2[%c8_7, %c0_8], %31 {strides = array<i32>} : memref<30x384xf32, #tpu.memory_space<vmem>>, vector<3x384xf32>,
    %c11 = arith.constant 11 : index
    %c0_9 = arith.constant 0 : index
    %33 = vector.load %arg1[%c11, %c0_9] : memref<30x384xf32, #tpu.memory_space<vmem>>, vector<3x384xf32>
    %34 = vector.extract_strided_slice %33 {offsets = [0, 0], sizes = [1, 384], strides = [1, 1]} : vector<3x384xf32> to vector<1x384xf32>
    %35 = vector.extract_strided_slice %33 {offsets = [0, 0], sizes = [1, 384], strides = [1, 1]} : vector<3x384xf32> to vector<1x384xf32>
    %36 = arith.mulf %34, %35 : vector<1x384xf32>
    %37 = vector.extract_strided_slice %33 {offsets = [1, 0], sizes = [1, 384], strides = [1, 1]} : vector<3x384xf32> to vector<1x384xf32>
    %38 = vector.extract_strided_slice %33 {offsets = [1, 0], sizes = [1, 384], strides = [1, 1]} : vector<3x384xf32> to vector<1x384xf32>
    %39 = arith.mulf %37, %38 : vector<1x384xf32>
    %40 = arith.addf %36, %39 : vector<1x384xf32>
    %41 = vector.extract_strided_slice %33 {offsets = [2, 0], sizes = [1, 384], strides = [1, 1]} : vector<3x384xf32> to vector<1x384xf32>
    %42 = vector.extract_strided_slice %33 {offsets = [2, 0], sizes = [1, 384], strides = [1, 1]} : vector<3x384xf32> to vector<1x384xf32>
    %43 = arith.mulf %41, %42 : vector<1x384xf32>
    %44 = arith.addf %40, %43 : vector<1x384xf32>
    %cst_10 = arith.constant 0.577350259 : f32
    %45 = vector.broadcast %cst_10 : f32 to vector<1x384xf32>
    %46 = arith.mulf %44, %45 : vector<1x384xf32>
    %cst_11 = arith.constant 9.99999993E-9 : f32
    %47 = vector.broadcast %cst_11 : f32 to vector<1x384xf32>
    %48 = arith.addf %46, %47 : vector<1x384xf32>
    %49 = math.sqrt %48 : vector<1x384xf32>
    %50 = arith.negf %49 : vector<1x384xf32>
    %51 = math.exp %50 : vector<1x384xf32>
    %cst_12 = arith.constant 1.000000e+00 : f32
    %52 = vector.broadcast %cst_12 : f32 to vector<1x384xf32>
    %53 = arith.addf %52, %51 : vector<1x384xf32>
    %54 = arith.divf %52, %53 : vector<1x384xf32>
    %55 = vector.broadcast %54 : vector<1x384xf32> to vector<3x384xf32>
    %56 = arith.mulf %55, %33 : vector<3x384xf32>
    %c11_13 = arith.constant 11 : index
    %c0_14 = arith.constant 0 : index
    %57 = vector.load %arg2[%c11_13, %c0_14] : memref<30x384xf32, #tpu.memory_space<vmem>>, vector<3x384xf32>
    tpu.vector_store %arg2[%c11_13, %c0_14], %56 {strides = array<i32>} : memref<30x384xf32, #tpu.memory_space<vmem>>, vector<3x384xf32>,
    %c14 = arith.constant 14 : index
    %c0_15 = arith.constant 0 : index
    %58 = vector.load %arg1[%c14, %c0_15] : memref<30x384xf32, #tpu.memory_space<vmem>>, vector<3x384xf32>
    %59 = vector.extract_strided_slice %58 {offsets = [0, 0], sizes = [1, 384], strides = [1, 1]} : vector<3x384xf32> to vector<1x384xf32>
    %60 = vector.extract_strided_slice %58 {offsets = [0, 0], sizes = [1, 384], strides = [1, 1]} : vector<3x384xf32> to vector<1x384xf32>
    %61 = arith.mulf %59, %60 : vector<1x384xf32>
    %62 = vector.extract_strided_slice %58 {offsets = [1, 0], sizes = [1, 384], strides = [1, 1]} : vector<3x384xf32> to vector<1x384xf32>
    %63 = vector.extract_strided_slice %58 {offsets = [1, 0], sizes = [1, 384], strides = [1, 1]} : vector<3x384xf32> to vector<1x384xf32>
    %64 = arith.mulf %62, %63 : vector<1x384xf32>
    %65 = arith.addf %61, %64 : vector<1x384xf32>
    %66 = vector.extract_strided_slice %58 {offsets = [2, 0], sizes = [1, 384], strides = [1, 1]} : vector<3x384xf32> to vector<1x384xf32>
    %67 = vector.extract_strided_slice %58 {offsets = [2, 0], sizes = [1, 384], strides = [1, 1]} : vector<3x384xf32> to vector<1x384xf32>
    %68 = arith.mulf %66, %67 : vector<1x384xf32>
    %69 = arith.addf %65, %68 : vector<1x384xf32>
    %cst_16 = arith.constant 0.577350259 : f32
    %70 = vector.broadcast %cst_16 : f32 to vector<1x384xf32>
    %71 = arith.mulf %69, %70 : vector<1x384xf32>
    %cst_17 = arith.constant 9.99999993E-9 : f32
    %72 = vector.broadcast %cst_17 : f32 to vector<1x384xf32>
    %73 = arith.addf %71, %72 : vector<1x384xf32>
    %74 = math.sqrt %73 : vector<1x384xf32>
    %75 = arith.negf %74 : vector<1x384xf32>
    %76 = math.exp %75 : vector<1x384xf32>
    %cst_18 = arith.constant 1.000000e+00 : f32
    %77 = vector.broadcast %cst_18 : f32 to vector<1x384xf32>
    %78 = arith.addf %77, %76 : vector<1x384xf32>
    %79 = arith.divf %77, %78 : vector<1x384xf32>
    %80 = vector.broadcast %79 : vector<1x384xf32> to vector<3x384xf32>
    %81 = arith.mulf %80, %58 : vector<3x384xf32>
    %c14_19 = arith.constant 14 : index
    %c0_20 = arith.constant 0 : index
    %82 = vector.load %arg2[%c14_19, %c0_20] : memref<30x384xf32, #tpu.memory_space<vmem>>, vector<3x384xf32>
    tpu.vector_store %arg2[%c14_19, %c0_20], %81 {strides = array<i32>} : memref<30x384xf32, #tpu.memory_space<vmem>>, vector<3x384xf32>,
    %c17 = arith.constant 17 : index
    %c0_21 = arith.constant 0 : index
    %83 = vector.load %arg1[%c17, %c0_21] : memref<30x384xf32, #tpu.memory_space<vmem>>, vector<3x384xf32>
    %84 = vector.extract_strided_slice %83 {offsets = [0, 0], sizes = [1, 384], strides = [1, 1]} : vector<3x384xf32> to vector<1x384xf32>
    %85 = vector.extract_strided_slice %83 {offsets = [0, 0], sizes = [1, 384], strides = [1, 1]} : vector<3x384xf32> to vector<1x384xf32>
    %86 = arith.mulf %84, %85 : vector<1x384xf32>
    %87 = vector.extract_strided_slice %83 {offsets = [1, 0], sizes = [1, 384], strides = [1, 1]} : vector<3x384xf32> to vector<1x384xf32>
    %88 = vector.extract_strided_slice %83 {offsets = [1, 0], sizes = [1, 384], strides = [1, 1]} : vector<3x384xf32> to vector<1x384xf32>
    %89 = arith.mulf %87, %88 : vector<1x384xf32>
    %90 = arith.addf %86, %89 : vector<1x384xf32>
    %91 = vector.extract_strided_slice %83 {offsets = [2, 0], sizes = [1, 384], strides = [1, 1]} : vector<3x384xf32> to vector<1x384xf32>
    %92 = vector.extract_strided_slice %83 {offsets = [2, 0], sizes = [1, 384], strides = [1, 1]} : vector<3x384xf32> to vector<1x384xf32>
    %93 = arith.mulf %91, %92 : vector<1x384xf32>
    %94 = arith.addf %90, %93 : vector<1x384xf32>
    %cst_22 = arith.constant 0.577350259 : f32
    %95 = vector.broadcast %cst_22 : f32 to vector<1x384xf32>
    %96 = arith.mulf %94, %95 : vector<1x384xf32>
    %cst_23 = arith.constant 9.99999993E-9 : f32
    %97 = vector.broadcast %cst_23 : f32 to vector<1x384xf32>
    %98 = arith.addf %96, %97 : vector<1x384xf32>
    %99 = math.sqrt %98 : vector<1x384xf32>
    %100 = arith.negf %99 : vector<1x384xf32>
    %101 = math.exp %100 : vector<1x384xf32>
    %cst_24 = arith.constant 1.000000e+00 : f32
    %102 = vector.broadcast %cst_24 : f32 to vector<1x384xf32>
    %103 = arith.addf %102, %101 : vector<1x384xf32>
    %104 = arith.divf %102, %103 : vector<1x384xf32>
    %105 = vector.broadcast %104 : vector<1x384xf32> to vector<3x384xf32>
    %106 = arith.mulf %105, %83 : vector<3x384xf32>
    %c17_25 = arith.constant 17 : index
    %c0_26 = arith.constant 0 : index
    %107 = vector.load %arg2[%c17_25, %c0_26] : memref<30x384xf32, #tpu.memory_space<vmem>>, vector<3x384xf32>
    tpu.vector_store %arg2[%c17_25, %c0_26], %106 {strides = array<i32>} : memref<30x384xf32, #tpu.memory_space<vmem>>, vector<3x384xf32>,
    %c20 = arith.constant 20 : index
    %c0_27 = arith.constant 0 : index
    %108 = vector.load %arg1[%c20, %c0_27] : memref<30x384xf32, #tpu.memory_space<vmem>>, vector<5x384xf32>
    %109 = vector.extract_strided_slice %108 {offsets = [0, 0], sizes = [1, 384], strides = [1, 1]} : vector<5x384xf32> to vector<1x384xf32>
    %110 = vector.extract_strided_slice %108 {offsets = [0, 0], sizes = [1, 384], strides = [1, 1]} : vector<5x384xf32> to vector<1x384xf32>
    %111 = arith.mulf %109, %110 : vector<1x384xf32>
    %112 = vector.extract_strided_slice %108 {offsets = [1, 0], sizes = [1, 384], strides = [1, 1]} : vector<5x384xf32> to vector<1x384xf32>
    %113 = vector.extract_strided_slice %108 {offsets = [1, 0], sizes = [1, 384], strides = [1, 1]} : vector<5x384xf32> to vector<1x384xf32>
    %114 = arith.mulf %112, %113 : vector<1x384xf32>
    %115 = arith.addf %111, %114 : vector<1x384xf32>
    %116 = vector.extract_strided_slice %108 {offsets = [2, 0], sizes = [1, 384], strides = [1, 1]} : vector<5x384xf32> to vector<1x384xf32>
    %117 = vector.extract_strided_slice %108 {offsets = [2, 0], sizes = [1, 384], strides = [1, 1]} : vector<5x384xf32> to vector<1x384xf32>
    %118 = arith.mulf %116, %117 : vector<1x384xf32>
    %119 = arith.addf %115, %118 : vector<1x384xf32>
    %120 = vector.extract_strided_slice %108 {offsets = [3, 0], sizes = [1, 384], strides = [1, 1]} : vector<5x384xf32> to vector<1x384xf32>
    %121 = vector.extract_strided_slice %108 {offsets = [3, 0], sizes = [1, 384], strides = [1, 1]} : vector<5x384xf32> to vector<1x384xf32>
    %122 = arith.mulf %120, %121 : vector<1x384xf32>
    %123 = arith.addf %119, %122 : vector<1x384xf32>
    %124 = vector.extract_strided_slice %108 {offsets = [4, 0], sizes = [1, 384], strides = [1, 1]} : vector<5x384xf32> to vector<1x384xf32>
    %125 = vector.extract_strided_slice %108 {offsets = [4, 0], sizes = [1, 384], strides = [1, 1]} : vector<5x384xf32> to vector<1x384xf32>
    %126 = arith.mulf %124, %125 : vector<1x384xf32>
    %127 = arith.addf %123, %126 : vector<1x384xf32>
    %cst_28 = arith.constant 0.44721359 : f32
    %128 = vector.broadcast %cst_28 : f32 to vector<1x384xf32>
    %129 = arith.mulf %127, %128 : vector<1x384xf32>
    %cst_29 = arith.constant 9.99999993E-9 : f32
    %130 = vector.broadcast %cst_29 : f32 to vector<1x384xf32>
    %131 = arith.addf %129, %130 : vector<1x384xf32>
    %132 = math.sqrt %131 : vector<1x384xf32>
    %133 = arith.negf %132 : vector<1x384xf32>
    %134 = math.exp %133 : vector<1x384xf32>
    %cst_30 = arith.constant 1.000000e+00 : f32
    %135 = vector.broadcast %cst_30 : f32 to vector<1x384xf32>
    %136 = arith.addf %135, %134 : vector<1x384xf32>
    %137 = arith.divf %135, %136 : vector<1x384xf32>
    %138 = vector.broadcast %137 : vector<1x384xf32> to vector<5x384xf32>
    %139 = arith.mulf %138, %108 : vector<5x384xf32>
    %c20_31 = arith.constant 20 : index
    %c0_32 = arith.constant 0 : index
    %140 = vector.load %arg2[%c20_31, %c0_32] : memref<30x384xf32, #tpu.memory_space<vmem>>, vector<5x384xf32>
    tpu.vector_store %arg2[%c20_31, %c0_32], %139 {strides = array<i32>} : memref<30x384xf32, #tpu.memory_space<vmem>>, vector<5x384xf32>,
    %c25 = arith.constant 25 : index
    %c0_33 = arith.constant 0 : index
    %141 = vector.load %arg1[%c25, %c0_33] : memref<30x384xf32, #tpu.memory_space<vmem>>, vector<5x384xf32>
    %142 = vector.extract_strided_slice %141 {offsets = [0, 0], sizes = [1, 384], strides = [1, 1]} : vector<5x384xf32> to vector<1x384xf32>
    %143 = vector.extract_strided_slice %141 {offsets = [0, 0], sizes = [1, 384], strides = [1, 1]} : vector<5x384xf32> to vector<1x384xf32>
    %144 = arith.mulf %142, %143 : vector<1x384xf32>
    %145 = vector.extract_strided_slice %141 {offsets = [1, 0], sizes = [1, 384], strides = [1, 1]} : vector<5x384xf32> to vector<1x384xf32>
    %146 = vector.extract_strided_slice %141 {offsets = [1, 0], sizes = [1, 384], strides = [1, 1]} : vector<5x384xf32> to vector<1x384xf32>
    %147 = arith.mulf %145, %146 : vector<1x384xf32>
    %148 = arith.addf %144, %147 : vector<1x384xf32>
    %149 = vector.extract_strided_slice %141 {offsets = [2, 0], sizes = [1, 384], strides = [1, 1]} : vector<5x384xf32> to vector<1x384xf32>
    %150 = vector.extract_strided_slice %141 {offsets = [2, 0], sizes = [1, 384], strides = [1, 1]} : vector<5x384xf32> to vector<1x384xf32>
    %151 = arith.mulf %149, %150 : vector<1x384xf32>
    %152 = arith.addf %148, %151 : vector<1x384xf32>
    %153 = vector.extract_strided_slice %141 {offsets = [3, 0], sizes = [1, 384], strides = [1, 1]} : vector<5x384xf32> to vector<1x384xf32>
    %154 = vector.extract_strided_slice %141 {offsets = [3, 0], sizes = [1, 384], strides = [1, 1]} : vector<5x384xf32> to vector<1x384xf32>
    %155 = arith.mulf %153, %154 : vector<1x384xf32>
    %156 = arith.addf %152, %155 : vector<1x384xf32>
    %157 = vector.extract_strided_slice %141 {offsets = [4, 0], sizes = [1, 384], strides = [1, 1]} : vector<5x384xf32> to vector<1x384xf32>
    %158 = vector.extract_strided_slice %141 {offsets = [4, 0], sizes = [1, 384], strides = [1, 1]} : vector<5x384xf32> to vector<1x384xf32>
    %159 = arith.mulf %157, %158 : vector<1x384xf32>
    %160 = arith.addf %156, %159 : vector<1x384xf32>
    %cst_34 = arith.constant 0.44721359 : f32
    %161 = vector.broadcast %cst_34 : f32 to vector<1x384xf32>
    %162 = arith.mulf %160, %161 : vector<1x384xf32>
    %cst_35 = arith.constant 9.99999993E-9 : f32
    %163 = vector.broadcast %cst_35 : f32 to vector<1x384xf32>
    %164 = arith.addf %162, %163 : vector<1x384xf32>
    %165 = math.sqrt %164 : vector<1x384xf32>
    %166 = arith.negf %165 : vector<1x384xf32>
    %167 = math.exp %166 : vector<1x384xf32>
    %cst_36 = arith.constant 1.000000e+00 : f32
    %168 = vector.broadcast %cst_36 : f32 to vector<1x384xf32>
    %169 = arith.addf %168, %167 : vector<1x384xf32>
    %170 = arith.divf %168, %169 : vector<1x384xf32>
    %171 = vector.broadcast %170 : vector<1x384xf32> to vector<5x384xf32>
    %172 = arith.mulf %171, %141 : vector<5x384xf32>
    %c25_37 = arith.constant 25 : index
    %c0_38 = arith.constant 0 : index
    %173 = vector.load %arg2[%c25_37, %c0_38] : memref<30x384xf32, #tpu.memory_space<vmem>>, vector<5x384xf32>
    tpu.vector_store %arg2[%c25_37, %c0_38], %172 {strides = array<i32>} : memref<30x384xf32, #tpu.memory_space<vmem>>, vector<5x384xf32>,
    return
  }
  func.func @transform_0(%arg0: i32) -> (i32, i32) {
    %c0_i32 = arith.constant 0 : i32
    %c0_i32_0 = arith.constant 0 : i32
    return %c0_i32, %arg0 : i32, i32
  }
  func.func @transform_1(%arg0: i32) -> (i32, i32) {
    %c0_i32 = arith.constant 0 : i32
    %c0_i32_0 = arith.constant 0 : i32
    return %c0_i32, %arg0 : i32, i32
  }
}

</mosaic_0001>

<bundles_post_ra>
// kernel: tpu_custom_call.1
= control target key start
LH: loop header
LB: loop body
LE: loop exit
PB: predicated region body
PF: predicated region fallthrough
CT: control target
= control target key end

     0   :  { %s2509_s0 = inlined_call_operand.vmem [shape: f32[300,30], index: 0, kind: input, shape index: {}]   ;;  %s2510_s1 = inlined_call_operand.vmem [shape: f32[300,30], index: 1, kind: output, shape index: {}]  }
   0x1   :  { %v40_v0 = vld [vmem:[%s2509_s0 + $0x100] sm:$0xff]  ;;  %v41_v3 = vld [vmem:[%s2509_s0 + $0x108] sm:$0xff]  ;;  %v42_v6 = vld [vmem:[%s2509_s0 + $0x110] sm:$0xff] }
   0x2   :  { %v24_v1 = vld [vmem:[%s2509_s0 + $0x80] sm:$0xff]  ;;  %120 = vxpose.xlu2.b32.start [1/16] (narrow) %v40_v0, 32  ;;  %v25_v4 = vld [vmem:[%s2509_s0 + $0x88] sm:$0xff]  ;;  %v26_v7 = vld [vmem:[%s2509_s0 + $0x90] sm:$0xff] }
   0x3   :  { %v8_v2 = vld [vmem:[%s2509_s0] sm:$0xff]  ;;  %88 = vxpose.xlu1.b32.start [1/16] (narrow) %v24_v1, 32  ;;  %v9_v5 = vld [vmem:[%s2509_s0 + $0x8] sm:$0xff]  ;;  %v10_v8 = vld [vmem:[%s2509_s0 + $0x10] sm:$0xff] }
   0x4   :  { %56 = vxpose.xlu0.b32.start [1/16] (narrow) %v8_v2, 32  ;;  %v43_v9 = vld [vmem:[%s2509_s0 + $0x118] sm:$0xff]  ;;  %v44_v12 = vld [vmem:[%s2509_s0 + $0x120] sm:$0xff]  ;;  %v45_v15 = vld [vmem:[%s2509_s0 + $0x128] sm:$0xff] }
   0x5   :  { %v27_v10 = vld [vmem:[%s2509_s0 + $0x98] sm:$0xff]  ;;  %v28_v13 = vld [vmem:[%s2509_s0 + $0xa0] sm:$0xff]  ;;  %v29_v16 = vld [vmem:[%s2509_s0 + $0xa8] sm:$0xff] }
   0x6   :  { %v11_v11 = vld [vmem:[%s2509_s0 + $0x18] sm:$0xff]  ;;  %v12_v14 = vld [vmem:[%s2509_s0 + $0x20] sm:$0xff]  ;;  %v13_v17 = vld [vmem:[%s2509_s0 + $0x28] sm:$0xff] }
   0x7   :  { %v46_v18 = vld [vmem:[%s2509_s0 + $0x130] sm:$0xff]  ;;  %v47_v21 = vld [vmem:[%s2509_s0 + $0x138] sm:$0xff]  ;;  %v48_v24 = vld [vmem:[%s2509_s0 + $0x140] sm:$0xff] }
   0x8   :  { %v30_v19 = vld [vmem:[%s2509_s0 + $0xb0] sm:$0xff]  ;;  %v31_v22 = vld [vmem:[%s2509_s0 + $0xb8] sm:$0xff]  ;;  %v32_v25 = vld [vmem:[%s2509_s0 + $0xc0] sm:$0xff] }
   0x9   :  { %v14_v20 = vld [vmem:[%s2509_s0 + $0x30] sm:$0xff]  ;;  %v15_v23 = vld [vmem:[%s2509_s0 + $0x38] sm:$0xff]  ;;  %v16_v26 = vld [vmem:[%s2509_s0 + $0x40] sm:$0xff] }
   0xa   :  { %121 = vxpose.xlu2.b32.cont [2/16] (narrow) %v41_v3, 32  ;;  %v49_v27 = vld [vmem:[%s2509_s0 + $0x148] sm:$0xff]  ;;  %v50_v30 = vld [vmem:[%s2509_s0 + $0x150] sm:$0xff]  ;;  %v51_v33 = vld [vmem:[%s2509_s0 + $0x158] sm:$0xff] }
   0xb   :  { %89 = vxpose.xlu1.b32.cont [2/16] (narrow) %v25_v4, 32  ;;  %v33_v28 = vld [vmem:[%s2509_s0 + $0xc8] sm:$0xff]  ;;  %v34_v31 = vld [vmem:[%s2509_s0 + $0xd0] sm:$0xff]  ;;  %v35_v34 = vld [vmem:[%s2509_s0 + $0xd8] sm:$0xff] }
   0xc   :  { %57 = vxpose.xlu0.b32.cont [2/16] (narrow) %v9_v5, 32  ;;  %v17_v29 = vld [vmem:[%s2509_s0 + $0x48] sm:$0xff]  ;;  %v18_v32 = vld [vmem:[%s2509_s0 + $0x50] sm:$0xff]  ;;  %v19_v35 = vld [vmem:[%s2509_s0 + $0x58] sm:$0xff] }
   0xd   :  { %v52_v36 = vld [vmem:[%s2509_s0 + $0x160] sm:$0xff]  ;;  %v53_v39 = vld [vmem:[%s2509_s0 + $0x168] sm:$0xff]  ;;  %v54_v42 = vld [vmem:[%s2509_s0 + $0x170] sm:$0xff] }
   0xe   :  { %v36_v37 = vld [vmem:[%s2509_s0 + $0xe0] sm:$0xff]  ;;  %v37_v40 = vld [vmem:[%s2509_s0 + $0xe8] sm:$0xff]  ;;  %v38_v43 = vld [vmem:[%s2509_s0 + $0xf0] sm:$0xff] }
   0xf   :  { %v20_v38 = vld [vmem:[%s2509_s0 + $0x60] sm:$0xff]  ;;  %v21_v41 = vld [vmem:[%s2509_s0 + $0x68] sm:$0xff]  ;;  %v22_v44 = vld [vmem:[%s2509_s0 + $0x70] sm:$0xff] }
  0x10   :  { %v55_v45 = vld [vmem:[%s2509_s0 + $0x178] sm:$0xff] }
  0x11   :  { %v39_v46 = vld [vmem:[%s2509_s0 + $0xf8] sm:$0xff] }
  0x12   :  { %122 = vxpose.xlu2.b32.cont [3/16] (narrow) %v42_v6, 32  ;;  %v23_v47 = vld [vmem:[%s2509_s0 + $0x78] sm:$0xff] }
  0x13   :  { %90 = vxpose.xlu1.b32.cont [3/16] (narrow) %v26_v7, 32 }
  0x14   :  { %58 = vxpose.xlu0.b32.cont [3/16] (narrow) %v10_v8, 32 }
  0x1a   :  { %123 = vxpose.xlu2.b32.cont [4/16] (narrow) %v43_v9, 32 }
  0x1b   :  { %91 = vxpose.xlu1.b32.cont [4/16] (narrow) %v27_v10, 32 }
  0x1c   :  { %59 = vxpose.xlu0.b32.cont [4/16] (narrow) %v11_v11, 32 }
  0x22   :  { %124 = vxpose.xlu2.b32.cont [5/16] (narrow) %v44_v12, 32 }
  0x23   :  { %92 = vxpose.xlu1.b32.cont [5/16] (narrow) %v28_v13, 32 }
  0x24   :  { %60 = vxpose.xlu0.b32.cont [5/16] (narrow) %v12_v14, 32 }
  0x2a   :  { %125 = vxpose.xlu2.b32.cont [6/16] (narrow) %v45_v15, 32 }
  0x2b   :  { %93 = vxpose.xlu1.b32.cont [6/16] (narrow) %v29_v16, 32 }
  0x2c   :  { %61 = vxpose.xlu0.b32.cont [6/16] (narrow) %v13_v17, 32 }
  0x32   :  { %126 = vxpose.xlu2.b32.cont [7/16] (narrow) %v46_v18, 32 }
  0x33   :  { %94 = vxpose.xlu1.b32.cont [7/16] (narrow) %v30_v19, 32 }
  0x34   :  { %62 = vxpose.xlu0.b32.cont [7/16] (narrow) %v14_v20, 32 }
  0x3a   :  { %127 = vxpose.xlu2.b32.cont [8/16] (narrow) %v47_v21, 32 }
  0x3b   :  { %95 = vxpose.xlu1.b32.cont [8/16] (narrow) %v31_v22, 32 }
  0x3c   :  { %63 = vxpose.xlu0.b32.cont [8/16] (narrow) %v15_v23, 32 }
  0x42   :  { %128 = vxpose.xlu2.b32.cont [9/16] (narrow) %v48_v24, 32 }
  0x43   :  { %96 = vxpose.xlu1.b32.cont [9/16] (narrow) %v32_v25, 32 }
  0x44   :  { %64 = vxpose.xlu0.b32.cont [9/16] (narrow) %v16_v26, 32 }
  0x4a   :  { %129 = vxpose.xlu2.b32.cont [10/16] (narrow) %v49_v27, 32 }
  0x4b   :  { %97 = vxpose.xlu1.b32.cont [10/16] (narrow) %v33_v28, 32 }
  0x4c   :  { %65 = vxpose.xlu0.b32.cont [10/16] (narrow) %v17_v29, 32 }
  0x52   :  { %130 = vxpose.xlu2.b32.cont [11/16] (narrow) %v50_v30, 32 }
  0x53   :  { %98 = vxpose.xlu1.b32.cont [11/16] (narrow) %v34_v31, 32 }
  0x54   :  { %66 = vxpose.xlu0.b32.cont [11/16] (narrow) %v18_v32, 32 }
  0x5a   :  { %131 = vxpose.xlu2.b32.cont [12/16] (narrow) %v51_v33, 32 }
  0x5b   :  { %99 = vxpose.xlu1.b32.cont [12/16] (narrow) %v35_v34, 32 }
  0x5c   :  { %67 = vxpose.xlu0.b32.cont [12/16] (narrow) %v19_v35, 32 }
  0x62   :  { %132 = vxpose.xlu2.b32.cont [13/16] (narrow) %v52_v36, 32 }
  0x63   :  { %100 = vxpose.xlu1.b32.cont [13/16] (narrow) %v36_v37, 32 }
  0x64   :  { %68 = vxpose.xlu0.b32.cont [13/16] (narrow) %v20_v38, 32 }
  0x6a   :  { %133 = vxpose.xlu2.b32.cont [14/16] (narrow) %v53_v39, 32 }
  0x6b   :  { %101 = vxpose.xlu1.b32.cont [14/16] (narrow) %v37_v40, 32 }
  0x6c   :  { %69 = vxpose.xlu0.b32.cont [14/16] (narrow) %v21_v41, 32 }
  0x72   :  { %134 = vxpose.xlu2.b32.cont [15/16] (narrow) %v54_v42, 32 }
  0x73   :  { %102 = vxpose.xlu1.b32.cont [15/16] (narrow) %v38_v43, 32 }
  0x74   :  { %70 = vxpose.xlu0.b32.cont [15/16] (narrow) %v22_v44, 32 }
  0x7a   :  { %135 = vxpose.xlu2.b32.end [16/16] (narrow) %v55_v45, 32 }
  0x7b   :  { %103 = vxpose.xlu1.b32.end [16/16] (narrow) %v39_v46, 32 }
  0x7c   :  { %71 = vxpose.xlu0.b32.end [16/16] (narrow) %v23_v47, 32 }
  0x9b   :  { %v1748_v48 = vpop.trf.xlu2 }
  0x9c   :  { %v1454_v49 = vmul.f32 -1.442695, %v1748_v48 }
  0x9e   :  { %1474 = vpow2.f32 %v1454_v49 }
  0xa3   :  { %v137_v50 = vpop.trf.xlu2 }
  0xa4   :  { %v1475_v51 = vpop.eup %1474  ;;  %157 = vst [vmem:[#allocation2 + $0x20] sm:$0xff] %v137_v50 }
  0xa5   :  { %v178_v52 = vadd.f32 1.0, %v1475_v51 }
  0xa7   :  { %v1751_v53 = vpop.trf.xlu1  ;;  %1476 = vrcp.f32 %v178_v52  ;;  %vm214_vm0 = vweird.f32 %v178_v52  ;;  %v220_v4 = vand.u32 2147483648, %v178_v52  ;;  %v218_v10 = vand.u32 2147483647, %v178_v52 }
  0xa8   :  { %v1753_v54 = vpop.trf.xlu0  ;;  %v1453_v55 = vmul.f32 -1.442695, %v1751_v53 }
  0xa9   :  { %v1452_v56 = vmul.f32 -1.442695, %v1753_v54  ;;  %v221_v20 = vor.u32 1.1754944e-38, %v220_v4  ;;  %vm219_vm3 = vcmp.eq.f32.partialorder %v218_v10, 8.507059e+37 }
  0xaa   :  { %1478 = vpow2.f32 %v1453_v55 }
  0xab   :  { %v1757_v57 = vld [vmem:[#allocation2 + $0x20] sm:$0x7]  ;;  %v1759_v58 = vld [vmem:[#allocation2 + $0x20] sm:$0x38]  ;;  %1480 = vpow2.f32 %v1452_v56  ;;  %v138_v59 = vpop.trf.xlu2  ;;  %v1765_v2 = vld [vmem:[#allocation2 + $0x20] sm:$0xc0] }
  0xac   :  { %v235_v60 = vmul.f32 %v1757_v57, %v1757_v57  ;;  %v370_v61 = vmul.f32 %v1759_v58, %v1759_v58  ;;  %160 = vst [vmem:[#allocation2 + $0x28] sm:$0xff] %v138_v59  ;;  %v508_v15 = vmul.f32 %v1765_v2, %v1765_v2 }
  0xad   :  { %v1477_v62 = vpop.eup %1476 }
  0xae   :  { %v210_v63 = vmul.f32 %v1477_v62, %v178_v52  ;;  %v241_v0 = vrot.slane %v235_v60, 1  ;;  %v250_v1 = vrot.slane %v235_v60, 2  ;;  %v376_v5 = vrot.slane %v370_v61, 1 }
  0xaf   :  { %v105_v3 = vpop.trf.xlu1  ;;  %v385_v6 = vrot.slane %v370_v61, 2  ;;  %vm215_vm1 = vweird.f32 %v1477_v62  ;;  %v514_v27 = vrot.slane %v508_v15, 1 }
  0xb0   :  { %156 = vst [vmem:[#allocation2 + $0x50] sm:$0xff] %v105_v3  ;;  %v73_v7 = vpop.trf.xlu0  ;;  %v1479_v8 = vpop.eup %1478  ;;  %v211_v9 = vsub.f32 1.0, %v210_v63  ;;  %v247_v11 = vadd.f32 %v241_v0, %v235_v60  ;;  %v382_v13 = vadd.f32 %v376_v5, %v370_v61  ;;  %vm1774_vm2 = vmor %vm214_vm0, %vm215_vm1 }
  0xb1   :  { %155 = vst [vmem:[#allocation2 + $0x18] sm:$0xff] %v73_v7  ;;  %v1481_v12 = vpop.eup %1480  ;;  %v1767_v14 = vadd.f32 1.0, %v1479_v8  ;;  %v520_v40 = vadd.f32 %v514_v27, %v508_v15 }
  0xb2   :  { %v212_v16 = vmul.f32 %v1477_v62, %v211_v9  ;;  %v256_v17 = vadd.f32 %v250_v1, %v247_v11  ;;  %v1771_v18 = vadd.f32 1.0, %v1481_v12  ;;  %v391_v21 = vadd.f32 %v385_v6, %v382_v13 }
  0xb3   :  { %1482 = vrcp.f32 %v1767_v14  ;;  %v1780_v24 = vld [vmem:[#allocation2 + $0x28] sm:$0x1]  ;;  %v203_v26 = vand.u32 2147483647, %v1767_v14  ;;  %v205_v30 = vand.u32 2147483648, %v1767_v14  ;;  %v139_v38 = vpop.trf.xlu2  ;;  %vm199_vm4 = vweird.f32 %v1767_v14 }
  0xb4   :  { %v213_v22 = vadd.f32 %v1477_v62, %v212_v16  ;;  %v259_v23 = vmul.f32 0.57735026, %v256_v17  ;;  %1484 = vrcp.f32 %v1771_v18  ;;  %v394_v25 = vmul.f32 0.57735026, %v391_v21  ;;  %v1796_v37 = vld [vmem:[#allocation2 + $0x28] sm:$0xe] }
  0xb5   :  { %v188_v31 = vand.u32 2147483647, %v1771_v18  ;;  %v190_v34 = vand.u32 2147483648, %v1771_v18  ;;  %v523_v35 = vmul.f32 %v1780_v24, %v1780_v24  ;;  %vm1805_vm6 = vcmp.eq.f32.partialorder %v203_v26, 8.507059e+37  ;;  %163 = vst [vmem:[#allocation2 + $0x40] sm:$0x3f] %v139_v38 }
  0xb6   :  { %v217_v28 = vsel %vm1774_vm2, %v1477_v62, %v213_v22  ;;  %v1785_v29 = vadd.f32 1e-08, %v259_v23  ;;  %v1789_v33 = vadd.f32 1e-08, %v394_v25  ;;  %v206_v46 = vor.u32 1.1754944e-38, %v205_v30 }
  0xb7   :  { %v222_v32 = vsel %vm219_vm3, %v221_v20, %v217_v28  ;;  %v1800_v41 = vld [vmem:[#allocation2 + $0x50] sm:$0x7]  ;;  %v1802_v42 = vld [vmem:[#allocation2 + $0x50] sm:$0x38]  ;;  %vm184_vm7 = vweird.f32 %v1771_v18  ;;  %vm1813_vm8 = vcmp.eq.f32.partialorder %v188_v31, 8.507059e+37  ;;  %v191_v50 = vor.u32 1.1754944e-38, %v190_v34 }
  0xb8   :  { %v226_v36 = vmul.f32 %v222_v32, %v1748_v48  ;;  %1486 = vrsqrt.f32 %v1785_v29  ;;  %v1810_v47 = vld [vmem:[#allocation2 + $0x18] sm:$0x7]  ;;  %v529_v51 = vrot.slane %v523_v35, 2  ;;  %v655_v52 = vmul.f32 %v1796_v37, %v1796_v37  ;;  %v1843_v34 = vld [vmem:[#allocation2 + $0x18] sm:$0x38] }
  0xb9   :  { %v1483_v39 = vpop.eup %1482  ;;  %1488 = vrsqrt.f32 %v1789_v33  ;;  %v234_v56 = vmul.f32 %v1800_v41, %v1800_v41  ;;  %v369_v59 = vmul.f32 %v1802_v42, %v1802_v42  ;;  %v1825_v63 = vmul.f32 %v1810_v47, %v1810_v47 }
  0xba   :  { %v1485_v43 = vpop.eup %1484  ;;  %229 = vst [vmem:[#allocation2 + $0x58] sm:$0xff] %v226_v36  ;;  %v195_v44 = vmul.f32 %v1483_v39, %v1767_v14  ;;  %vm200_vm5 = vweird.f32 %v1483_v39  ;;  %v535_v61 = vadd.f32 %v529_v51, %v520_v40  ;;  %v661_v62 = vrot.slane %v655_v52, 1 }
  0xbb   :  { %v180_v48 = vmul.f32 %v1485_v43, %v1771_v18  ;;  %vm185_vm9 = vweird.f32 %v1485_v43  ;;  %v670_v3 = vrot.slane %v655_v52, 2  ;;  %v240_v4 = vrot.slane %v234_v56, 1  ;;  %vm201_vm10 = vmor %vm199_vm4, %vm200_vm5 }
  0xbc   :  { %v196_v55 = vsub.f32 1.0, %v195_v44  ;;  %v375_v5 = vrot.slane %v369_v59, 1  ;;  %v538_v9 = vmul.f32 0.57735026, %v535_v61  ;;  %v667_v10 = vadd.f32 %v661_v62, %v655_v52  ;;  %vm186_vm11 = vmor %vm184_vm7, %vm185_vm9 }
  0xbd   :  { %v181_v60 = vsub.f32 1.0, %v180_v48  ;;  %v246_v13 = vadd.f32 %v240_v4, %v234_v56  ;;  %v249_v15 = vrot.slane %v234_v56, 2  ;;  %v384_v32 = vrot.slane %v369_v59, 2 }
  0xbe   :  { %v1487_v0 = vpop.eup %1486  ;;  %v197_v1 = vmul.f32 %v1483_v39, %v196_v55  ;;  %v1832_v19 = vadd.f32 1e-08, %v538_v9  ;;  %v381_v20 = vadd.f32 %v375_v5, %v369_v59  ;;  %v676_v23 = vadd.f32 %v670_v3, %v667_v10 }
  0xbf   :  { %v1489_v6 = vpop.eup %1488  ;;  %v288_v7 = vmul.f32 %v1487_v0, %v1785_v29  ;;  %v182_v8 = vmul.f32 %v1485_v43, %v181_v60  ;;  %v255_v25 = vadd.f32 %v249_v15, %v246_v13  ;;  %vm294_vm12 = vcmp.eq.f32.partialorder %v1785_v29, inf }
  0xc0   :  { %v423_v11 = vmul.f32 %v1489_v6, %v1789_v33  ;;  %v198_v12 = vadd.f32 %v1483_v39, %v197_v1  ;;  %1490 = vrsqrt.f32 %v1832_v19  ;;  %vm296_vm13 = vcmp.eq.f32.partialorder %v1785_v29, 0.0 }
  0xc1   :  { %v289_v16 = vmul.f32 %v1487_v0, %v288_v7  ;;  %v183_v17 = vadd.f32 %v1485_v43, %v182_v8  ;;  %v679_v38 = vmul.f32 0.57735026, %v676_v23  ;;  %v390_v40 = vadd.f32 %v384_v32, %v381_v20 }
  0xc2   :  { %v424_v21 = vmul.f32 %v1489_v6, %v423_v11  ;;  %v202_v22 = vsel %vm201_vm10, %v1483_v39, %v198_v12  ;;  %v258_v39 = vmul.f32 0.57735026, %v255_v25  ;;  %v239_v44 = vrot.slane %v1825_v63, 1 }
  0xc3   :  { %v290_v26 = vmul.f32 0.5, %v289_v16  ;;  %v207_v27 = vsel %vm1805_vm6, %v206_v46, %v202_v22  ;;  %v187_v28 = vsel %vm186_vm11, %v1485_v43, %v183_v17  ;;  %v368_v45 = vmul.f32 %v1843_v34, %v1843_v34 }
  0xc4   :  { %v425_v14 = vmul.f32 0.5, %v424_v21  ;;  %v225_v30 = vmul.f32 %v207_v27, %v1751_v53  ;;  %v192_v31 = vsel %vm1813_vm8, %v191_v50, %v187_v28  ;;  %v297_v53 = vand.u32 2147483648, %v1785_v29 }
  0xc5   :  { %v291_v18 = vsub.f32 1.5, %v290_v26  ;;  %v224_v35 = vmul.f32 %v192_v31, %v1753_v54  ;;  %vm429_vm14 = vcmp.eq.f32.partialorder %v1789_v33, inf  ;;  %v1853_v48 = vadd.f32 1e-08, %v679_v38 }
  0xc6   :  { %v426_v36 = vsub.f32 1.5, %v425_v14  ;;  %228 = vst [vmem:[#allocation2] sm:$0xff] %v225_v30  ;;  %v1855_v54 = vadd.f32 1e-08, %v258_v39  ;;  %v1491_v49 = vpop.eup %1490  ;;  %vm431_vm15 = vcmp.eq.f32.partialorder %v1789_v33, 0.0  ;;  %v432_v51 = vand.u32 2147483648, %v1789_v33 }
  0xc7   :  { %v292_v43 = vmul.f32 %v1487_v0, %v291_v18  ;;  %227 = vst [vmem:[#allocation2 + $0x30] sm:$0xff] %v224_v35  ;;  %v393_v52 = vmul.f32 0.57735026, %v390_v40  ;;  %v567_v56 = vmul.f32 %v1491_v49, %v1832_v19  ;;  %1492 = vrsqrt.f32 %v1853_v48 }
  0xc8   :  { %v427_v46 = vmul.f32 %v1489_v6, %v426_v36  ;;  %v245_v59 = vadd.f32 %v239_v44, %v1825_v63  ;;  %1494 = vrsqrt.f32 %v1855_v54  ;;  %v374_v61 = vrot.slane %v368_v45, 1  ;;  %v1874_v6 = vld [vmem:[#allocation2 + $0x28] sm:$0xf0]  ;;  %v1897_v36 = vld [vmem:[#allocation2 + $0x40] sm:$0x1] }
  0xc9   :  { %v293_v50 = vmul.f32 %v292_v43, %v1785_v29  ;;  %v568_v1 = vmul.f32 %v1491_v49, %v567_v56  ;;  %v248_v3 = vrot.slane %v1825_v63, 2  ;;  %v1876_v9 = vadd.f32 1e-08, %v393_v52 }
  0xca   :  { %v428_v55 = vmul.f32 %v427_v46, %v1789_v33  ;;  %v380_v11 = vadd.f32 %v374_v61, %v368_v45  ;;  %v383_v13 = vrot.slane %v368_v45, 2  ;;  %v1881_v63 = vmul.f32 %v1874_v6, %v1874_v6 }
  0xcb   :  { %v295_v60 = vsel %vm294_vm12, %v1785_v29, %v293_v50  ;;  %v569_v8 = vmul.f32 0.5, %v568_v1  ;;  %v254_v10 = vadd.f32 %v248_v3, %v245_v59  ;;  %vm573_vm0 = vcmp.eq.f32.partialorder %v1832_v19, inf }
  0xcc   :  { %v298_v62 = vsel %vm296_vm13, %v297_v53, %v295_v60  ;;  %v430_v0 = vsel %vm429_vm14, %v1789_v33, %v428_v55  ;;  %v389_v21 = vadd.f32 %v383_v13, %v380_v11  ;;  %v576_v22 = vand.u32 2147483648, %v1832_v19  ;;  %v106_v11 = vpop.trf.xlu1 }
  0xcd   :  { %v1457_v4 = vmul.f32 -1.442695, %v298_v62  ;;  %v433_v5 = vsel %vm431_vm15, %v432_v51, %v430_v0  ;;  %v1493_v29 = vpop.eup %1492  ;;  %v570_v12 = vsub.f32 1.5, %v569_v8  ;;  %v257_v16 = vmul.f32 0.57735026, %v254_v10  ;;  %159 = vst [vmem:[#allocation2 + $0x38] sm:$0xff] %v106_v11 }
  0xce   :  { %v1460_v7 = vmul.f32 -1.442695, %v433_v5  ;;  %v1495_v15 = vpop.eup %1494  ;;  %v708_v33 = vmul.f32 %v1493_v29, %v1853_v48  ;;  %vm575_vm1 = vcmp.eq.f32.partialorder %v1832_v19, 0.0  ;;  %v392_v30 = vmul.f32 0.57735026, %v389_v21 }
  0xcf   :  { %1496 = vpow2.f32 %v1457_v4  ;;  %v571_v17 = vmul.f32 %v1491_v49, %v570_v12  ;;  %v276_v20 = vmul.f32 %v1495_v15, %v1855_v54  ;;  %v1887_v25 = vadd.f32 1e-08, %v257_v16 }
  0xd0   :  { %1498 = vpow2.f32 %v1460_v7  ;;  %v709_v23 = vmul.f32 %v1493_v29, %v708_v33  ;;  %vm714_vm2 = vcmp.eq.f32.partialorder %v1853_v48, inf  ;;  %v799_v35 = vrot.slane %v1881_v63, 1 }
  0xd1   :  { %1500 = vrsqrt.f32 %v1876_v9  ;;  %v572_v26 = vmul.f32 %v571_v17, %v1832_v19  ;;  %v277_v27 = vmul.f32 %v1495_v15, %v276_v20  ;;  %vm716_vm3 = vcmp.eq.f32.partialorder %v1853_v48, 0.0 }
  0xd2   :  { %v710_v14 = vmul.f32 0.5, %v709_v23  ;;  %1502 = vrsqrt.f32 %v1887_v25  ;;  %v717_v44 = vand.u32 2147483648, %v1853_v48  ;;  %vm282_vm4 = vcmp.eq.f32.partialorder %v1855_v54, inf }
  0xd3   :  { %v574_v18 = vsel %vm573_vm0, %v1832_v19, %v572_v26  ;;  %v278_v43 = vmul.f32 0.5, %v277_v27  ;;  %vm284_vm5 = vcmp.eq.f32.partialorder %v1855_v54, 0.0  ;;  %v285_v19 = vand.u32 2147483648, %v1855_v54 }
  0xd4   :  { %v577_v39 = vsel %vm575_vm1, %v576_v22, %v574_v18  ;;  %v711_v40 = vsub.f32 1.5, %v710_v14  ;;  %v1908_v45 = vadd.f32 1e-08, %v392_v30  ;;  %v1912_v46 = vmul.f32 %v1897_v36, %v1897_v36 }
  0xd5   :  { %v1497_v28 = vpop.eup %1496  ;;  %v1463_v49 = vmul.f32 -1.442695, %v577_v39  ;;  %v420_v51 = vand.u32 2147483648, %v1876_v9  ;;  %v808_v52 = vrot.slane %v1881_v63, 2  ;;  %v279_v56 = vsub.f32 1.5, %v278_v43 }
  0xd6   :  { %v1499_v31 = vpop.eup %1498  ;;  %v1892_v32 = vadd.f32 1.0, %v1497_v28  ;;  %v712_v50 = vmul.f32 %v1493_v29, %v711_v40  ;;  %v805_v60 = vadd.f32 %v799_v35, %v1881_v63  ;;  %v817_v61 = vrot.slane %v1881_v63, 3 }
  0xd7   :  { %v1899_v38 = vadd.f32 1.0, %v1499_v31  ;;  %v1501_v53 = vpop.eup %1500  ;;  %v280_v3 = vmul.f32 %v1495_v15, %v279_v56  ;;  %vm417_vm8 = vcmp.eq.f32.partialorder %v1876_v9, inf  ;;  %vm419_vm9 = vcmp.eq.f32.partialorder %v1876_v9, 0.0 }
  0xd8   :  { %1504 = vrcp.f32 %v1892_v32  ;;  %v1503_v55 = vpop.eup %1502  ;;  %v411_v59 = vmul.f32 %v1501_v53, %v1876_v9  ;;  %vm346_vm6 = vweird.f32 %v1892_v32  ;;  %v713_v62 = vmul.f32 %v712_v50, %v1853_v48 }
  0xd9   :  { %1506 = vrcp.f32 %v1899_v38  ;;  %v264_v0 = vmul.f32 %v1503_v55, %v1887_v25  ;;  %v350_v1 = vand.u32 2147483647, %v1892_v32  ;;  %v352_v7 = vand.u32 2147483648, %v1892_v32 }
  0xda   :  { %1508 = vpow2.f32 %v1463_v49  ;;  %v412_v4 = vmul.f32 %v1501_v53, %v411_v59  ;;  %vm481_vm7 = vweird.f32 %v1899_v38  ;;  %v715_v8 = vsel %vm714_vm2, %v1853_v48, %v713_v62 }
  0xdb   :  { %1510 = vrsqrt.f32 %v1908_v45  ;;  %v265_v10 = vmul.f32 %v1503_v55, %v264_v0  ;;  %v485_v13 = vand.u32 2147483647, %v1899_v38  ;;  %v718_v15 = vsel %vm716_vm3, %v717_v44, %v715_v8 }
  0xdc   :  { %v281_v33 = vmul.f32 %v280_v3, %v1855_v54  ;;  %v487_v17 = vand.u32 2147483648, %v1899_v38  ;;  %v1466_v20 = vmul.f32 -1.442695, %v718_v15  ;;  %v413_v21 = vmul.f32 0.5, %v412_v4 }
  0xdd   :  { %v266_v23 = vmul.f32 0.5, %v265_v10  ;;  %vm270_vm12 = vcmp.eq.f32.partialorder %v1887_v25, inf  ;;  %vm351_vm13 = vcmp.eq.f32.partialorder %v350_v1, 8.507059e+37  ;;  %vm272_vm14 = vcmp.eq.f32.partialorder %v1887_v25, 0.0 }
  0xde   :  { %v1505_v5 = vpop.eup %1504  ;;  %v283_v48 = vsel %vm282_vm4, %v1855_v54, %v281_v33  ;;  %1512 = vpow2.f32 %v1466_v20  ;;  %v414_v14 = vsub.f32 1.5, %v413_v21  ;;  %v353_v54 = vor.u32 1.1754944e-38, %v352_v7  ;;  %v74_v7 = vpop.trf.xlu0 }
  0xdf   :  { %v1507_v29 = vpop.eup %1506  ;;  %v342_v12 = vmul.f32 %v1505_v5, %v1892_v32  ;;  %vm347_vm10 = vweird.f32 %v1505_v5  ;;  %v286_v28 = vsel %vm284_vm5, %v285_v19, %v283_v48  ;;  %v267_v39 = vsub.f32 1.5, %v266_v23  ;;  %158 = vst [vmem:[#allocation2 + $0x8] sm:$0xff] %v74_v7 }
  0xe0   :  { %v477_v16 = vmul.f32 %v1507_v29, %v1899_v38  ;;  %v1509_v26 = vpop.eup %1508  ;;  %v1456_v35 = vmul.f32 -1.442695, %v286_v28  ;;  %vm482_vm11 = vweird.f32 %v1507_v29  ;;  %v415_v43 = vmul.f32 %v1501_v53, %v414_v14  ;;  %vm348_vm15 = vmor %vm346_vm6, %vm347_vm10  ;;  %v1996_v14 = vld [vmem:[#allocation2 + $0x40] sm:$0x3e] }
  0xe1   :  { %v343_v22 = vsub.f32 1.0, %v342_v12  ;;  %v1943_v30 = vpop.eup %1510  ;;  %v1945_v18 = vadd.f32 1.0, %v1509_v26  ;;  %v488_v50 = vor.u32 1.1754944e-38, %v487_v17  ;;  %vm483_vm0 = vmor %vm481_vm7, %vm482_vm11  ;;  %v268_v59 = vmul.f32 %v1503_v55, %v267_v39 }
  0xe2   :  { %v478_v27 = vsub.f32 1.0, %v477_v16  ;;  %v399_v44 = vmul.f32 %v1943_v30, %v1908_v45  ;;  %v416_v53 = vmul.f32 %v415_v43, %v1876_v9  ;;  %v814_v0 = vadd.f32 %v808_v52, %v805_v60 }
  0xe3   :  { %v344_v31 = vmul.f32 %v1505_v5, %v343_v22  ;;  %1514 = vrcp.f32 %v1945_v18  ;;  %vm486_vm1 = vcmp.eq.f32.partialorder %v485_v13, 8.507059e+37  ;;  %v269_v60 = vmul.f32 %v268_v59, %v1887_v25 }
  0xe4   :  { %v479_v40 = vmul.f32 %v1507_v29, %v478_v27  ;;  %1516 = vpow2.f32 %v1456_v35  ;;  %v400_v62 = vmul.f32 %v1943_v30, %v399_v44  ;;  %v1513_v1 = vpop.eup %1512  ;;  %v418_v4 = vsel %vm417_vm8, %v1876_v9, %v416_v53 }
  0xe5   :  { %v345_v49 = vadd.f32 %v1505_v5, %v344_v31  ;;  %v1965_v10 = vadd.f32 1.0, %v1513_v1  ;;  %v421_v38 = vsel %vm419_vm9, %v420_v51, %v418_v4  ;;  %v273_v13 = vand.u32 2147483648, %v1887_v25 }
  0xe6   :  { %v480_v19 = vadd.f32 %v1507_v29, %v479_v40  ;;  %v1459_v55 = vmul.f32 -1.442695, %v421_v38  ;;  %v401_v11 = vmul.f32 0.5, %v400_v62  ;;  %v823_v15 = vadd.f32 %v817_v61, %v814_v0 }
  0xe7   :  { %v349_v56 = vsel %vm348_vm15, %v1505_v5, %v345_v49  ;;  %1518 = vrcp.f32 %v1965_v10  ;;  %v629_v16 = vand.u32 2147483647, %v1945_v18  ;;  %vm405_vm2 = vcmp.eq.f32.partialorder %v1908_v45, inf }
  0xe8   :  { %v354_v3 = vsel %vm351_vm13, %v353_v54, %v349_v56  ;;  %v484_v32 = vsel %vm483_vm0, %v1507_v29, %v480_v19  ;;  %v832_v17 = vrot.slane %v1912_v46, 4  ;;  %1520 = vpow2.f32 %v1459_v55 }
  0xe9   :  { %v358_v5 = vperm.slane %v354_v3, 0  ;;  %v489_v8 = vsel %vm486_vm1, %v488_v50, %v484_v32  ;;  %v1515_v29 = vpop.eup %1514  ;;  %v271_v63 = vsel %vm270_vm12, %v1887_v25, %v269_v60  ;;  %v770_v61 = vand.u32 2147483647, %v1965_v10 }
  0xea   :  { %v493_v52 = vperm.slane %v489_v8, 3  ;;  %v1517_v33 = vpop.eup %1516  ;;  %v621_v51 = vmul.f32 %v1515_v29, %v1945_v18  ;;  %v274_v21 = vsel %vm272_vm14, %v273_v13, %v271_v63  ;;  %v402_v22 = vsub.f32 1.5, %v401_v11 }
  0xeb   :  { %v361_v12 = vmul.f32 %v358_v5, %v1757_v57  ;;  %v631_v57 = vand.u32 2147483648, %v1945_v18  ;;  %v1983_v20 = vadd.f32 1.0, %v1517_v33  ;;  %vm626_vm3 = vweird.f32 %v1515_v29 }
  0xec   :  { %v496_v9 = vmul.f32 %v493_v52, %v1759_v58  ;;  %v622_v58 = vsub.f32 1.0, %v621_v51  ;;  %v772_v46 = vand.u32 2147483648, %v1965_v10  ;;  %v408_v48 = vand.u32 2147483648, %v1908_v45 }
  0xed   :  { %364 = vst [vmem:[#allocation2 + $0x20] sm:$0x7] %v361_v12  ;;  %1522 = vrcp.f32 %v1983_v20  ;;  %v1455_v26 = vmul.f32 -1.442695, %v274_v21  ;;  %v403_v27 = vmul.f32 %v1943_v30, %v402_v22  ;;  %vm407_vm4 = vcmp.eq.f32.partialorder %v1908_v45, 0.0  ;;  %v1519_v31 = vpop.eup %1518 }
  0xee   :  { %499 = vst [vmem:[#allocation2 + $0x20] sm:$0x38] %v496_v9  ;;  %v623_v23 = vmul.f32 %v1515_v29, %v622_v58  ;;  %v838_v28 = vadd.f32 %v832_v17, %v823_v15  ;;  %vm625_vm5 = vweird.f32 %v1945_v18  ;;  %vm1999_vm6 = vcmp.eq.f32.partialorder %v629_v16, 8.507059e+37  ;;  %v1521_v43 = vpop.eup %1520  ;;  %v2042_v9 = vld [vmem:[#allocation2 + $0x50] sm:$0xc0] }
  0xef   :  { %v632_v35 = vor.u32 1.1754944e-38, %v631_v57  ;;  %vm766_vm7 = vweird.f32 %v1965_v10  ;;  %v762_v40 = vmul.f32 %v1519_v31, %v1965_v10  ;;  %vm2005_vm8 = vcmp.eq.f32.partialorder %v770_v61, 8.507059e+37  ;;  %vm627_vm9 = vmor %vm625_vm5, %vm626_vm3  ;;  %v2056_v21 = vld [vmem:[#allocation2 + $0x38] sm:$0x1] }
  0xf0   :  { %v624_v39 = vadd.f32 %v1515_v29, %v623_v23  ;;  %1524 = vpow2.f32 %v1455_v26  ;;  %v773_v44 = vor.u32 1.1754944e-38, %v772_v46  ;;  %v404_v18 = vmul.f32 %v403_v27, %v1908_v45 }
  0xf1   :  { %v841_v49 = vmul.f32 0.4472136, %v838_v28  ;;  %v2013_v54 = vmul.f32 %v1996_v14, %v1996_v14  ;;  %v763_v50 = vsub.f32 1.0, %v762_v40  ;;  %vm331_vm10 = vweird.f32 %v1983_v20 }
  0xf2   :  { %v628_v19 = vsel %vm627_vm9, %v1515_v29, %v624_v39  ;;  %v2016_v53 = vadd.f32 1.0, %v1521_v43  ;;  %vm767_vm11 = vweird.f32 %v1519_v31  ;;  %v335_v62 = vand.u32 2147483647, %v1983_v20  ;;  %v107_v29 = vpop.trf.xlu1 }
  0xf3   :  { %v1523_v56 = vpop.eup %1522  ;;  %v633_v59 = vsel %vm1999_vm6, %v632_v35, %v628_v19  ;;  %v406_v0 = vsel %vm405_vm2, %v1908_v45, %v404_v18  ;;  %v764_v3 = vmul.f32 %v1519_v31, %v763_v50  ;;  %v2025_v4 = vadd.f32 1e-08, %v841_v49  ;;  %vm768_vm12 = vmor %vm766_vm7, %vm767_vm11  ;;  %162 = vst [vmem:[#allocation2 + $0x10] sm:$0x3f] %v107_v29 }
  0xf4   :  { %v637_v1 = vperm.slane %v633_v59, 6  ;;  %v327_v32 = vmul.f32 %v1523_v56, %v1983_v20  ;;  %v337_v7 = vand.u32 2147483648, %v1983_v20  ;;  %1526 = vrcp.f32 %v2016_v53  ;;  %v2064_v20 = vld [vmem:[#allocation2 + $0x38] sm:$0xe] }
  0xf5   :  { %v964_v5 = vrot.slane %v2013_v54, 1  ;;  %v973_v8 = vrot.slane %v2013_v54, 2  ;;  %v765_v60 = vadd.f32 %v1519_v31, %v764_v3  ;;  %vm332_vm13 = vweird.f32 %v1523_v56 }
  0xf6   :  { %v1525_v38 = vpop.eup %1524  ;;  %v640_v52 = vmul.f32 %v637_v1, %v1765_v2  ;;  %v643_v55 = vmul.f32 %v637_v1, %v1780_v24  ;;  %v328_v11 = vsub.f32 1.0, %v327_v32  ;;  %v470_v12 = vand.u32 2147483647, %v2016_v53  ;;  %vm333_vm15 = vmor %vm331_vm10, %vm332_vm13  ;;  %v2078_v1 = vld [vmem:[#allocation2 + $0x18] sm:$0xc0] }
  0xf7   :  { %v2037_v13 = vadd.f32 1.0, %v1525_v38  ;;  %v409_v15 = vsel %vm407_vm4, %v408_v48, %v406_v0  ;;  %v769_v2 = vsel %vm768_vm12, %v1519_v31, %v765_v60  ;;  %1528 = vrsqrt.f32 %v2025_v4 }
  0xf8   :  { %646 = vst [vmem:[#allocation2 + $0x20] sm:$0xc0] %v640_v52  ;;  %v329_v33 = vmul.f32 %v1523_v56, %v328_v11  ;;  %v1458_v24 = vmul.f32 -1.442695, %v409_v15  ;;  %v774_v10 = vsel %vm2005_vm8, %v773_v44, %v769_v2  ;;  %v472_v51 = vand.u32 2147483648, %v2016_v53 }
  0xf9   :  { %649 = vst [vmem:[#allocation2 + $0x28] sm:$0x1] %v643_v55  ;;  %1530 = vrcp.f32 %v2037_v13  ;;  %v970_v45 = vadd.f32 %v964_v5, %v2013_v54  ;;  %v778_v16 = vperm.slane %v774_v10, 1  ;;  %vm336_vm14 = vcmp.eq.f32.partialorder %v335_v62, 8.507059e+37 }
  0xfa   :  { %v330_v17 = vadd.f32 %v1523_v56, %v329_v33  ;;  %1532 = vpow2.f32 %v1458_v24  ;;  %v1527_v57 = vpop.eup %1526  ;;  %v338_v63 = vor.u32 1.1754944e-38, %v337_v7  ;;  %vm466_vm0 = vweird.f32 %v2016_v53 }
  0xfb   :  { %v982_v58 = vrot.slane %v2013_v54, 3  ;;  %v507_v61 = vmul.f32 %v2042_v9, %v2042_v9  ;;  %v781_v22 = vmul.f32 %v778_v16, %v1796_v37  ;;  %v462_v48 = vmul.f32 %v1527_v57, %v2016_v53 }
  0xfc   :  { %v334_v46 = vsel %vm333_vm15, %v1523_v56, %v330_v17  ;;  %vm2060_vm1 = vcmp.eq.f32.partialorder %v470_v12, 8.507059e+37  ;;  %v473_v27 = vor.u32 1.1754944e-38, %v472_v51  ;;  %v979_v28 = vadd.f32 %v973_v8, %v970_v45 }
  0xfd   :  { %v339_v26 = vsel %vm336_vm14, %v338_v63, %v334_v46  ;;  %v991_v31 = vrot.slane %v2013_v54, 4  ;;  %v1529_v25 = vpop.eup %1528  ;;  %784 = vst [vmem:[#allocation2 + $0x28] sm:$0xe] %v781_v22  ;;  %v463_v39 = vsub.f32 1.0, %v462_v48  ;;  %vm316_vm2 = vweird.f32 %v2037_v13  ;;  %v2100_v63 = vld [vmem:[#allocation2 + $0x8] sm:$0x1] }
  0xfe   :  { %v357_v35 = vperm.slane %v339_v26, 0  ;;  %v522_v37 = vmul.f32 %v2056_v21, %v2056_v21  ;;  %v870_v30 = vmul.f32 %v1529_v25, %v2025_v4  ;;  %v988_v43 = vadd.f32 %v982_v58, %v979_v28  ;;  %v2106_v46 = vld [vmem:[#allocation2 + $0x8] sm:$0xe] }
  0xff   :  { %v1531_v40 = vpop.eup %1530  ;;  %v513_v44 = vrot.slane %v507_v61, 1  ;;  %v654_v18 = vmul.f32 %v2064_v20, %v2064_v20  ;;  %v464_v19 = vmul.f32 %v1527_v57, %v463_v39  ;;  %vm467_vm3 = vweird.f32 %v1527_v57 }
 0x100   :  { %v1533_v49 = vpop.eup %1532  ;;  %v360_v54 = vmul.f32 %v357_v35, %v1800_v41  ;;  %v312_v50 = vmul.f32 %v1531_v40, %v2037_v13  ;;  %v320_v56 = vand.u32 2147483647, %v2037_v13  ;;  %v871_v62 = vmul.f32 %v1529_v25, %v870_v30  ;;  %vm468_vm4 = vmor %vm466_vm0, %vm467_vm3 }
 0x101   :  { %v2076_v59 = vadd.f32 1.0, %v1533_v49  ;;  %v997_v0 = vadd.f32 %v991_v31, %v988_v43  ;;  %v465_v3 = vadd.f32 %v1527_v57, %v464_v19  ;;  %v322_v7 = vand.u32 2147483648, %v2037_v13 }
 0x102   :  { %363 = vst [vmem:[#allocation2 + $0x50] sm:$0x7] %v360_v54  ;;  %v313_v32 = vsub.f32 1.0, %v312_v50  ;;  %v528_v5 = vrot.slane %v522_v37, 2  ;;  %vm317_vm5 = vweird.f32 %v1531_v40  ;;  %v519_v41 = vadd.f32 %v513_v44, %v507_v61  ;;  %v2125_v44 = vld [vmem:[#allocation2 + $0x38] sm:$0xf0] }
 0x103   :  { %1534 = vrcp.f32 %v2076_v59  ;;  %v660_v8 = vrot.slane %v654_v18, 1  ;;  %v469_v38 = vsel %vm468_vm4, %v1527_v57, %v465_v3  ;;  %v872_v55 = vmul.f32 0.5, %v871_v62  ;;  %vm318_vm7 = vmor %vm316_vm2, %vm317_vm5 }
 0x104   :  { %v314_v52 = vmul.f32 %v1531_v40, %v313_v32  ;;  %v1000_v60 = vmul.f32 0.4472136, %v997_v0  ;;  %v474_v11 = vsel %vm2060_vm1, %v473_v27, %v469_v38  ;;  %vm2086_vm6 = vcmp.eq.f32.partialorder %v320_v56, 8.507059e+37 }
 0x105   :  { %v534_v12 = vadd.f32 %v528_v5, %v519_v41  ;;  %v506_v53 = vmul.f32 %v2078_v1, %v2078_v1  ;;  %v492_v15 = vperm.slane %v474_v11, 3  ;;  %v873_v33 = vsub.f32 1.5, %v872_v55 }
 0x106   :  { %v315_v2 = vadd.f32 %v1531_v40, %v314_v52  ;;  %v2092_v24 = vadd.f32 1e-08, %v1000_v60  ;;  %v323_v10 = vor.u32 1.1754944e-38, %v322_v7  ;;  %vm876_vm8 = vcmp.eq.f32.partialorder %v2025_v4, inf  ;;  %v2134_v52 = vld [vmem:[#allocation2 + $0x10] sm:$0x1] }
 0x107   :  { %v537_v51 = vmul.f32 0.57735026, %v534_v12  ;;  %v666_v45 = vadd.f32 %v660_v8, %v654_v18  ;;  %v495_v16 = vmul.f32 %v492_v15, %v1802_v42  ;;  %v874_v57 = vmul.f32 %v1529_v25, %v873_v33 }
 0x108   :  { %v319_v17 = vsel %vm318_vm7, %v1531_v40, %v315_v2  ;;  %1536 = vrsqrt.f32 %v2092_v24  ;;  %vm878_vm9 = vcmp.eq.f32.partialorder %v2025_v4, 0.0  ;;  %v879_v13 = vand.u32 2147483648, %v2025_v4 }
 0x109   :  { %v1535_v58 = vpop.eup %1534  ;;  %v324_v61 = vsel %vm2086_vm6, %v323_v10, %v319_v17  ;;  %v669_v22 = vrot.slane %v654_v18, 2  ;;  %498 = vst [vmem:[#allocation2 + $0x50] sm:$0x38] %v495_v16  ;;  %v875_v23 = vmul.f32 %v874_v57, %v2025_v4  ;;  %v512_v26 = vrot.slane %v506_v53, 1 }
 0x10a   :  { %v356_v48 = vperm.slane %v324_v61, 0  ;;  %v447_v42 = vmul.f32 %v1535_v58, %v2076_v59  ;;  %v455_v27 = vand.u32 2147483647, %v2076_v59  ;;  %v2111_v28 = vadd.f32 1e-08, %v537_v51 }
 0x10b   :  { %v675_v31 = vadd.f32 %v669_v22, %v666_v45  ;;  %v521_v25 = vmul.f32 %v2100_v63, %v2100_v63  ;;  %v877_v37 = vsel %vm876_vm8, %v2025_v4, %v875_v23  ;;  %v653_v40 = vmul.f32 %v2106_v46, %v2106_v46  ;;  %v2146_v22 = vld [vmem:[#allocation2 + $0x10] sm:$0x3e] }
 0x10c   :  { %v359_v35 = vmul.f32 %v356_v48, %v1810_v47  ;;  %v448_v39 = vsub.f32 1.0, %v447_v42  ;;  %vm452_vm10 = vweird.f32 %v1535_v58  ;;  %v457_v30 = vand.u32 2147483648, %v2076_v59 }
 0x10d   :  { %v880_v43 = vsel %vm878_vm9, %v879_v13, %v877_v37  ;;  %1538 = vrsqrt.f32 %v2111_v28  ;;  %v518_v54 = vadd.f32 %v512_v26, %v506_v53  ;;  %v527_v19 = vrot.slane %v521_v25, 2 }
 0x10e   :  { %v1537_v18 = vpop.eup %1536  ;;  %362 = vst [vmem:[#allocation2 + $0x18] sm:$0x7] %v359_v35  ;;  %v449_v47 = vmul.f32 %v1535_v58, %v448_v39  ;;  %v1469_v49 = vmul.f32 -1.442695, %v880_v43  ;;  %vm451_vm11 = vweird.f32 %v2076_v59  ;;  %v678_v56 = vmul.f32 0.57735026, %v675_v31 }
 0x10f   :  { %v1029_v50 = vmul.f32 %v1537_v18, %v2092_v24  ;;  %v659_v62 = vrot.slane %v653_v40, 1  ;;  %v533_v4 = vadd.f32 %v527_v19, %v518_v54  ;;  %v792_v3 = vmul.f32 %v2125_v44, %v2125_v44  ;;  %vm453_vm12 = vmor %vm451_vm11, %vm452_vm10 }
 0x110   :  { %v450_v0 = vadd.f32 %v1535_v58, %v449_v47  ;;  %1540 = vpow2.f32 %v1469_v49  ;;  %vm456_vm13 = vcmp.eq.f32.partialorder %v455_v27, 8.507059e+37  ;;  %v458_v32 = vor.u32 1.1754944e-38, %v457_v30 }
 0x111   :  { %v1030_v7 = vmul.f32 %v1537_v18, %v1029_v50  ;;  %v2132_v5 = vadd.f32 1e-08, %v678_v56  ;;  %v536_v8 = vmul.f32 0.57735026, %v533_v4  ;;  %v665_v59 = vadd.f32 %v659_v62, %v653_v40 }
 0x112   :  { %v454_v41 = vsel %vm453_vm12, %v1535_v58, %v450_v0  ;;  %v798_v38 = vrot.slane %v792_v3, 1  ;;  %v668_v53 = vrot.slane %v653_v40, 2  ;;  %v825_v10 = vmul.f32 %v2134_v52, %v2134_v52  ;;  %v75_v58 = vpop.trf.xlu0 }
 0x113   :  { %v1539_v55 = vpop.eup %1538  ;;  %v459_v60 = vsel %vm456_vm13, %v458_v32, %v454_v41  ;;  %v1031_v11 = vmul.f32 0.5, %v1030_v7  ;;  %1542 = vrsqrt.f32 %v2132_v5  ;;  %v2138_v2 = vadd.f32 1e-08, %v536_v8  ;;  %161 = vst [vmem:[#allocation2 + $0x48] sm:$0x3f] %v75_v58 }
 0x114   :  { %v491_v29 = vperm.slane %v459_v60, 3  ;;  %v555_v12 = vmul.f32 %v1539_v55, %v2111_v28  ;;  %v804_v33 = vadd.f32 %v798_v38, %v792_v3  ;;  %v674_v17 = vadd.f32 %v668_v53, %v665_v59 }
 0x115   :  { %v1032_v15 = vsub.f32 1.5, %v1031_v11  ;;  %v807_v57 = vrot.slane %v792_v3, 2  ;;  %1544 = vrsqrt.f32 %v2138_v2  ;;  %vm1035_vm14 = vcmp.eq.f32.partialorder %v2092_v24, inf }
 0x116   :  { %v1541_v51 = vpop.eup %1540  ;;  %v494_v45 = vmul.f32 %v491_v29, %v1843_v34  ;;  %v556_v16 = vmul.f32 %v1539_v55, %v555_v12  ;;  %vm1037_vm15 = vcmp.eq.f32.partialorder %v2092_v24, 0.0  ;;  %v1038_v23 = vand.u32 2147483648, %v2092_v24 }
 0x117   :  { %v2143_v61 = vadd.f32 1.0, %v1541_v51  ;;  %v1033_v13 = vmul.f32 %v1537_v18, %v1032_v15  ;;  %v813_v42 = vadd.f32 %v807_v57, %v804_v33  ;;  %v816_v26 = vrot.slane %v792_v3, 3 }
 0x118   :  { %497 = vst [vmem:[#allocation2 + $0x18] sm:$0x38] %v494_v45  ;;  %v557_v48 = vmul.f32 0.5, %v556_v16  ;;  %v831_v27 = vrot.slane %v825_v10, 4  ;;  %v677_v39 = vmul.f32 0.57735026, %v674_v17  ;;  %v2158_v40 = vmul.f32 %v2146_v22, %v2146_v22 }
 0x119   :  { %v1543_v34 = vpop.eup %1542  ;;  %1546 = vrcp.f32 %v2143_v61  ;;  %v1034_v31 = vmul.f32 %v1033_v13, %v2092_v24  ;;  %vm561_vm0 = vcmp.eq.f32.partialorder %v2111_v28, inf  ;;  %vm563_vm1 = vcmp.eq.f32.partialorder %v2111_v28, 0.0 }
 0x11a   :  { %v558_v25 = vsub.f32 1.5, %v557_v48  ;;  %v696_v35 = vmul.f32 %v1543_v34, %v2132_v5  ;;  %v822_v37 = vadd.f32 %v816_v26, %v813_v42  ;;  %v2163_v47 = vadd.f32 1e-08, %v677_v39 }
 0x11b   :  { %v1036_v30 = vsel %vm1035_vm14, %v2092_v24, %v1034_v31  ;;  %v1545_v49 = vpop.eup %1544  ;;  %v564_v19 = vand.u32 2147483648, %v2111_v28  ;;  %v963_v56 = vrot.slane %v2158_v40, 1  ;;  %vm702_vm2 = vcmp.eq.f32.partialorder %v2132_v5, inf }
 0x11c   :  { %v559_v43 = vmul.f32 %v1539_v55, %v558_v25  ;;  %v697_v18 = vmul.f32 %v1543_v34, %v696_v35  ;;  %v1039_v54 = vsel %vm1037_vm15, %v1038_v23, %v1036_v30  ;;  %v837_v50 = vadd.f32 %v831_v27, %v822_v37  ;;  %v1108_v23 = vld [vmem:[#allocation2 + $0x58] sm:$0xff] }
 0x11d   :  { %v1472_v62 = vmul.f32 -1.442695, %v1039_v54  ;;  %v543_v3 = vmul.f32 %v1545_v49, %v2138_v2  ;;  %vm704_vm3 = vcmp.eq.f32.partialorder %v2132_v5, 0.0  ;;  %v705_v7 = vand.u32 2147483648, %v2132_v5  ;;  %1182 = vxpose.xlu2.b32.start [1/4] (short) %v1108_v23, 128 }
 0x11e   :  { %v560_v0 = vmul.f32 %v559_v43, %v2111_v28  ;;  %v698_v4 = vmul.f32 0.5, %v697_v18  ;;  %1548 = vrsqrt.f32 %v2163_v47  ;;  %v934_v41 = vand.u32 2147483648, %v2143_v61  ;;  %v2201_v43 = vld [vmem:[#allocation2 + $0x8] sm:$0xf0] }
 0x11f   :  { %v1547_v32 = vpop.eup %1546  ;;  %1550 = vpow2.f32 %v1472_v62  ;;  %v544_v55 = vmul.f32 %v1545_v49, %v543_v3  ;;  %v840_v60 = vmul.f32 0.4472136, %v837_v50  ;;  %v969_v12 = vadd.f32 %v963_v56, %v2158_v40 }
 0x120   :  { %v924_v24 = vmul.f32 %v1547_v32, %v2143_v61  ;;  %v562_v8 = vsel %vm561_vm0, %v2111_v28, %v560_v0  ;;  %v699_v38 = vsub.f32 1.5, %v698_v4  ;;  %v972_v53 = vrot.slane %v2158_v40, 2 }
 0x121   :  { %v565_v59 = vsel %vm563_vm1, %v564_v19, %v562_v8  ;;  %v932_v15 = vand.u32 2147483647, %v2143_v61  ;;  %v545_v10 = vmul.f32 0.5, %v544_v55  ;;  %v2185_v51 = vadd.f32 1e-08, %v840_v60  ;;  %v1106_v55 = vld [vmem:[#allocation2 + $0x30] sm:$0xff] }
 0x122   :  { %v925_v11 = vsub.f32 1.0, %v924_v24  ;;  %v1462_v29 = vmul.f32 -1.442695, %v565_v59  ;;  %v700_v33 = vmul.f32 %v1543_v34, %v699_v38  ;;  %vm929_vm4 = vweird.f32 %v1547_v32  ;;  %v1107_v38 = vld [vmem:[#allocation2] sm:$0xff]  ;;  %1118 = vxpose.xlu0.b32.start [1/4] (short) %v1106_v55, 128 }
 0x123   :  { %v978_v28 = vadd.f32 %v972_v53, %v969_v12  ;;  %v546_v57 = vsub.f32 1.5, %v545_v10  ;;  %v981_v58 = vrot.slane %v2158_v40, 3  ;;  %vm928_vm5 = vweird.f32 %v2143_v61  ;;  %1150 = vxpose.xlu1.b32.start [1/4] (short) %v1107_v38, 128 }
 0x124   :  { %v926_v45 = vmul.f32 %v1547_v32, %v925_v11  ;;  %1552 = vpow2.f32 %v1462_v29  ;;  %v1549_v16 = vpop.eup %1548  ;;  %v701_v17 = vmul.f32 %v700_v33, %v2132_v5  ;;  %v935_v42 = vor.u32 1.1754944e-38, %v934_v41  ;;  %vm930_vm6 = vmor %vm928_vm5, %vm929_vm4 }
 0x125   :  { %1554 = vrsqrt.f32 %v2185_v51  ;;  %v1551_v13 = vpop.eup %1550  ;;  %v684_v34 = vmul.f32 %v1549_v16, %v2163_v47  ;;  %v547_v31 = vmul.f32 %v1545_v49, %v546_v57  ;;  %v987_v25 = vadd.f32 %v981_v58, %v978_v28 }
 0x126   :  { %v927_v48 = vadd.f32 %v1547_v32, %v926_v45  ;;  %v2192_v26 = vadd.f32 1.0, %v1551_v13  ;;  %v703_v27 = vsel %vm702_vm2, %v2132_v5, %v701_v17  ;;  %vm933_vm7 = vcmp.eq.f32.partialorder %v932_v15, 8.507059e+37 }
 0x127   :  { %v706_v39 = vsel %vm704_vm3, %v705_v7, %v703_v27  ;;  %v685_v61 = vmul.f32 %v1549_v16, %v684_v34  ;;  %v990_v30 = vrot.slane %v2158_v40, 4  ;;  %v548_v49 = vmul.f32 %v547_v31, %v2138_v2 }
 0x128   :  { %v931_v35 = vsel %vm930_vm6, %v1547_v32, %v927_v48  ;;  %1556 = vrcp.f32 %v2192_v26  ;;  %v1465_v19 = vmul.f32 -1.442695, %v706_v39  ;;  %vm549_vm8 = vcmp.eq.f32.partialorder %v2138_v2, inf }
 0x129   :  { %v936_v37 = vsel %vm933_vm7, %v935_v42, %v931_v35  ;;  %vm551_vm9 = vcmp.eq.f32.partialorder %v2138_v2, 0.0  ;;  %v686_v5 = vmul.f32 0.5, %v685_v61  ;;  %v996_v62 = vadd.f32 %v990_v30, %v987_v25 }
 0x12a   :  { %v1553_v18 = vpop.eup %1552  ;;  %v940_v54 = vperm.slane %v936_v37, 4  ;;  %1558 = vpow2.f32 %v1465_v19  ;;  %v2214_v4 = vmul.f32 %v2201_v43, %v2201_v43  ;;  %v552_v3 = vand.u32 2147483648, %v2138_v2 }
 0x12b   :  { %v2205_v50 = vpop.eup %1554  ;;  %v2207_v56 = vadd.f32 1.0, %v1553_v18  ;;  %vm690_vm10 = vcmp.eq.f32.partialorder %v2163_v47, inf  ;;  %vm692_vm11 = vcmp.eq.f32.partialorder %v2163_v47, 0.0  ;;  %v550_v32 = vsel %vm549_vm8, %v2138_v2, %v548_v49  ;;  %v2263_v49 = vld [vmem:[#allocation2 + $0x48] sm:$0x1] }
 0x12c   :  { %v943_v0 = vmul.f32 %v940_v54, %v1874_v6  ;;  %v946_v40 = vmul.f32 %v940_v54, %v1897_v36  ;;  %v687_v7 = vsub.f32 1.5, %v686_v5  ;;  %v858_v6 = vmul.f32 %v2205_v50, %v2185_v51 }
 0x12d   :  { %1560 = vrcp.f32 %v2207_v56  ;;  %v999_v36 = vmul.f32 0.4472136, %v996_v62  ;;  %v553_v41 = vsel %vm551_vm9, %v552_v3, %v550_v32  ;;  %v693_v8 = vand.u32 2147483648, %v2163_v47 }
 0x12e   :  { %949 = vst [vmem:[#allocation2 + $0x28] sm:$0xf0] %v943_v0  ;;  %v1557_v24 = vpop.eup %1556  ;;  %v867_v59 = vand.u32 2147483648, %v2185_v51  ;;  %v1461_v11 = vmul.f32 -1.442695, %v553_v41  ;;  %v688_v29 = vmul.f32 %v1549_v16, %v687_v7  ;;  %v797_v12 = vrot.slane %v2214_v4, 1 }
 0x12f   :  { %952 = vst [vmem:[#allocation2 + $0x40] sm:$0x1] %v946_v40  ;;  %v1083_v60 = vmul.f32 %v1557_v24, %v2192_v26  ;;  %v1091_v53 = vand.u32 2147483647, %v2192_v26  ;;  %v1093_v15 = vand.u32 2147483648, %v2192_v26  ;;  %v859_v2 = vmul.f32 %v2205_v50, %v858_v6 }
 0x130   :  { %v2232_v33 = vadd.f32 1e-08, %v999_v36  ;;  %v1559_v10 = vpop.eup %1558  ;;  %vm1087_vm12 = vweird.f32 %v2192_v26  ;;  %1562 = vpow2.f32 %v1461_v11  ;;  %v689_v28 = vmul.f32 %v688_v29, %v2163_v47 }
 0x131   :  { %v1084_v45 = vsub.f32 1.0, %v1083_v60  ;;  %v614_v17 = vand.u32 2147483647, %v2207_v56  ;;  %v2237_v57 = vadd.f32 1.0, %v1559_v10  ;;  %v860_v58 = vmul.f32 0.5, %v859_v2 }
 0x132   :  { %1564 = vrsqrt.f32 %v2232_v33  ;;  %vm1088_vm13 = vweird.f32 %v1557_v24  ;;  %v691_v42 = vsel %vm690_vm10, %v2163_v47, %v689_v28  ;;  %vm864_vm14 = vcmp.eq.f32.partialorder %v2185_v51, inf }
 0x133   :  { %v1561_v16 = vpop.eup %1560  ;;  %v1085_v13 = vmul.f32 %v1557_v24, %v1084_v45  ;;  %vm2245_vm15 = vcmp.eq.f32.partialorder %v1091_v53, 8.507059e+37  ;;  %v1094_v23 = vor.u32 1.1754944e-38, %v1093_v15  ;;  %vm610_vm0 = vweird.f32 %v2207_v56  ;;  %vm1089_vm2 = vmor %vm1087_vm12, %vm1088_vm13  ;;  %v2291_v15 = vld [vmem:[#allocation2 + $0x48] sm:$0x3e] }
 0x134   :  { %v606_v48 = vmul.f32 %v1561_v16, %v2207_v56  ;;  %1566 = vrcp.f32 %v2237_v57  ;;  %vm866_vm1 = vcmp.eq.f32.partialorder %v2185_v51, 0.0  ;;  %v694_v25 = vsel %vm692_vm11, %v693_v8, %v691_v42 }
 0x135   :  { %v1086_v27 = vadd.f32 %v1557_v24, %v1085_v13  ;;  %v861_v35 = vsub.f32 1.5, %v860_v58  ;;  %vm2256_vm3 = vcmp.eq.f32.partialorder %v614_v17, 8.507059e+37  ;;  %v616_v61 = vand.u32 2147483648, %v2207_v56 }
 0x136   :  { %v607_v31 = vsub.f32 1.0, %v606_v48  ;;  %v1464_v37 = vmul.f32 -1.442695, %v694_v25  ;;  %v803_v30 = vadd.f32 %v797_v12, %v2214_v4  ;;  %v1563_v18 = vpop.eup %1562  ;;  %vm611_vm4 = vweird.f32 %v1561_v16 }
 0x137   :  { %v1090_v54 = vsel %vm1089_vm2, %v1557_v24, %v1086_v27  ;;  %v862_v47 = vmul.f32 %v2205_v50, %v861_v35  ;;  %v2267_v62 = vadd.f32 1.0, %v1563_v18  ;;  %v806_v0 = vrot.slane %v2214_v4, 2  ;;  %vm612_vm5 = vmor %vm610_vm0, %vm611_vm4 }
 0x138   :  { %v608_v19 = vmul.f32 %v1561_v16, %v607_v31  ;;  %v1565_v5 = vpop.eup %1564  ;;  %v1095_v26 = vsel %vm2245_vm15, %v1094_v23, %v1090_v54  ;;  %1568 = vpow2.f32 %v1464_v37  ;;  %v617_v50 = vor.u32 1.1754944e-38, %v616_v61 }
 0x139   :  { %v1099_v40 = vperm.slane %v1095_v26, 1  ;;  %v863_v32 = vmul.f32 %v862_v47, %v2185_v51  ;;  %v1017_v7 = vmul.f32 %v1565_v5, %v2232_v33  ;;  %1570 = vrcp.f32 %v2267_v62 }
 0x13a   :  { %v609_v3 = vadd.f32 %v1561_v16, %v608_v19  ;;  %v1567_v6 = vpop.eup %1566  ;;  %v812_v36 = vadd.f32 %v806_v0, %v803_v30  ;;  %v824_v24 = vmul.f32 %v2263_v49, %v2263_v49  ;;  %v815_v55 = vrot.slane %v2214_v4, 3 }
 0x13b   :  { %v1102_v41 = vmul.f32 %v1099_v40, %v1996_v14  ;;  %v747_v38 = vmul.f32 %v1567_v6, %v2237_v57  ;;  %v755_v56 = vand.u32 2147483647, %v2237_v57  ;;  %v757_v11 = vand.u32 2147483648, %v2237_v57 }
 0x13c   :  { %v613_v8 = vsel %vm612_vm5, %v1561_v16, %v609_v3  ;;  %v865_v29 = vsel %vm864_vm14, %v2185_v51, %v863_v32  ;;  %v1018_v4 = vmul.f32 %v1565_v5, %v1017_v7  ;;  %vm752_vm6 = vweird.f32 %v1567_v6 }
 0x13d   :  { %v618_v60 = vsel %vm2256_vm3, %v617_v50, %v613_v8  ;;  %1105 = vst [vmem:[#allocation2 + $0x40] sm:$0x3e] %v1102_v41  ;;  %v748_v53 = vsub.f32 1.0, %v747_v38  ;;  %v868_v14 = vsel %vm866_vm1, %v867_v59, %v865_v29  ;;  %v821_v45 = vadd.f32 %v815_v55, %v812_v36 }
 0x13e   :  { %v636_v12 = vperm.slane %v618_v60, 6  ;;  %v1569_v2 = vpop.eup %1568  ;;  %v1468_v10 = vmul.f32 -1.442695, %v868_v14  ;;  %v830_v28 = vrot.slane %v824_v24, 4  ;;  %v1019_v42 = vmul.f32 0.5, %v1018_v4 }
 0x13f   :  { %v749_v58 = vmul.f32 %v1567_v6, %v748_v53  ;;  %v2295_v13 = vadd.f32 1.0, %v1569_v2  ;;  %v1571_v48 = vpop.eup %1570  ;;  %v2299_v59 = vmul.f32 %v2291_v15, %v2291_v15  ;;  %vm751_vm7 = vweird.f32 %v2237_v57 }
 0x140   :  { %v639_v16 = vmul.f32 %v636_v12, %v2042_v9  ;;  %v642_v17 = vmul.f32 %v636_v12, %v2056_v21  ;;  %1572 = vpow2.f32 %v1468_v10  ;;  %v836_v51 = vadd.f32 %v830_v28, %v821_v45  ;;  %vm753_vm8 = vmor %vm751_vm7, %vm752_vm6 }
 0x141   :  { %v750_v34 = vadd.f32 %v1567_v6, %v749_v58  ;;  %v591_v23 = vmul.f32 %v1571_v48, %v2267_v62  ;;  %1574 = vrcp.f32 %v2295_v13  ;;  %vm756_vm9 = vcmp.eq.f32.partialorder %v755_v56, 8.507059e+37 }
 0x142   :  { %645 = vst [vmem:[#allocation2 + $0x50] sm:$0xc0] %v639_v16  ;;  %v758_v9 = vor.u32 1.1754944e-38, %v757_v11  ;;  %v1020_v21 = vsub.f32 1.5, %v1019_v42  ;;  %v599_v25 = vand.u32 2147483647, %v2267_v62  ;;  %vm596_vm10 = vweird.f32 %v1571_v48 }
 0x143   :  { %648 = vst [vmem:[#allocation2 + $0x38] sm:$0x1] %v642_v17  ;;  %v754_v27 = vsel %vm753_vm8, %v1567_v6, %v750_v34  ;;  %v592_v31 = vsub.f32 1.0, %v591_v23  ;;  %v839_v35 = vmul.f32 0.4472136, %v836_v51  ;;  %v601_v61 = vand.u32 2147483648, %v2267_v62 }
 0x144   :  { %v759_v39 = vsel %vm756_vm9, %v758_v9, %v754_v27  ;;  %v1021_v37 = vmul.f32 %v1565_v5, %v1020_v21  ;;  %v962_v57 = vrot.slane %v2299_v59, 1  ;;  %vm595_vm11 = vweird.f32 %v2267_v62 }
 0x145   :  { %v777_v30 = vperm.slane %v759_v39, 1  ;;  %v593_v18 = vmul.f32 %v1571_v48, %v592_v31  ;;  %v2308_v54 = vadd.f32 1e-08, %v839_v35  ;;  %vm1023_vm12 = vcmp.eq.f32.partialorder %v2232_v33, inf  ;;  %vm597_vm13 = vmor %vm595_vm11, %vm596_vm10 }
 0x146   :  { %v1573_v19 = vpop.eup %1572  ;;  %v1022_v47 = vmul.f32 %v1021_v37, %v2232_v33  ;;  %v1026_v26 = vand.u32 2147483648, %v2232_v33  ;;  %v602_v32 = vor.u32 1.1754944e-38, %v601_v61  ;;  %v968_v6 = vadd.f32 %v962_v57, %v2299_v59 }
 0x147   :  { %v1575_v0 = vpop.eup %1574  ;;  %v780_v40 = vmul.f32 %v777_v30, %v2064_v20  ;;  %v594_v5 = vadd.f32 %v1571_v48, %v593_v18  ;;  %v2315_v3 = vadd.f32 1.0, %v1573_v19  ;;  %1576 = vrsqrt.f32 %v2308_v54 }
 0x148   :  { %v732_v7 = vmul.f32 %v1575_v0, %v2295_v13  ;;  %v1024_v62 = vsel %vm1023_vm12, %v2232_v33, %v1022_v47  ;;  %vm600_vm14 = vcmp.eq.f32.partialorder %v599_v25, 8.507059e+37  ;;  %vm1025_vm15 = vcmp.eq.f32.partialorder %v2232_v33, 0.0 }
 0x149   :  { %783 = vst [vmem:[#allocation2 + $0x38] sm:$0xe] %v780_v40  ;;  %v598_v50 = vsel %vm597_vm13, %v1571_v48, %v594_v5  ;;  %1578 = vrcp.f32 %v2315_v3  ;;  %v1027_v24 = vsel %vm1025_vm15, %v1026_v26, %v1024_v62  ;;  %v971_v41 = vrot.slane %v2299_v59, 2  ;;  %v1111_v5 = vld [vmem:[#allocation2 + $0x20] sm:$0xff] }
 0x14a   :  { %v603_v20 = vsel %vm600_vm14, %v602_v32, %v598_v50  ;;  %v733_v36 = vsub.f32 1.0, %v732_v7  ;;  %v740_v38 = vand.u32 2147483647, %v2295_v13  ;;  %v742_v55 = vand.u32 2147483648, %v2295_v13  ;;  %1183 = vxpose.xlu2.b32.cont [2/4] (short) %v1111_v5, 128 }
 0x14b   :  { %v635_v8 = vperm.slane %v603_v20, 6  ;;  %v1471_v60 = vmul.f32 -1.442695, %v1027_v24  ;;  %vm737_vm0 = vweird.f32 %v1575_v0  ;;  %v977_v11 = vadd.f32 %v971_v41, %v968_v6 }
 0x14c   :  { %v734_v56 = vmul.f32 %v1575_v0, %v733_v36  ;;  %v980_v29 = vrot.slane %v2299_v59, 3  ;;  %vm736_vm1 = vweird.f32 %v2295_v13  ;;  %v743_v45 = vor.u32 1.1754944e-38, %v742_v55 }
 0x14d   :  { %v1577_v12 = vpop.eup %1576  ;;  %v638_v53 = vmul.f32 %v635_v8, %v2078_v1  ;;  %v641_v33 = vmul.f32 %v635_v8, %v2100_v63  ;;  %1580 = vpow2.f32 %v1471_v60  ;;  %vm738_vm2 = vmor %vm736_vm1, %vm737_vm0  ;;  %v989_v28 = vrot.slane %v2299_v59, 4  ;;  %v1114_v8 = vld [vmem:[#allocation2 + $0x28] sm:$0xff] }
 0x14e   :  { %v735_v14 = vadd.f32 %v1575_v0, %v734_v56  ;;  %v846_v4 = vmul.f32 %v1577_v12, %v2308_v54  ;;  %v986_v2 = vadd.f32 %v980_v29, %v977_v11  ;;  %vm741_vm3 = vcmp.eq.f32.partialorder %v740_v38, 8.507059e+37 }
 0x14f   :  { %v1579_v10 = vpop.eup %1578  ;;  %644 = vst [vmem:[#allocation2 + $0x18] sm:$0xc0] %v638_v53  ;;  %v917_v34 = vand.u32 2147483647, %v2315_v3  ;;  %v919_v23 = vand.u32 2147483648, %v2315_v3  ;;  %vm913_vm5 = vweird.f32 %v2315_v3  ;;  %vm852_vm8 = vcmp.eq.f32.partialorder %v2308_v54, inf }
 0x150   :  { %647 = vst [vmem:[#allocation2 + $0x8] sm:$0x1] %v641_v33  ;;  %v739_v16 = vsel %vm738_vm2, %v1575_v0, %v735_v14  ;;  %v909_v1 = vmul.f32 %v1579_v10, %v2315_v3  ;;  %v847_v17 = vmul.f32 %v1577_v12, %v846_v4  ;;  %v995_v58 = vadd.f32 %v989_v28, %v986_v2 }
 0x151   :  { %v744_v63 = vsel %vm741_vm3, %v743_v45, %v739_v16  ;;  %vm914_vm4 = vweird.f32 %v1579_v10  ;;  %v920_v39 = vor.u32 1.1754944e-38, %v919_v23  ;;  %vm918_vm7 = vcmp.eq.f32.partialorder %v917_v34, 8.507059e+37  ;;  %v1117_v45 = vld [vmem:[#allocation2 + $0x40] sm:$0x3f] }
 0x152   :  { %v776_v48 = vperm.slane %v744_v63, 1  ;;  %v910_v42 = vsub.f32 1.0, %v909_v1  ;;  %v848_v13 = vmul.f32 0.5, %v847_v17  ;;  %v998_v9 = vmul.f32 0.4472136, %v995_v58  ;;  %vm915_vm6 = vmor %vm913_vm5, %vm914_vm4  ;;  %1184 = vxpose.xlu2.b32.cont [3/4] (short) %v1114_v8, 128 }
 0x153   :  { %v1581_v51 = vpop.eup %1580  ;;  %v855_v18 = vand.u32 2147483648, %v2308_v54  ;;  %vm854_vm9 = vcmp.eq.f32.partialorder %v2308_v54, 0.0 }
 0x154   :  { %v779_v59 = vmul.f32 %v776_v48, %v2106_v46  ;;  %v911_v21 = vmul.f32 %v1579_v10, %v910_v42  ;;  %v1050_v27 = vadd.f32 1.0, %v1581_v51  ;;  %v849_v31 = vsub.f32 1.5, %v848_v13 }
 0x155   :  { %v2336_v25 = vadd.f32 1e-08, %v998_v9 }
 0x156   :  { %782 = vst [vmem:[#allocation2 + $0x8] sm:$0xe] %v779_v59  ;;  %v912_v35 = vadd.f32 %v1579_v10, %v911_v21  ;;  %1582 = vrcp.f32 %v1050_v27  ;;  %v850_v61 = vmul.f32 %v1577_v12, %v849_v31  ;;  %v1078_v50 = vand.u32 2147483648, %v1050_v27  ;;  %v1110_v12 = vld [vmem:[#allocation2 + $0x50] sm:$0xff]  ;;  %v1109_v53 = vld [vmem:[#allocation2 + $0x18] sm:$0xff] }
 0x157   :  { %1584 = vrsqrt.f32 %v2336_v25  ;;  %v1076_v36 = vand.u32 2147483647, %v1050_v27  ;;  %vm1072_vm11 = vweird.f32 %v1050_v27  ;;  %1151 = vxpose.xlu1.b32.cont [2/4] (short) %v1110_v12, 128  ;;  %1119 = vxpose.xlu0.b32.cont [2/4] (short) %v1109_v53, 128  ;;  %vm1011_vm14 = vcmp.eq.f32.partialorder %v2336_v25, inf }
 0x158   :  { %v916_v37 = vsel %vm915_vm6, %v1579_v10, %v912_v35  ;;  %v851_v46 = vmul.f32 %v850_v61, %v2308_v54  ;;  %v1014_v4 = vand.u32 2147483648, %v2336_v25  ;;  %vm1013_vm15 = vcmp.eq.f32.partialorder %v2336_v25, 0.0 }
 0x159   :  { %v921_v57 = vsel %vm918_vm7, %v920_v39, %v916_v37  ;;  %vm1077_vm13 = vcmp.eq.f32.partialorder %v1076_v36, 8.507059e+37 }
 0x15a   :  { %v939_v30 = vperm.slane %v921_v57, 4  ;;  %v853_v19 = vsel %vm852_vm8, %v2308_v54, %v851_v46  ;;  %1185 = vxpose.xlu2.b32.end [4/4] (short) %v1117_v45, 128  ;;  %vm1214_vm8 = vcmask 244736  }
 0x15b   :  { %v856_v40 = vsel %vm854_vm9, %v855_v18, %v853_v19 }
 0x15c   :  { %v1583_v47 = vpop.eup %1582  ;;  %v942_v26 = vmul.f32 %v939_v30, %v2125_v44  ;;  %v945_v0 = vmul.f32 %v939_v30, %v2134_v52  ;;  %v1467_v7 = vmul.f32 -1.442695, %v856_v40  ;;  %v1079_v52 = vor.u32 1.1754944e-38, %v1078_v50 }
 0x15d   :  { %v1585_v3 = vpop.eup %1584  ;;  %v1068_v32 = vmul.f32 %v1583_v47, %v1050_v27  ;;  %vm1073_vm10 = vweird.f32 %v1583_v47 }
 0x15e   :  { %948 = vst [vmem:[#allocation2 + $0x38] sm:$0xf0] %v942_v26  ;;  %v1005_v62 = vmul.f32 %v1585_v3, %v2336_v25  ;;  %1586 = vpow2.f32 %v1467_v7  ;;  %vm1074_vm12 = vmor %vm1072_vm11, %vm1073_vm10 }
 0x15f   :  { %951 = vst [vmem:[#allocation2 + $0x10] sm:$0x1] %v945_v0  ;;  %v1069_v6 = vsub.f32 1.0, %v1068_v32 }
 0x160   :  { %v1006_v20 = vmul.f32 %v1585_v3, %v1005_v62 }
 0x161   :  { %v1070_v54 = vmul.f32 %v1583_v47, %v1069_v6 }
 0x162   :  { %v1007_v44 = vmul.f32 0.5, %v1006_v20 }
 0x163   :  { %v1071_v24 = vadd.f32 %v1583_v47, %v1070_v54 }
 0x164   :  { %v1008_v41 = vsub.f32 1.5, %v1007_v44  ;;  %v1587_v38 = vpop.eup %1586 }
 0x165   :  { %v1075_v55 = vsel %vm1074_vm12, %v1583_v47, %v1071_v24  ;;  %v890_v56 = vadd.f32 1.0, %v1587_v38  ;;  %v1113_v16 = vld [vmem:[#allocation2 + $0x38] sm:$0xff] }
 0x166   :  { %v1080_v60 = vsel %vm1077_vm13, %v1079_v52, %v1075_v55  ;;  %v1009_v11 = vmul.f32 %v1585_v3, %v1008_v41  ;;  %1152 = vxpose.xlu1.b32.cont [3/4] (short) %v1113_v16, 128 }
 0x167   :  { %v1098_v29 = vperm.slane %v1080_v60, 1  ;;  %1588 = vrcp.f32 %v890_v56  ;;  %v904_v63 = vand.u32 2147483648, %v890_v56  ;;  %v902_v48 = vand.u32 2147483647, %v890_v56 }
 0x168   :  { %v1010_v14 = vmul.f32 %v1009_v11, %v2336_v25  ;;  %vm898_vm1 = vweird.f32 %v890_v56 }
 0x169   :  { %v1101_v33 = vmul.f32 %v1098_v29, %v2146_v22  ;;  %v905_v51 = vor.u32 1.1754944e-38, %v904_v63  ;;  %vm903_vm3 = vcmp.eq.f32.partialorder %v902_v48, 8.507059e+37 }
 0x16a   :  { %v1012_v2 = vsel %vm1011_vm14, %v2336_v25, %v1010_v14 }
 0x16b   :  { %1104 = vst [vmem:[#allocation2 + $0x10] sm:$0x3e] %v1101_v33  ;;  %v1015_v10 = vsel %vm1013_vm15, %v1014_v4, %v1012_v2 }
 0x16c   :  { %v1470_v28 = vmul.f32 -1.442695, %v1015_v10 }
 0x16d   :  { %v1589_v1 = vpop.eup %1588 }
 0x16e   :  { %v894_v17 = vmul.f32 %v1589_v1, %v890_v56  ;;  %1590 = vpow2.f32 %v1470_v28  ;;  %vm899_vm0 = vweird.f32 %v1589_v1 }
 0x16f   :  { %vm900_vm2 = vmor %vm898_vm1, %vm899_vm0 }
 0x170   :  { %v895_v22 = vsub.f32 1.0, %v894_v17 }
 0x172   :  { %v896_v58 = vmul.f32 %v1589_v1, %v895_v22  ;;  %v1116_v9 = vld [vmem:[#allocation2 + $0x10] sm:$0x3f] }
 0x173   :  { %1153 = vxpose.xlu1.b32.end [4/4] (short) %v1116_v9, 128 }
 0x174   :  { %v1591_v42 = vpop.eup %1590  ;;  %v897_v13 = vadd.f32 %v1589_v1, %v896_v58 }
 0x175   :  { %v1049_v34 = vadd.f32 1.0, %v1591_v42 }
 0x176   :  { %v901_v23 = vsel %vm900_vm2, %v1589_v1, %v897_v13 }
 0x177   :  { %v906_v59 = vsel %vm903_vm3, %v905_v51, %v901_v23  ;;  %1592 = vrcp.f32 %v1049_v34  ;;  %v1063_v61 = vand.u32 2147483648, %v1049_v34  ;;  %v1061_v57 = vand.u32 2147483647, %v1049_v34 }
 0x178   :  { %v938_v21 = vperm.slane %v906_v59, 4  ;;  %vm1057_vm5 = vweird.f32 %v1049_v34 }
 0x179   :  { %v1064_v18 = vor.u32 1.1754944e-38, %v1063_v61  ;;  %vm1062_vm7 = vcmp.eq.f32.partialorder %v1061_v57, 8.507059e+37 }
 0x17a   :  { %v941_v27 = vmul.f32 %v938_v21, %v2201_v43  ;;  %v944_v31 = vmul.f32 %v938_v21, %v2263_v49 }
 0x17c   :  { %947 = vst [vmem:[#allocation2 + $0x8] sm:$0xf0] %v941_v27 }
 0x17d   :  { %v1593_v25 = vpop.eup %1592  ;;  %950 = vst [vmem:[#allocation2 + $0x48] sm:$0x1] %v944_v31 }
 0x17e   :  { %v1053_v35 = vmul.f32 %v1593_v25, %v1049_v34  ;;  %vm1058_vm4 = vweird.f32 %v1593_v25 }
 0x17f   :  { %vm1059_vm6 = vmor %vm1057_vm5, %vm1058_vm4 }
 0x180   :  { %v1054_v39 = vsub.f32 1.0, %v1053_v35 }
 0x182   :  { %v1055_v37 = vmul.f32 %v1593_v25, %v1054_v39 }
 0x183   :  { %v1112_v46 = vld [vmem:[#allocation2 + $0x8] sm:$0xff] }
 0x184   :  { %v1056_v30 = vadd.f32 %v1593_v25, %v1055_v37  ;;  %1120 = vxpose.xlu0.b32.cont [3/4] (short) %v1112_v46, 128 }
 0x186   :  { %v1060_v19 = vsel %vm1059_vm6, %v1593_v25, %v1056_v30 }
 0x187   :  { %v1065_v43 = vsel %vm1062_vm7, %v1064_v18, %v1060_v19 }
 0x188   :  { %v1097_v47 = vperm.slane %v1065_v43, 1 }
 0x18a   :  { %v1100_v49 = vmul.f32 %v1097_v47, %v2291_v15 }
 0x18c   :  { %1103 = vst [vmem:[#allocation2 + $0x48] sm:$0x3e] %v1100_v49 }
 0x193   :  { %v1115_v26 = vld [vmem:[#allocation2 + $0x48] sm:$0x3f] }
 0x194   :  { %1121 = vxpose.xlu0.b32.end [4/4] (short) %v1115_v26, 128 }
 0x1db   :  { %v1198_v40 = vpop.trf.xlu2 }
 0x1dc   :  { %1247 = vst.msk [vmem:[#allocation3 + $0x100] sm:$0xff] %vm1214_vm8, %v1198_v40 }
 0x1e3   :  { %v1431_v32 = vld [vmem:[#allocation3 + $0x100] sm:$0xff]  ;;  %v1199_v15 = vpop.trf.xlu2 }
 0x1e4   :  { %1432 = vst [vmem:[%s2510_s1 + $0x100] sm:$0xff] %v1431_v32 }
 0x1e5   :  { %1248 = vst.msk [vmem:[#allocation3 + $0x108] sm:$0xff] %vm1214_vm8, %v1199_v15 }
 0x1eb   :  { %v1200_v50 = vpop.trf.xlu2 }
 0x1ec   :  { %v1433_v6 = vld [vmem:[#allocation3 + $0x108] sm:$0xff]  ;;  %1249 = vst.msk [vmem:[#allocation3 + $0x110] sm:$0xff] %vm1214_vm8, %v1200_v50 }
 0x1ed   :  { %1434 = vst [vmem:[%s2510_s1 + $0x108] sm:$0xff] %v1433_v6 }
 0x1f3   :  { %v1201_v44 = vpop.trf.xlu2  ;;  %v1435_v52 = vld [vmem:[#allocation3 + $0x110] sm:$0xff] }
 0x1f4   :  { %1250 = vst.msk [vmem:[#allocation3 + $0x118] sm:$0xff] %vm1214_vm8, %v1201_v44 }
 0x1f5   :  { %1436 = vst [vmem:[%s2510_s1 + $0x110] sm:$0xff] %v1435_v52 }
 0x1fb   :  { %v1437_v55 = vld [vmem:[#allocation3 + $0x118] sm:$0xff]  ;;  %v1202_v60 = vpop.trf.xlu2 }
 0x1fc   :  { %1438 = vst [vmem:[%s2510_s1 + $0x118] sm:$0xff] %v1437_v55 }
 0x1fd   :  { %1251 = vst.msk [vmem:[#allocation3 + $0x120] sm:$0xff] %vm1214_vm8, %v1202_v60 }
 0x1ff   :  { %v1166_v0 = vpop.trf.xlu1 }
 0x200   :  { %1231 = vst.msk [vmem:[#allocation3 + $0x80] sm:$0xff] %vm1214_vm8, %v1166_v0 }
 0x203   :  { %v1203_v53 = vpop.trf.xlu2 }
 0x204   :  { %1252 = vst.msk [vmem:[#allocation3 + $0x128] sm:$0xff] %vm1214_vm8, %v1203_v53  ;;  %v1439_v14 = vld [vmem:[#allocation3 + $0x120] sm:$0xff] }
 0x205   :  { %1440 = vst [vmem:[%s2510_s1 + $0x120] sm:$0xff] %v1439_v14 }
 0x207   :  { %v1399_v5 = vld [vmem:[#allocation3 + $0x80] sm:$0xff]  ;;  %v1167_v3 = vpop.trf.xlu1 }
 0x208   :  { %1400 = vst [vmem:[%s2510_s1 + $0x80] sm:$0xff] %v1399_v5 }
 0x209   :  { %1232 = vst.msk [vmem:[#allocation3 + $0x88] sm:$0xff] %vm1214_vm8, %v1167_v3 }
 0x20b   :  { %v1441_v45 = vld [vmem:[#allocation3 + $0x128] sm:$0xff]  ;;  %v1204_v28 = vpop.trf.xlu2 }
 0x20c   :  { %1442 = vst [vmem:[%s2510_s1 + $0x128] sm:$0xff] %v1441_v45 }
 0x20f   :  { %v1168_v7 = vpop.trf.xlu1 }
 0x210   :  { %v1401_v62 = vld [vmem:[#allocation3 + $0x88] sm:$0xff]  ;;  %1233 = vst.msk [vmem:[#allocation3 + $0x90] sm:$0xff] %vm1214_vm8, %v1168_v7 }
 0x211   :  { %1402 = vst [vmem:[%s2510_s1 + $0x88] sm:$0xff] %v1401_v62 }
 0x213   :  { %v1205_v63 = vpop.trf.xlu2 }
 0x217   :  { %v1403_v20 = vld [vmem:[#allocation3 + $0x90] sm:$0xff]  ;;  %v1169_v54 = vpop.trf.xlu1 }
 0x218   :  { %1404 = vst [vmem:[%s2510_s1 + $0x90] sm:$0xff] %v1403_v20 }
 0x219   :  { %1234 = vst.msk [vmem:[#allocation3 + $0x98] sm:$0xff] %vm1214_vm8, %v1169_v54 }
 0x21b   :  { %v1206_v51 = vpop.trf.xlu2 }
 0x21f   :  { %v1170_v24 = vpop.trf.xlu1 }
 0x220   :  { %v1134_v36 = vpop.trf.xlu0  ;;  %1235 = vst.msk [vmem:[#allocation3 + $0xa0] sm:$0xff] %vm1214_vm8, %v1170_v24  ;;  %v1405_v41 = vld [vmem:[#allocation3 + $0x98] sm:$0xff] }
 0x221   :  { %1215 = vst.msk [vmem:[#allocation3] sm:$0xff] %vm1214_vm8, %v1134_v36 }
 0x222   :  { %1406 = vst [vmem:[%s2510_s1 + $0x98] sm:$0xff] %v1405_v41 }
 0x223   :  { %v1207_v21 = vpop.trf.xlu2 }
 0x227   :  { %v1407_v56 = vld [vmem:[#allocation3 + $0xa0] sm:$0xff]  ;;  %v1171_v11 = vpop.trf.xlu1 }
 0x228   :  { %v1367_v8 = vld [vmem:[#allocation3] sm:$0xff]  ;;  %v1135_v38 = vpop.trf.xlu0  ;;  %1408 = vst [vmem:[%s2510_s1 + $0xa0] sm:$0xff] %v1407_v56 }
 0x229   :  { %1368 = vst [vmem:[%s2510_s1] sm:$0xff] %v1367_v8 }
 0x22a   :  { %1216 = vst.msk [vmem:[#allocation3 + $0x8] sm:$0xff] %vm1214_vm8, %v1135_v38 }
 0x22b   :  { %1236 = vst.msk [vmem:[#allocation3 + $0xa8] sm:$0xff] %vm1214_vm8, %v1171_v11  ;;  %v1208_v39 = vpop.trf.xlu2 }
 0x22f   :  { %v1172_v33 = vpop.trf.xlu1 }
 0x230   :  { %v1136_v29 = vpop.trf.xlu0  ;;  %1237 = vst.msk [vmem:[#allocation3 + $0xb0] sm:$0xff] %vm1214_vm8, %v1172_v33 }
 0x231   :  { %v1369_v12 = vld [vmem:[#allocation3 + $0x8] sm:$0xff]  ;;  %1217 = vst.msk [vmem:[#allocation3 + $0x10] sm:$0xff] %vm1214_vm8, %v1136_v29 }
 0x232   :  { %1370 = vst [vmem:[%s2510_s1 + $0x8] sm:$0xff] %v1369_v12  ;;  %v1409_v4 = vld [vmem:[#allocation3 + $0xa8] sm:$0xff] }
 0x233   :  { %1410 = vst [vmem:[%s2510_s1 + $0xa8] sm:$0xff] %v1409_v4  ;;  %v1209_v30 = vpop.trf.xlu2 }
 0x237   :  { %v1411_v16 = vld [vmem:[#allocation3 + $0xb0] sm:$0xff]  ;;  %v1173_v1 = vpop.trf.xlu1 }
 0x238   :  { %v1371_v2 = vld [vmem:[#allocation3 + $0x10] sm:$0xff]  ;;  %v1137_v10 = vpop.trf.xlu0  ;;  %1412 = vst [vmem:[%s2510_s1 + $0xb0] sm:$0xff] %v1411_v16 }
 0x239   :  { %1372 = vst [vmem:[%s2510_s1 + $0x10] sm:$0xff] %v1371_v2 }
 0x23a   :  { %1218 = vst.msk [vmem:[#allocation3 + $0x18] sm:$0xff] %vm1214_vm8, %v1137_v10 }
 0x23b   :  { %1238 = vst.msk [vmem:[#allocation3 + $0xb8] sm:$0xff] %vm1214_vm8, %v1173_v1  ;;  %v1210_v49 = vpop.trf.xlu2 }
 0x23f   :  { %v1174_v58 = vpop.trf.xlu1 }
 0x240   :  { %v1138_v17 = vpop.trf.xlu0  ;;  %1239 = vst.msk [vmem:[#allocation3 + $0xc0] sm:$0xff] %vm1214_vm8, %v1174_v58 }
 0x241   :  { %v1373_v22 = vld [vmem:[#allocation3 + $0x18] sm:$0xff]  ;;  %1219 = vst.msk [vmem:[#allocation3 + $0x20] sm:$0xff] %vm1214_vm8, %v1138_v17 }
 0x242   :  { %1374 = vst [vmem:[%s2510_s1 + $0x18] sm:$0xff] %v1373_v22  ;;  %v1413_v48 = vld [vmem:[#allocation3 + $0xb8] sm:$0xff] }
 0x243   :  { %1414 = vst [vmem:[%s2510_s1 + $0xb8] sm:$0xff] %v1413_v48  ;;  %v1211_v3 = vpop.trf.xlu2 }
 0x247   :  { %v1415_v34 = vld [vmem:[#allocation3 + $0xc0] sm:$0xff]  ;;  %v1175_v23 = vpop.trf.xlu1 }
 0x248   :  { %v1375_v42 = vld [vmem:[#allocation3 + $0x20] sm:$0xff]  ;;  %v1139_v13 = vpop.trf.xlu0  ;;  %1416 = vst [vmem:[%s2510_s1 + $0xc0] sm:$0xff] %v1415_v34 }
 0x249   :  { %1376 = vst [vmem:[%s2510_s1 + $0x20] sm:$0xff] %v1375_v42 }
 0x24a   :  { %1220 = vst.msk [vmem:[#allocation3 + $0x28] sm:$0xff] %vm1214_vm8, %v1139_v13 }
 0x24b   :  { %1240 = vst.msk [vmem:[#allocation3 + $0xc8] sm:$0xff] %vm1214_vm8, %v1175_v23  ;;  %v1212_v6 = vpop.trf.xlu2 }
 0x24f   :  { %v1176_v27 = vpop.trf.xlu1 }
 0x250   :  { %v1140_v9 = vpop.trf.xlu0  ;;  %1241 = vst.msk [vmem:[#allocation3 + $0xd0] sm:$0xff] %vm1214_vm8, %v1176_v27 }
 0x251   :  { %v1377_v59 = vld [vmem:[#allocation3 + $0x28] sm:$0xff]  ;;  %1221 = vst.msk [vmem:[#allocation3 + $0x30] sm:$0xff] %vm1214_vm8, %v1140_v9 }
 0x252   :  { %1378 = vst [vmem:[%s2510_s1 + $0x28] sm:$0xff] %v1377_v59  ;;  %v1417_v31 = vld [vmem:[#allocation3 + $0xc8] sm:$0xff] }
 0x253   :  { %1418 = vst [vmem:[%s2510_s1 + $0xc8] sm:$0xff] %v1417_v31  ;;  %v1213_v44 = vpop.trf.xlu2 }
 0x257   :  { %v1419_v61 = vld [vmem:[#allocation3 + $0xd0] sm:$0xff]  ;;  %v1177_v37 = vpop.trf.xlu1 }
 0x258   :  { %v1379_v25 = vld [vmem:[#allocation3 + $0x30] sm:$0xff]  ;;  %v1141_v35 = vpop.trf.xlu0  ;;  %1420 = vst [vmem:[%s2510_s1 + $0xd0] sm:$0xff] %v1419_v61 }
 0x259   :  { %1380 = vst [vmem:[%s2510_s1 + $0x30] sm:$0xff] %v1379_v25 }
 0x25a   :  { %1222 = vst.msk [vmem:[#allocation3 + $0x38] sm:$0xff] %vm1214_vm8, %v1141_v35 }
 0x25b   :  { %1242 = vst.msk [vmem:[#allocation3 + $0xd8] sm:$0xff] %vm1214_vm8, %v1177_v37 }
 0x25f   :  { %v1178_v18 = vpop.trf.xlu1 }
 0x260   :  { %v1142_v57 = vpop.trf.xlu0  ;;  %1243 = vst.msk [vmem:[#allocation3 + $0xe0] sm:$0xff] %vm1214_vm8, %v1178_v18 }
 0x261   :  { %v1381_v46 = vld [vmem:[#allocation3 + $0x38] sm:$0xff]  ;;  %1223 = vst.msk [vmem:[#allocation3 + $0x40] sm:$0xff] %vm1214_vm8, %v1142_v57 }
 0x262   :  { %1382 = vst [vmem:[%s2510_s1 + $0x38] sm:$0xff] %v1381_v46  ;;  %v1421_v19 = vld [vmem:[#allocation3 + $0xd8] sm:$0xff] }
 0x263   :  { %1422 = vst [vmem:[%s2510_s1 + $0xd8] sm:$0xff] %v1421_v19 }
 0x267   :  { %v1423_v26 = vld [vmem:[#allocation3 + $0xe0] sm:$0xff]  ;;  %v1179_v0 = vpop.trf.xlu1 }
 0x268   :  { %v1383_v43 = vld [vmem:[#allocation3 + $0x40] sm:$0xff]  ;;  %v1143_v47 = vpop.trf.xlu0  ;;  %1424 = vst [vmem:[%s2510_s1 + $0xe0] sm:$0xff] %v1423_v26 }
 0x269   :  { %1384 = vst [vmem:[%s2510_s1 + $0x40] sm:$0xff] %v1383_v43 }
 0x26a   :  { %1224 = vst.msk [vmem:[#allocation3 + $0x48] sm:$0xff] %vm1214_vm8, %v1143_v47 }
 0x26b   :  { %1244 = vst.msk [vmem:[#allocation3 + $0xe8] sm:$0xff] %vm1214_vm8, %v1179_v0 }
 0x26f   :  { %v1180_v32 = vpop.trf.xlu1 }
 0x270   :  { %v1144_v40 = vpop.trf.xlu0  ;;  %1245 = vst.msk [vmem:[#allocation3 + $0xf0] sm:$0xff] %vm1214_vm8, %v1180_v32 }
 0x271   :  { %v1385_v5 = vld [vmem:[#allocation3 + $0x48] sm:$0xff]  ;;  %1225 = vst.msk [vmem:[#allocation3 + $0x50] sm:$0xff] %vm1214_vm8, %v1144_v40 }
 0x272   :  { %1386 = vst [vmem:[%s2510_s1 + $0x48] sm:$0xff] %v1385_v5  ;;  %v1425_v15 = vld [vmem:[#allocation3 + $0xe8] sm:$0xff] }
 0x273   :  { %1426 = vst [vmem:[%s2510_s1 + $0xe8] sm:$0xff] %v1425_v15 }
 0x277   :  { %v1427_v50 = vld [vmem:[#allocation3 + $0xf0] sm:$0xff]  ;;  %v1181_v20 = vpop.trf.xlu1 }
 0x278   :  { %v1387_v7 = vld [vmem:[#allocation3 + $0x50] sm:$0xff]  ;;  %v1145_v62 = vpop.trf.xlu0  ;;  %1428 = vst [vmem:[%s2510_s1 + $0xf0] sm:$0xff] %v1427_v50 }
 0x279   :  { %1388 = vst [vmem:[%s2510_s1 + $0x50] sm:$0xff] %v1387_v7 }
 0x27a   :  { %1226 = vst.msk [vmem:[#allocation3 + $0x58] sm:$0xff] %vm1214_vm8, %v1145_v62 }
 0x27b   :  { %1246 = vst.msk [vmem:[#allocation3 + $0xf8] sm:$0xff] %vm1214_vm8, %v1181_v20 }
 0x280   :  { %v1146_v54 = vpop.trf.xlu0 }
 0x281   :  { %v1389_v36 = vld [vmem:[#allocation3 + $0x58] sm:$0xff]  ;;  %1227 = vst.msk [vmem:[#allocation3 + $0x60] sm:$0xff] %vm1214_vm8, %v1146_v54 }
 0x282   :  { %1390 = vst [vmem:[%s2510_s1 + $0x58] sm:$0xff] %v1389_v36  ;;  %v1429_v24 = vld [vmem:[#allocation3 + $0xf8] sm:$0xff] }
 0x283   :  { %1430 = vst [vmem:[%s2510_s1 + $0xf8] sm:$0xff] %v1429_v24 }
 0x288   :  { %v1391_v52 = vld [vmem:[#allocation3 + $0x60] sm:$0xff]  ;;  %v1147_v41 = vpop.trf.xlu0 }
 0x289   :  { %1392 = vst [vmem:[%s2510_s1 + $0x60] sm:$0xff] %v1391_v52 }
 0x28a   :  { %1228 = vst.msk [vmem:[#allocation3 + $0x68] sm:$0xff] %vm1214_vm8, %v1147_v41 }
 0x290   :  { %v1148_v8 = vpop.trf.xlu0 }
 0x291   :  { %v1393_v38 = vld [vmem:[#allocation3 + $0x68] sm:$0xff]  ;;  %1229 = vst.msk [vmem:[#allocation3 + $0x70] sm:$0xff] %vm1214_vm8, %v1148_v8 }
 0x292   :  { %1394 = vst [vmem:[%s2510_s1 + $0x68] sm:$0xff] %v1393_v38 }
 0x298   :  { %v1395_v55 = vld [vmem:[#allocation3 + $0x70] sm:$0xff]  ;;  %v1149_v60 = vpop.trf.xlu0 }
 0x299   :  { %1396 = vst [vmem:[%s2510_s1 + $0x70] sm:$0xff] %v1395_v55 }
 0x29a   :  { %1230 = vst.msk [vmem:[#allocation3 + $0x78] sm:$0xff] %vm1214_vm8, %v1149_v60 }
 0x2a1   :  { %v1397_v56 = vld [vmem:[#allocation3 + $0x78] sm:$0xff] }
 0x2a2   :  { %1398 = vst [vmem:[%s2510_s1 + $0x78] sm:$0xff] %v1397_v56 }

// kernel: tpu_custom_call.1
= control target key start
LH: loop header
LB: loop body
LE: loop exit
PB: predicated region body
PF: predicated region fallthrough
CT: control target
= control target key end

     0   :  { %6 = vsyncpa [#allocation3], 0  ;;  %s1933_s0 = inlined_call_operand.hbm [shape: f32[30,300], index: 0, kind: input, shape index: {}]   ;;  %s1934_s1 = inlined_call_operand.hbm [shape: f32[30,300], index: 1, kind: output, shape index: {}]  }
   0x1   :  { %7 = vsyncpa [#allocation4], 0  ;;  %s12_s8 = sshll.u32 %s1933_s0, 4  ;;  %s1183_s9 = smov [#allocation2]   ;;  %s13_s8 = int_to_ptr.hbm [resolvable:$true] %s12_s8 }
   0x2   :  { %s14_s10 = sshll.u32 %s1183_s9, 4  ;;  %s1184_s11 = smov 384   ;;  %s15_s10 = int_to_ptr.vmem [resolvable:$true] %s14_s10 }
   0x3   :  { %s1185_s12 = smov 24  }
   0x4   :  { %20 = dma.hbm_to_vmem [thread:$0]  %s13_s8, 1536, %s15_s10, [#allocation3], %s1184_s11, %s1184_s11, %s1185_s12  }
   0x5   :  { %1179 = dma.done.wait [#allocation3], 1536  }
   0x6   :  { %1180 = vsyncadd [#allocation3], 4294965760  ;;  %v1203_v0 = vld [vmem:[#allocation2] sm:$0xff]  ;;  %v1205_v1 = vld [vmem:[#allocation2 + $0x8] sm:$0xff]  ;;  %s1186_s0 = smov [#allocation5]   ;;  %s973_s16 = sshll.u32 %s1934_s1, 4  ;;  %s974_s16 = int_to_ptr.hbm [resolvable:$true] %s973_s16 }
   0x7   :  { %v1207_v2 = vld [vmem:[#allocation2 + $0x10] sm:$0xff]  ;;  %v986_v3 = vmul.f32 -1.442695, %v1203_v0  ;;  %v987_v4 = vmul.f32 -1.442695, %v1205_v1  ;;  %s971_s13 = sshll.u32 %s1186_s0, 4  ;;  %s972_s13 = int_to_ptr.vmem [resolvable:$true] %s971_s13 }
   0x8   :  { %v988_v5 = vmul.f32 -1.442695, %v1207_v2  ;;  %v1212_v6 = vld [vmem:[#allocation2 + $0x18] sm:$0x7]  ;;  %v1214_v7 = vld [vmem:[#allocation2 + $0x20] sm:$0x7] }
   0x9   :  { %v1216_v8 = vld [vmem:[#allocation2 + $0x28] sm:$0x7]  ;;  %1011 = vpow2.f32 %v986_v3  ;;  %v94_v9 = vmul.f32 %v1212_v6, %v1212_v6  ;;  %v95_v10 = vmul.f32 %v1214_v7, %v1214_v7  ;;  %v1224_v12 = vld [vmem:[#allocation2 + $0x18] sm:$0x38]  ;;  %v1226_v13 = vld [vmem:[#allocation2 + $0x20] sm:$0x38] }
   0xa   :  { %v96_v11 = vmul.f32 %v1216_v8, %v1216_v8  ;;  %1013 = vpow2.f32 %v987_v4  ;;  %v229_v14 = vmul.f32 %v1224_v12, %v1224_v12  ;;  %v230_v15 = vmul.f32 %v1226_v13, %v1226_v13  ;;  %v1232_v21 = vld [vmem:[#allocation2 + $0x28] sm:$0x38]  ;;  %v1322_v61 = vld [vmem:[#allocation2 + $0x30] sm:$0x1] }
   0xb   :  { %1015 = vpow2.f32 %v988_v5  ;;  %v100_v16 = vrot.slane %v94_v9, 1  ;;  %v109_v17 = vrot.slane %v94_v9, 2  ;;  %v101_v18 = vrot.slane %v95_v10, 1 }
   0xc   :  { %v110_v19 = vrot.slane %v95_v10, 2  ;;  %v102_v20 = vrot.slane %v96_v11, 1  ;;  %v111_v25 = vrot.slane %v96_v11, 2  ;;  %v235_v26 = vrot.slane %v229_v14, 1 }
   0xd   :  { %v106_v22 = vadd.f32 %v100_v16, %v94_v9  ;;  %v107_v23 = vadd.f32 %v101_v18, %v95_v10  ;;  %v236_v30 = vrot.slane %v230_v15, 1  ;;  %v1236_v31 = vmul.f32 %v1232_v21, %v1232_v21 }
   0xe   :  { %v108_v24 = vadd.f32 %v102_v20, %v96_v11  ;;  %v241_v39 = vadd.f32 %v235_v26, %v229_v14  ;;  %v244_v40 = vrot.slane %v229_v14, 2  ;;  %v245_v42 = vrot.slane %v230_v15, 2 }
   0xf   :  { %v1012_v27 = vpop.eup %1011  ;;  %v115_v28 = vadd.f32 %v109_v17, %v106_v22  ;;  %v116_v29 = vadd.f32 %v110_v19, %v107_v23  ;;  %v242_v41 = vadd.f32 %v236_v30, %v230_v15  ;;  %v237_v43 = vrot.slane %v1236_v31, 1 }
  0x10   :  { %v1014_v32 = vpop.eup %1013  ;;  %v37_v33 = vadd.f32 1.0, %v1012_v27  ;;  %v117_v38 = vadd.f32 %v111_v25, %v108_v24  ;;  %v246_v50 = vrot.slane %v1236_v31, 2  ;;  %v250_v53 = vadd.f32 %v244_v40, %v241_v39 }
  0x11   :  { %v1016_v34 = vpop.eup %1015  ;;  %v38_v35 = vadd.f32 1.0, %v1014_v32  ;;  %v118_v36 = vmul.f32 0.57735026, %v115_v28  ;;  %v119_v37 = vmul.f32 0.57735026, %v116_v29  ;;  %v251_v54 = vadd.f32 %v245_v42, %v242_v41 }
  0x12   :  { %1017 = vrcp.f32 %v37_v33  ;;  %v49_v44 = vand.u32 2147483647, %v37_v33  ;;  %v51_v45 = vand.u32 2147483648, %v37_v33  ;;  %v1239_v46 = vadd.f32 1.0, %v1016_v34  ;;  %v1278_v29 = vld [vmem:[#allocation2 + $0x18] sm:$0xc0] }
  0x13   :  { %1019 = vrcp.f32 %v38_v35  ;;  %v1241_v47 = vadd.f32 1e-08, %v118_v36  ;;  %v64_v48 = vand.u32 2147483647, %v38_v35  ;;  %v1243_v49 = vadd.f32 1e-08, %v119_v37 }
  0x14   :  { %v66_v51 = vand.u32 2147483648, %v38_v35  ;;  %1021 = vrcp.f32 %v1239_v46  ;;  %v120_v52 = vmul.f32 0.57735026, %v117_v38  ;;  %vm45_vm0 = vweird.f32 %v37_v33 }
  0x15   :  { %1023 = vrsqrt.f32 %v1241_v47  ;;  %v243_v55 = vadd.f32 %v237_v43, %v1236_v31  ;;  %vm1249_vm1 = vcmp.eq.f32.partialorder %v49_v44, 8.507059e+37  ;;  %v52_v58 = vor.u32 1.1754944e-38, %v51_v45 }
  0x16   :  { %vm60_vm2 = vweird.f32 %v38_v35  ;;  %1025 = vrsqrt.f32 %v1243_v49  ;;  %vm1254_vm3 = vcmp.eq.f32.partialorder %v64_v48, 8.507059e+37  ;;  %v79_v62 = vand.u32 2147483647, %v1239_v46 }
  0x17   :  { %v81_v63 = vand.u32 2147483648, %v1239_v46  ;;  %v67_v4 = vor.u32 1.1754944e-38, %v66_v51  ;;  %v1260_v5 = vadd.f32 1e-08, %v120_v52  ;;  %v253_v9 = vmul.f32 0.57735026, %v250_v53 }
  0x18   :  { %v1018_v56 = vpop.eup %1017  ;;  %vm75_vm5 = vweird.f32 %v1239_v46  ;;  %v134_v11 = vand.u32 2147483648, %v1241_v47  ;;  %v254_v16 = vmul.f32 0.57735026, %v251_v54  ;;  %vm1266_vm7 = vcmp.eq.f32.partialorder %v79_v62, 8.507059e+37 }
  0x19   :  { %v1020_v59 = vpop.eup %1019  ;;  %v41_v60 = vmul.f32 %v1018_v56, %v37_v33  ;;  %vm46_vm4 = vweird.f32 %v1018_v56  ;;  %1027 = vrsqrt.f32 %v1260_v5  ;;  %v82_v22 = vor.u32 1.1754944e-38, %v81_v63 }
  0x1a   :  { %v56_v3 = vmul.f32 %v1020_v59, %v38_v35  ;;  %v1022_v14 = vpop.eup %1021  ;;  %vm61_vm6 = vweird.f32 %v1020_v59  ;;  %vm1271_vm8 = vmor %vm45_vm0, %vm46_vm4  ;;  %v1276_v27 = vadd.f32 1e-08, %v253_v9  ;;  %v252_v28 = vadd.f32 %v246_v50, %v243_v55 }
  0x1b   :  { %v42_v10 = vsub.f32 1.0, %v41_v60  ;;  %v1024_v17 = vpop.eup %1023  ;;  %v71_v19 = vmul.f32 %v1022_v14, %v1239_v46  ;;  %vm1282_vm9 = vmor %vm60_vm2, %vm61_vm6  ;;  %vm76_vm10 = vweird.f32 %v1022_v14  ;;  %vm131_vm11 = vcmp.eq.f32.partialorder %v1241_v47, inf }
  0x1c   :  { %v57_v15 = vsub.f32 1.0, %v56_v3  ;;  %v1026_v23 = vpop.eup %1025  ;;  %v125_v26 = vmul.f32 %v1024_v17, %v1241_v47  ;;  %vm133_vm12 = vcmp.eq.f32.partialorder %v1241_v47, 0.0  ;;  %vm143_vm13 = vcmp.eq.f32.partialorder %v1243_v49, inf  ;;  %vm1305_vm15 = vmor %vm75_vm5, %vm76_vm10 }
  0x1d   :  { %v43_v18 = vmul.f32 %v1018_v56, %v42_v10  ;;  %v72_v32 = vsub.f32 1.0, %v71_v19  ;;  %v137_v33 = vmul.f32 %v1026_v23, %v1243_v49  ;;  %1029 = vrsqrt.f32 %v1276_v27 }
  0x1e   :  { %v58_v25 = vmul.f32 %v1020_v59, %v57_v15  ;;  %v126_v36 = vmul.f32 %v1024_v17, %v125_v26  ;;  %v1291_v37 = vadd.f32 1e-08, %v254_v16  ;;  %vm145_vm14 = vcmp.eq.f32.partialorder %v1243_v49, 0.0  ;;  %v1347_v26 = vld [vmem:[#allocation2 + $0x20] sm:$0xc0] }
  0x1f   :  { %v44_v30 = vadd.f32 %v1018_v56, %v43_v18  ;;  %v73_v38 = vmul.f32 %v1022_v14, %v72_v32  ;;  %v138_v39 = vmul.f32 %v1026_v23, %v137_v33  ;;  %v367_v40 = vmul.f32 %v1278_v29, %v1278_v29  ;;  %v1028_v41 = vpop.eup %1027 }
  0x20   :  { %v59_v34 = vadd.f32 %v1020_v59, %v58_v25  ;;  %v127_v45 = vmul.f32 0.5, %v126_v36  ;;  %v255_v48 = vmul.f32 0.57735026, %v252_v28  ;;  %1031 = vrsqrt.f32 %v1291_v37  ;;  %v1349_v28 = vld [vmem:[#allocation2 + $0x38] sm:$0x1] }
  0x21   :  { %v48_v35 = vsel %vm1271_vm8, %v1018_v56, %v44_v30  ;;  %v74_v52 = vadd.f32 %v1022_v14, %v73_v38  ;;  %v139_v53 = vmul.f32 0.5, %v138_v39  ;;  %v149_v56 = vmul.f32 %v1028_v41, %v1260_v5 }
  0x22   :  { %v53_v42 = vsel %vm1249_vm1, %v52_v58, %v48_v35  ;;  %v63_v43 = vsel %vm1282_vm9, %v1020_v59, %v59_v34  ;;  %v128_v55 = vsub.f32 1.5, %v127_v45  ;;  %v146_v58 = vand.u32 2147483648, %v1243_v49 }
  0x23   :  { %v85_v50 = vmul.f32 %v53_v42, %v1203_v0  ;;  %v68_v51 = vsel %vm1254_vm3, %v67_v4, %v63_v43  ;;  %v78_v46 = vsel %vm1305_vm15, %v1022_v14, %v74_v52  ;;  %v140_v57 = vsub.f32 1.5, %v139_v53  ;;  %v1030_v0 = vpop.eup %1029 }
  0x24   :  { %v86_v54 = vmul.f32 %v68_v51, %v1205_v1  ;;  %vm155_vm0 = vcmp.eq.f32.partialorder %v1260_v5, inf  ;;  %v83_v59 = vsel %vm1266_vm7, %v82_v22, %v78_v46  ;;  %v129_v1 = vmul.f32 %v1024_v17, %v128_v55 }
  0x25   :  { %88 = vst [vmem:[#allocation5] sm:$0xff] %v85_v50  ;;  %v150_v60 = vmul.f32 %v1028_v41, %v149_v56  ;;  %vm157_vm1 = vcmp.eq.f32.partialorder %v1260_v5, 0.0  ;;  %v87_v62 = vmul.f32 %v83_v59, %v1207_v2  ;;  %v141_v63 = vmul.f32 %v1026_v23, %v140_v57 }
  0x26   :  { %89 = vst [vmem:[#allocation5 + $0x8] sm:$0xff] %v86_v54  ;;  %v260_v3 = vmul.f32 %v1030_v0, %v1276_v27  ;;  %v1326_v4 = vadd.f32 1e-08, %v255_v48  ;;  %v130_v9 = vmul.f32 %v129_v1, %v1241_v47  ;;  %v158_v14 = vand.u32 2147483648, %v1260_v5  ;;  %v1032_v18 = vpop.eup %1031 }
  0x27   :  { %v151_v10 = vmul.f32 0.5, %v150_v60  ;;  %v373_v15 = vrot.slane %v367_v40, 1  ;;  %90 = vst [vmem:[#allocation5 + $0x10] sm:$0xff] %v87_v62  ;;  %v142_v16 = vmul.f32 %v141_v63, %v1243_v49  ;;  %v382_v2 = vmul.f32 %v1322_v61, %v1322_v61 }
  0x28   :  { %v261_v17 = vmul.f32 %v1030_v0, %v260_v3  ;;  %1033 = vrsqrt.f32 %v1326_v4  ;;  %v132_v19 = vsel %vm131_vm11, %v1241_v47, %v130_v9  ;;  %vm266_vm2 = vcmp.eq.f32.partialorder %v1276_v27, inf }
  0x29   :  { %v152_v20 = vsub.f32 1.5, %v151_v10  ;;  %vm268_vm3 = vcmp.eq.f32.partialorder %v1276_v27, 0.0  ;;  %v135_v22 = vsel %vm133_vm12, %v134_v11, %v132_v19  ;;  %v144_v23 = vsel %vm143_vm13, %v1243_v49, %v142_v16  ;;  %v1388_v16 = vld [vmem:[#allocation2 + $0x40] sm:$0x1] }
  0x2a   :  { %v262_v24 = vmul.f32 0.5, %v261_v17  ;;  %v272_v25 = vmul.f32 %v1032_v18, %v1291_v37  ;;  %v989_v30 = vmul.f32 -1.442695, %v135_v22  ;;  %v147_v31 = vsel %vm145_vm14, %v146_v58, %v144_v23 }
  0x2b   :  { %v153_v32 = vmul.f32 %v1028_v41, %v152_v20  ;;  %v379_v33 = vadd.f32 %v373_v15, %v367_v40  ;;  %v990_v34 = vmul.f32 -1.442695, %v147_v31  ;;  %v388_v36 = vrot.slane %v382_v2, 2  ;;  %v1382_v15 = vld [vmem:[#allocation2 + $0x28] sm:$0xc0] }
  0x2c   :  { %v263_v47 = vsub.f32 1.5, %v262_v24  ;;  %v273_v11 = vmul.f32 %v1032_v18, %v272_v25  ;;  %1035 = vpow2.f32 %v989_v30  ;;  %v368_v38 = vmul.f32 %v1347_v26, %v1347_v26 }
  0x2d   :  { %v154_v35 = vmul.f32 %v153_v32, %v1260_v5  ;;  %v383_v39 = vmul.f32 %v1349_v28, %v1349_v28  ;;  %1037 = vpow2.f32 %v990_v34  ;;  %v394_v44 = vadd.f32 %v388_v36, %v379_v33 }
  0x2e   :  { %v1034_v42 = vpop.eup %1033  ;;  %v264_v43 = vmul.f32 %v1030_v0, %v263_v47  ;;  %v274_v49 = vmul.f32 0.5, %v273_v11  ;;  %v269_v41 = vand.u32 2147483648, %v1276_v27  ;;  %v374_v48 = vrot.slane %v368_v38, 1 }
  0x2f   :  { %v156_v40 = vsel %vm155_vm0, %v1260_v5, %v154_v35  ;;  %v284_v45 = vmul.f32 %v1034_v42, %v1326_v4  ;;  %v397_v53 = vmul.f32 0.57735026, %v394_v44  ;;  %vm278_vm4 = vcmp.eq.f32.partialorder %v1291_v37, inf }
  0x30   :  { %v159_v50 = vsel %vm157_vm1, %v158_v14, %v156_v40  ;;  %v265_v51 = vmul.f32 %v264_v43, %v1276_v27  ;;  %v275_v52 = vsub.f32 1.5, %v274_v49  ;;  %v389_v58 = vrot.slane %v383_v39, 2 }
  0x31   :  { %v991_v54 = vmul.f32 -1.442695, %v159_v50  ;;  %v285_v55 = vmul.f32 %v1034_v42, %v284_v45  ;;  %v1370_v57 = vadd.f32 1e-08, %v397_v53  ;;  %v380_v1 = vadd.f32 %v374_v48, %v368_v38 }
  0x32   :  { %v267_v56 = vsel %vm266_vm2, %v1276_v27, %v265_v51  ;;  %v276_v46 = vmul.f32 %v1032_v18, %v275_v52  ;;  %v1036_v0 = vpop.eup %1035  ;;  %vm280_vm5 = vcmp.eq.f32.partialorder %v1291_v37, 0.0  ;;  %v281_v10 = vand.u32 2147483648, %v1291_v37 }
  0x33   :  { %1039 = vpow2.f32 %v991_v54  ;;  %v270_v5 = vsel %vm268_vm3, %v269_v41, %v267_v56  ;;  %v286_v59 = vmul.f32 0.5, %v285_v55  ;;  %v1038_v60 = vpop.eup %1037  ;;  %v1374_v62 = vadd.f32 1.0, %v1036_v0 }
  0x34   :  { %v992_v63 = vmul.f32 -1.442695, %v270_v5  ;;  %v277_v3 = vmul.f32 %v276_v46, %v1291_v37  ;;  %1041 = vrsqrt.f32 %v1370_v57  ;;  %v1378_v9 = vadd.f32 1.0, %v1038_v60 }
  0x35   :  { %v287_v14 = vsub.f32 1.5, %v286_v59  ;;  %1043 = vrcp.f32 %v1374_v62  ;;  %vm290_vm6 = vcmp.eq.f32.partialorder %v1326_v4, inf  ;;  %vm292_vm7 = vcmp.eq.f32.partialorder %v1326_v4, 0.0 }
  0x36   :  { %v293_v27 = vand.u32 2147483648, %v1326_v4  ;;  %v181_v17 = vand.u32 2147483647, %v1374_v62  ;;  %v183_v2 = vand.u32 2147483648, %v1374_v62  ;;  %1045 = vrcp.f32 %v1378_v9 }
  0x37   :  { %v395_v18 = vadd.f32 %v389_v58, %v380_v1  ;;  %v196_v19 = vand.u32 2147483647, %v1378_v9  ;;  %v198_v20 = vand.u32 2147483648, %v1378_v9  ;;  %1047 = vpow2.f32 %v992_v63 }
  0x38   :  { %v279_v22 = vsel %vm278_vm4, %v1291_v37, %v277_v3  ;;  %v288_v25 = vmul.f32 %v1034_v42, %v287_v14  ;;  %v369_v30 = vmul.f32 %v1382_v15, %v1382_v15  ;;  %v1404_v31 = vmul.f32 %v1388_v16, %v1388_v16 }
  0x39   :  { %v1040_v23 = vpop.eup %1039  ;;  %v282_v24 = vsel %vm280_vm5, %v281_v10, %v279_v22  ;;  %vm177_vm8 = vweird.f32 %v1374_v62  ;;  %vm192_vm9 = vweird.f32 %v1378_v9  ;;  %vm1412_vm10 = vcmp.eq.f32.partialorder %v181_v17, 8.507059e+37 }
  0x3a   :  { %v1406_v32 = vpop.eup %1041  ;;  %v1410_v33 = vadd.f32 1.0, %v1040_v23  ;;  %v993_v34 = vmul.f32 -1.442695, %v282_v24  ;;  %v184_v47 = vor.u32 1.1754944e-38, %v183_v2  ;;  %v289_v11 = vmul.f32 %v288_v25, %v1326_v4 }
  0x3b   :  { %v404_v36 = vmul.f32 %v1406_v32, %v1370_v57  ;;  %v1044_v35 = vpop.eup %1043  ;;  %vm1419_vm11 = vcmp.eq.f32.partialorder %v196_v19, 8.507059e+37  ;;  %v199_v39 = vor.u32 1.1754944e-38, %v198_v20  ;;  %v413_v42 = vand.u32 2147483648, %v1370_v57 }
  0x3c   :  { %1049 = vrcp.f32 %v1410_v33  ;;  %v398_v43 = vmul.f32 0.57735026, %v395_v18  ;;  %v1046_v49 = vpop.eup %1045  ;;  %v173_v44 = vmul.f32 %v1044_v35, %v1374_v62  ;;  %v291_v40 = vsel %vm290_vm6, %v1326_v4, %v289_v11 }
  0x3d   :  { %1051 = vpow2.f32 %v993_v34  ;;  %v375_v41 = vrot.slane %v369_v30, 1  ;;  %v1048_v45 = vpop.eup %1047  ;;  %vm178_vm12 = vweird.f32 %v1044_v35  ;;  %v188_v48 = vmul.f32 %v1046_v49, %v1378_v9 }
  0x3e   :  { %v211_v50 = vand.u32 2147483647, %v1410_v33  ;;  %v213_v51 = vand.u32 2147483648, %v1410_v33  ;;  %v174_v52 = vsub.f32 1.0, %v173_v44  ;;  %v1432_v53 = vadd.f32 1.0, %v1048_v45  ;;  %vm1445_vm15 = vmor %vm177_vm8, %vm178_vm12 }
  0x3f   :  { %v294_v54 = vsel %vm292_vm7, %v293_v27, %v291_v40  ;;  %v405_v55 = vmul.f32 %v1406_v32, %v404_v36  ;;  %v189_v56 = vsub.f32 1.0, %v188_v48  ;;  %vm193_vm13 = vweird.f32 %v1046_v49 }
  0x40   :  { %v994_v46 = vmul.f32 -1.442695, %v294_v54  ;;  %v390_v58 = vrot.slane %v1404_v31, 2  ;;  %v175_v0 = vmul.f32 %v1044_v35, %v174_v52  ;;  %vm207_vm14 = vweird.f32 %v1410_v33  ;;  %vm1456_vm1 = vmor %vm192_vm9, %vm193_vm13 }
  0x41   :  { %1053 = vrcp.f32 %v1432_v53  ;;  %v1440_v5 = vadd.f32 1e-08, %v398_v43  ;;  %v190_v1 = vmul.f32 %v1046_v49, %v189_v56  ;;  %vm1449_vm0 = vcmp.eq.f32.partialorder %v211_v50, 8.507059e+37 }
  0x42   :  { %v1050_v59 = vpop.eup %1049  ;;  %1055 = vpow2.f32 %v994_v46  ;;  %v406_v63 = vmul.f32 0.5, %v405_v55  ;;  %v176_v10 = vadd.f32 %v1044_v35, %v175_v0  ;;  %v214_v27 = vor.u32 1.1754944e-38, %v213_v51 }
  0x43   :  { %v1052_v3 = vpop.eup %1051  ;;  %v203_v62 = vmul.f32 %v1050_v59, %v1410_v33  ;;  %vm410_vm2 = vcmp.eq.f32.partialorder %v1370_v57, inf  ;;  %v1462_v17 = vadd.f32 %v375_v41, %v369_v30  ;;  %v191_v2 = vadd.f32 %v1046_v49, %v190_v1 }
  0x44   :  { %vm312_vm3 = vweird.f32 %v1432_v53  ;;  %v316_v18 = vand.u32 2147483647, %v1432_v53  ;;  %v1466_v19 = vadd.f32 1.0, %v1052_v3  ;;  %vm412_vm4 = vcmp.eq.f32.partialorder %v1370_v57, 0.0 }
  0x45   :  { %v180_v9 = vsel %vm1445_vm15, %v1044_v35, %v176_v10  ;;  %v204_v20 = vsub.f32 1.0, %v203_v62  ;;  %vm208_vm5 = vweird.f32 %v1050_v59  ;;  %1057 = vrsqrt.f32 %v1440_v5 }
  0x46   :  { %v185_v22 = vsel %vm1412_vm10, %v184_v47, %v180_v9  ;;  %v195_v23 = vsel %vm1456_vm1, %v1046_v49, %v191_v2  ;;  %1059 = vrcp.f32 %v1466_v19  ;;  %v407_v24 = vsub.f32 1.5, %v406_v63  ;;  %vm1482_vm6 = vmor %vm207_vm14, %vm208_vm5 }
  0x47   :  { %v1054_v25 = vpop.eup %1053  ;;  %v217_v30 = vperm.slane %v185_v22, 0  ;;  %v200_v34 = vsel %vm1419_vm11, %v199_v39, %v195_v23  ;;  %v205_v11 = vmul.f32 %v1050_v59, %v204_v20  ;;  %v318_v36 = vand.u32 2147483648, %v1432_v53  ;;  %v1545_v22 = vld [vmem:[#allocation2 + $0x38] sm:$0xe] }
  0x48   :  { %v1056_v35 = vpop.eup %1055  ;;  %v218_v43 = vperm.slane %v200_v34, 0  ;;  %v308_v47 = vmul.f32 %v1054_v25, %v1432_v53  ;;  %vm1487_vm7 = vcmp.eq.f32.partialorder %v316_v18, 8.507059e+37  ;;  %v331_v38 = vand.u32 2147483647, %v1466_v19  ;;  %v1526_v53 = vld [vmem:[#allocation2 + $0x30] sm:$0xe] }
  0x49   :  { %v220_v39 = vmul.f32 %v217_v30, %v1212_v6  ;;  %v206_v44 = vadd.f32 %v1050_v59, %v205_v11  ;;  %v333_v40 = vand.u32 2147483648, %v1466_v19  ;;  %v1494_v41 = vadd.f32 1.0, %v1056_v35 }
  0x4a   :  { %v221_v33 = vmul.f32 %v218_v43, %v1214_v7  ;;  %v309_v45 = vsub.f32 1.0, %v308_v47  ;;  %vm313_vm8 = vweird.f32 %v1054_v25  ;;  %v408_v48 = vmul.f32 %v1406_v32, %v407_v24 }
  0x4b   :  { %v1498_v50 = vpop.eup %1057  ;;  %223 = vst [vmem:[#allocation5 + $0x18] sm:$0x7] %v220_v39  ;;  %v210_v51 = vsel %vm1482_vm6, %v1050_v59, %v206_v44  ;;  %v319_v52 = vor.u32 1.1754944e-38, %v318_v36  ;;  %vm327_vm9 = vweird.f32 %v1466_v19  ;;  %1061 = vrcp.f32 %v1494_v41  ;;  %vm1514_vm11 = vmor %vm312_vm3, %vm313_vm8 }
  0x4c   :  { %v1060_v6 = vpop.eup %1059  ;;  %224 = vst [vmem:[#allocation5 + $0x20] sm:$0x7] %v221_v33  ;;  %v215_v7 = vsel %vm1449_vm0, %v214_v27, %v210_v51  ;;  %v310_v54 = vmul.f32 %v1054_v25, %v309_v45  ;;  %vm1506_vm10 = vcmp.eq.f32.partialorder %v331_v38, 8.507059e+37  ;;  %v409_v32 = vmul.f32 %v408_v48, %v1370_v57  ;;  %v1577_v48 = vld [vmem:[#allocation2 + $0x40] sm:$0xe] }
  0x4d   :  { %v219_v56 = vperm.slane %v215_v7, 0  ;;  %v323_v0 = vmul.f32 %v1060_v6, %v1466_v19  ;;  %v334_v59 = vor.u32 1.1754944e-38, %v333_v40  ;;  %vm342_vm12 = vweird.f32 %v1494_v41 }
  0x4e   :  { %v311_v4 = vadd.f32 %v1054_v25, %v310_v54  ;;  %v346_v1 = vand.u32 2147483647, %v1494_v41  ;;  %v411_v60 = vsel %vm410_vm2, %v1370_v57, %v409_v32  ;;  %v416_v63 = vmul.f32 %v1498_v50, %v1440_v5 }
  0x4f   :  { %v222_v3 = vmul.f32 %v219_v56, %v1216_v8  ;;  %v324_v10 = vsub.f32 1.0, %v323_v0  ;;  %vm328_vm13 = vweird.f32 %v1060_v6  ;;  %v414_v14 = vsel %vm412_vm4, %v413_v42, %v411_v60 }
  0x50   :  { %v315_v62 = vsel %vm1514_vm11, %v1054_v25, %v311_v4  ;;  %v348_v27 = vand.u32 2147483648, %v1494_v41  ;;  %v995_v2 = vmul.f32 -1.442695, %v414_v14  ;;  %v417_v18 = vmul.f32 %v1498_v50, %v416_v63  ;;  %vm1550_vm15 = vmor %vm327_vm9, %vm328_vm13 }
  0x51   :  { %v1062_v9 = vpop.eup %1061  ;;  %225 = vst [vmem:[#allocation5 + $0x28] sm:$0x7] %v222_v3  ;;  %v320_v8 = vsel %vm1487_vm7, %v319_v52, %v315_v62  ;;  %v325_v20 = vmul.f32 %v1060_v6, %v324_v10  ;;  %vm422_vm14 = vcmp.eq.f32.partialorder %v1440_v5, inf  ;;  %v396_v57 = vadd.f32 %v390_v58, %v1462_v17 }
  0x52   :  { %v514_v42 = vmul.f32 %v1526_v53, %v1526_v53  ;;  %v352_v23 = vperm.slane %v320_v8, 3  ;;  %v338_v25 = vmul.f32 %v1062_v9, %v1494_v41  ;;  %vm343_vm0 = vweird.f32 %v1062_v9 }
  0x53   :  { %1063 = vpow2.f32 %v995_v2  ;;  %v326_v30 = vadd.f32 %v1060_v6, %v325_v20  ;;  %v418_v31 = vmul.f32 0.5, %v417_v18  ;;  %v399_v58 = vmul.f32 0.57735026, %v396_v57  ;;  %vm1571_vm2 = vmor %vm342_vm12, %vm343_vm0 }
  0x54   :  { %v520_v17 = vrot.slane %v514_v42, 1  ;;  %v355_v34 = vmul.f32 %v352_v23, %v1224_v12  ;;  %v339_v11 = vsub.f32 1.0, %v338_v25  ;;  %v529_v36 = vrot.slane %v514_v42, 2  ;;  %v1604_v23 = vld [vmem:[#allocation2 + $0x48] sm:$0x1] }
  0x55   :  { %v515_v35 = vmul.f32 %v1545_v22, %v1545_v22  ;;  %v330_v19 = vsel %vm1550_vm15, %v1060_v6, %v326_v30  ;;  %v419_v43 = vsub.f32 1.5, %v418_v31  ;;  %v1560_v37 = vadd.f32 1e-08, %v399_v58 }
  0x56   :  { %v526_v47 = vadd.f32 %v520_v17, %v514_v42  ;;  %358 = vst [vmem:[#allocation5 + $0x18] sm:$0x38] %v355_v34  ;;  %v335_v49 = vsel %vm1506_vm10, %v334_v59, %v330_v19  ;;  %v340_v38 = vmul.f32 %v1062_v9, %v339_v11  ;;  %vm1564_vm1 = vcmp.eq.f32.partialorder %v346_v1, 8.507059e+37  ;;  %v1587_v59 = vld [vmem:[#allocation2 + $0x30] sm:$0xf0] }
  0x57   :  { %v521_v12 = vrot.slane %v515_v35, 1  ;;  %v353_v44 = vperm.slane %v335_v49, 3  ;;  %v349_v33 = vor.u32 1.1754944e-38, %v348_v27  ;;  %v420_v45 = vmul.f32 %v1498_v50, %v419_v43  ;;  %v1609_v19 = vld [vmem:[#allocation2 + $0x38] sm:$0xf0] }
  0x58   :  { %1065 = vrsqrt.f32 %v1560_v37  ;;  %v341_v52 = vadd.f32 %v1062_v9, %v340_v38  ;;  %v425_v6 = vand.u32 2147483648, %v1440_v5  ;;  %v535_v7 = vadd.f32 %v529_v36, %v526_v47 }
  0x59   :  { %v1064_v51 = vpop.eup %1063  ;;  %v530_v54 = vrot.slane %v515_v35, 2  ;;  %v356_v55 = vmul.f32 %v353_v44, %v1226_v13  ;;  %v421_v32 = vmul.f32 %v420_v45, %v1440_v5  ;;  %v527_v56 = vadd.f32 %v521_v12, %v515_v35 }
  0x5a   :  { %v448_v41 = vadd.f32 1.0, %v1064_v51  ;;  %v345_v46 = vsel %vm1571_vm2, %v1062_v9, %v341_v52  ;;  %vm424_vm3 = vcmp.eq.f32.partialorder %v1440_v5, 0.0  ;;  %v538_v50 = vmul.f32 0.57735026, %v535_v7 }
  0x5b   :  { %v516_v0 = vmul.f32 %v1577_v48, %v1577_v48  ;;  %359 = vst [vmem:[#allocation5 + $0x20] sm:$0x38] %v356_v55  ;;  %v350_v4 = vsel %vm1564_vm1, %v349_v33, %v345_v46  ;;  %v423_v1 = vsel %vm422_vm14, %v1440_v5, %v421_v32  ;;  %v536_v10 = vadd.f32 %v530_v54, %v527_v56 }
  0x5c   :  { %1067 = vrcp.f32 %v448_v41  ;;  %v354_v13 = vperm.slane %v350_v4, 3  ;;  %v1594_v60 = vadd.f32 1e-08, %v538_v50  ;;  %v426_v3 = vsel %vm424_vm3, %v425_v6, %v423_v1 }
  0x5d   :  { %v522_v14 = vrot.slane %v516_v0, 1  ;;  %v652_v62 = vmul.f32 %v1587_v59, %v1587_v59  ;;  %v996_v2 = vmul.f32 -1.442695, %v426_v3  ;;  %vm434_vm4 = vcmp.eq.f32.partialorder %v1560_v37, inf }
  0x5e   :  { %v1066_v63 = vpop.eup %1065  ;;  %v357_v27 = vmul.f32 %v354_v13, %v1232_v21  ;;  %1069 = vrsqrt.f32 %v1594_v60  ;;  %vm436_vm5 = vcmp.eq.f32.partialorder %v1560_v37, 0.0  ;;  %v539_v9 = vmul.f32 0.57735026, %v536_v10 }
  0x5f   :  { %v428_v18 = vmul.f32 %v1066_v63, %v1560_v37  ;;  %1071 = vpow2.f32 %v996_v2  ;;  %v528_v8 = vadd.f32 %v522_v14, %v516_v0  ;;  %v437_v57 = vand.u32 2147483648, %v1560_v37 }
  0x60   :  { %360 = vst [vmem:[#allocation5 + $0x28] sm:$0x38] %v357_v27  ;;  %v531_v42 = vrot.slane %v516_v0, 2  ;;  %v658_v21 = vrot.slane %v652_v62, 1  ;;  %v667_v24 = vrot.slane %v652_v62, 2  ;;  %vm456_vm6 = vweird.f32 %v448_v41 }
  0x61   :  { %v429_v5 = vmul.f32 %v1066_v63, %v428_v18  ;;  %v460_v30 = vand.u32 2147483647, %v448_v41  ;;  %v1606_v58 = vadd.f32 1e-08, %v539_v9  ;;  %v462_v17 = vand.u32 2147483648, %v448_v41 }
  0x62   :  { %v1068_v20 = vpop.eup %1067  ;;  %v537_v34 = vadd.f32 %v531_v42, %v528_v8  ;;  %v664_v11 = vadd.f32 %v658_v21, %v652_v62  ;;  %v676_v38 = vrot.slane %v652_v62, 3  ;;  %v685_v39 = vmul.f32 %v1604_v23, %v1604_v23  ;;  %v1650_v9 = vld [vmem:[#allocation2 + $0x50] sm:$0x1] }
  0x63   :  { %v452_v25 = vmul.f32 %v1068_v20, %v448_v41  ;;  %v430_v31 = vmul.f32 0.5, %v429_v5  ;;  %vm457_vm7 = vweird.f32 %v1068_v20  ;;  %1073 = vrsqrt.f32 %v1606_v58 }
  0x64   :  { %v1070_v43 = vpop.eup %1069  ;;  %v540_v47 = vmul.f32 0.57735026, %v537_v34  ;;  %v673_v49 = vadd.f32 %v667_v24, %v664_v11  ;;  %vm1613_vm8 = vcmp.eq.f32.partialorder %v460_v30, 8.507059e+37  ;;  %vm1619_vm9 = vmor %vm456_vm6, %vm457_vm7  ;;  %v463_v52 = vor.u32 1.1754944e-38, %v462_v17 }
  0x65   :  { %v453_v36 = vsub.f32 1.0, %v452_v25  ;;  %v431_v35 = vsub.f32 1.5, %v430_v31  ;;  %v1072_v12 = vpop.eup %1071  ;;  %v545_v45 = vmul.f32 %v1070_v43, %v1594_v60  ;;  %v1629_v54 = vmul.f32 %v1609_v19, %v1609_v19  ;;  %v1657_v31 = vld [vmem:[#allocation2 + $0x40] sm:$0xf0] }
  0x66   :  { %v1623_v6 = vadd.f32 1.0, %v1072_v12  ;;  %v1625_v7 = vadd.f32 1e-08, %v540_v47  ;;  %vm551_vm10 = vcmp.eq.f32.partialorder %v1594_v60, inf  ;;  %vm553_vm11 = vcmp.eq.f32.partialorder %v1594_v60, 0.0 }
  0x67   :  { %v454_v44 = vmul.f32 %v1068_v20, %v453_v36  ;;  %v432_v33 = vmul.f32 %v1066_v63, %v431_v35  ;;  %v546_v56 = vmul.f32 %v1070_v43, %v545_v45  ;;  %v682_v41 = vadd.f32 %v676_v38, %v673_v49 }
  0x68   :  { %1075 = vrcp.f32 %v1623_v6  ;;  %v691_v46 = vrot.slane %v685_v39, 4  ;;  %v554_v3 = vand.u32 2147483648, %v1594_v60  ;;  %v659_v10 = vrot.slane %v1629_v54, 1 }
  0x69   :  { %v455_v55 = vadd.f32 %v1068_v20, %v454_v44  ;;  %v433_v32 = vmul.f32 %v432_v33, %v1560_v37  ;;  %v1074_v50 = vpop.eup %1073  ;;  %v547_v13 = vmul.f32 0.5, %v546_v56  ;;  %1077 = vrsqrt.f32 %v1625_v7 }
  0x6a   :  { %v557_v2 = vmul.f32 %v1074_v50, %v1606_v58  ;;  %vm471_vm12 = vweird.f32 %v1623_v6  ;;  %v475_v18 = vand.u32 2147483647, %v1623_v6  ;;  %v697_v5 = vadd.f32 %v691_v46, %v682_v41 }
  0x6b   :  { %v459_v0 = vsel %vm1619_vm9, %v1068_v20, %v455_v55  ;;  %v435_v4 = vsel %vm434_vm4, %v1560_v37, %v433_v32  ;;  %v548_v27 = vsub.f32 1.5, %v547_v13  ;;  %v668_v8 = vrot.slane %v1629_v54, 2 }
  0x6c   :  { %v464_v1 = vsel %vm1613_vm8, %v463_v52, %v459_v0  ;;  %v438_v63 = vsel %vm436_vm5, %v437_v57, %v435_v4  ;;  %v477_v21 = vand.u32 2147483648, %v1623_v6  ;;  %v558_v24 = vmul.f32 %v1074_v50, %v557_v2 }
  0x6d   :  { %v496_v14 = vperm.slane %v464_v1, 6  ;;  %v997_v62 = vmul.f32 -1.442695, %v438_v63  ;;  %v549_v57 = vmul.f32 %v1070_v43, %v548_v27  ;;  %v700_v25 = vmul.f32 0.4472136, %v697_v5 }
  0x6e   :  { %v1076_v42 = vpop.eup %1075  ;;  %v665_v30 = vadd.f32 %v659_v10, %v1629_v54  ;;  %v559_v36 = vmul.f32 0.5, %v558_v24  ;;  %v1672_v39 = vmul.f32 %v1657_v31, %v1657_v31  ;;  %vm563_vm14 = vcmp.eq.f32.partialorder %v1606_v58, inf }
  0x6f   :  { %v499_v37 = vmul.f32 %v496_v14, %v1278_v29  ;;  %1079 = vpow2.f32 %v997_v62  ;;  %v502_v20 = vmul.f32 %v496_v14, %v1322_v61  ;;  %v1078_v17 = vpop.eup %1077  ;;  %v467_v34 = vmul.f32 %v1076_v42, %v1623_v6 }
  0x70   :  { %v550_v11 = vmul.f32 %v549_v57, %v1594_v60  ;;  %v677_v29 = vrot.slane %v1629_v54, 3  ;;  %v686_v61 = vmul.f32 %v1650_v9, %v1650_v9  ;;  %vm472_vm13 = vweird.f32 %v1076_v42 }
  0x71   :  { %505 = vst [vmem:[#allocation5 + $0x18] sm:$0xc0] %v499_v37  ;;  %v569_v35 = vmul.f32 %v1078_v17, %v1625_v7  ;;  %v1665_v43 = vadd.f32 1e-08, %v700_v25  ;;  %v468_v47 = vsub.f32 1.0, %v467_v34  ;;  %v674_v38 = vadd.f32 %v668_v8, %v665_v30  ;;  %vm1681_vm15 = vmor %vm471_vm12, %vm472_vm13 }
  0x72   :  { %508 = vst [vmem:[#allocation5 + $0x30] sm:$0x1] %v502_v20  ;;  %v552_v49 = vsel %vm551_vm10, %v1594_v60, %v550_v11  ;;  %v560_v44 = vsub.f32 1.5, %v559_v36  ;;  %v692_v52 = vrot.slane %v686_v61, 4  ;;  %v478_v55 = vor.u32 1.1754944e-38, %v477_v21 }
  0x73   :  { %v555_v12 = vsel %vm553_vm11, %v554_v3, %v552_v49  ;;  %v570_v40 = vmul.f32 %v1078_v17, %v569_v35  ;;  %1081 = vrsqrt.f32 %v1665_v43  ;;  %v469_v45 = vmul.f32 %v1076_v42, %v468_v47  ;;  %v1721_v35 = vld [vmem:[#allocation2 + $0x58] sm:$0x1]  ;;  %v1723_v47 = vld [vmem:[#allocation2 + $0x48] sm:$0x3e] }
  0x74   :  { %v998_v51 = vmul.f32 -1.442695, %v555_v12  ;;  %v561_v32 = vmul.f32 %v1074_v50, %v560_v44  ;;  %vm476_vm0 = vcmp.eq.f32.partialorder %v475_v18, 8.507059e+37  ;;  %v683_v46 = vadd.f32 %v677_v29, %v674_v38 }
  0x75   :  { %v1080_v33 = vpop.eup %1079  ;;  %v571_v56 = vmul.f32 0.5, %v570_v40  ;;  %v470_v41 = vadd.f32 %v1076_v42, %v469_v45  ;;  %vm565_vm1 = vcmp.eq.f32.partialorder %v1606_v58, 0.0  ;;  %v566_v0 = vand.u32 2147483648, %v1606_v58 }
  0x76   :  { %v1685_v60 = vadd.f32 1.0, %v1080_v33  ;;  %1083 = vpow2.f32 %v998_v51  ;;  %v660_v6 = vrot.slane %v1672_v39, 1  ;;  %v562_v13 = vmul.f32 %v561_v32, %v1606_v58 }
  0x77   :  { %v474_v4 = vsel %vm1681_vm15, %v1076_v42, %v470_v41  ;;  %v572_v1 = vsub.f32 1.5, %v571_v56  ;;  %v698_v50 = vadd.f32 %v692_v52, %v683_v46  ;;  %vm575_vm2 = vcmp.eq.f32.partialorder %v1625_v7, inf }
  0x78   :  { %1085 = vrcp.f32 %v1685_v60  ;;  %v479_v3 = vsel %vm476_vm0, %v478_v55, %v474_v4  ;;  %vm577_vm3 = vcmp.eq.f32.partialorder %v1625_v7, 0.0  ;;  %v564_v14 = vsel %vm563_vm14, %v1606_v58, %v562_v13 }
  0x79   :  { %v1082_v63 = vpop.eup %1081  ;;  %v497_v10 = vperm.slane %v479_v3, 6  ;;  %v573_v62 = vmul.f32 %v1078_v17, %v572_v1  ;;  %v567_v2 = vsel %vm565_vm1, %v566_v0, %v564_v14  ;;  %v578_v18 = vand.u32 2147483648, %v1625_v7 }
  0x7a   :  { %v707_v27 = vmul.f32 %v1082_v63, %v1665_v43  ;;  %v701_v5 = vmul.f32 0.4472136, %v698_v50  ;;  %v666_v8 = vadd.f32 %v660_v6, %v1672_v39  ;;  %v999_v42 = vmul.f32 -1.442695, %v567_v2 }
  0x7b   :  { %v500_v20 = vmul.f32 %v497_v10, %v1347_v26  ;;  %v503_v57 = vmul.f32 %v497_v10, %v1349_v28  ;;  %v574_v21 = vmul.f32 %v573_v62, %v1625_v7  ;;  %v669_v17 = vrot.slane %v1672_v39, 2 }
  0x7c   :  { %v1084_v37 = vpop.eup %1083  ;;  %v708_v58 = vmul.f32 %v1082_v63, %v707_v27  ;;  %v1707_v30 = vadd.f32 1e-08, %v701_v5  ;;  %v492_v11 = vand.u32 2147483648, %v1685_v60  ;;  %1087 = vpow2.f32 %v999_v42  ;;  %v1762_v27 = vld [vmem:[#allocation2 + $0x50] sm:$0x3e] }
  0x7d   :  { %v1705_v25 = vadd.f32 1.0, %v1084_v37  ;;  %506 = vst [vmem:[#allocation5 + $0x20] sm:$0xc0] %v500_v20  ;;  %v576_v26 = vsel %vm575_vm2, %v1625_v7, %v574_v21  ;;  %vm486_vm4 = vweird.f32 %v1685_v60  ;;  %v490_v28 = vand.u32 2147483647, %v1685_v60 }
  0x7e   :  { %v1086_v24 = vpop.eup %1085  ;;  %509 = vst [vmem:[#allocation5 + $0x38] sm:$0x1] %v503_v57  ;;  %v579_v61 = vsel %vm577_vm3, %v578_v18, %v576_v26  ;;  %v709_v36 = vmul.f32 0.5, %v708_v58  ;;  %vm713_vm6 = vcmp.eq.f32.partialorder %v1665_v43, inf  ;;  %v675_v38 = vadd.f32 %v669_v17, %v666_v8 }
  0x7f   :  { %v482_v34 = vmul.f32 %v1086_v24, %v1685_v60  ;;  %vm487_vm5 = vweird.f32 %v1086_v24  ;;  %1089 = vrcp.f32 %v1705_v25  ;;  %v1000_v49 = vmul.f32 -1.442695, %v579_v61 }
  0x80   :  { %1091 = vrsqrt.f32 %v1707_v30  ;;  %v678_v12 = vrot.slane %v1672_v39, 3  ;;  %v493_v40 = vor.u32 1.1754944e-38, %v492_v11  ;;  %v710_v33 = vsub.f32 1.5, %v709_v36  ;;  %vm1731_vm8 = vmor %vm486_vm4, %vm487_vm5 }
  0x81   :  { %v483_v29 = vsub.f32 1.0, %v482_v34  ;;  %vm715_vm7 = vcmp.eq.f32.partialorder %v1665_v43, 0.0  ;;  %v601_v45 = vand.u32 2147483647, %v1705_v25  ;;  %1093 = vpow2.f32 %v1000_v49 }
  0x82   :  { %v687_v51 = vmul.f32 %v1721_v35, %v1721_v35  ;;  %v1740_v39 = vmul.f32 %v1723_v47, %v1723_v47  ;;  %v1088_v52 = vpop.eup %1087  ;;  %vm491_vm9 = vcmp.eq.f32.partialorder %v490_v28, 8.507059e+37  ;;  %v711_v55 = vmul.f32 %v1082_v63, %v710_v33 }
  0x83   :  { %v484_v44 = vmul.f32 %v1086_v24, %v483_v29  ;;  %v716_v60 = vand.u32 2147483648, %v1665_v43  ;;  %v603_v56 = vand.u32 2147483648, %v1705_v25  ;;  %v1744_v41 = vadd.f32 1.0, %v1088_v52 }
  0x84   :  { %v684_v46 = vadd.f32 %v678_v12, %v675_v38  ;;  %v693_v0 = vrot.slane %v687_v51, 4  ;;  %vm597_vm10 = vweird.f32 %v1705_v25  ;;  %v712_v1 = vmul.f32 %v711_v55, %v1665_v43 }
  0x85   :  { %v485_v54 = vadd.f32 %v1086_v24, %v484_v44  ;;  %v1090_v32 = vpop.eup %1089  ;;  %vm1753_vm11 = vcmp.eq.f32.partialorder %v601_v45, 8.507059e+37  ;;  %1095 = vrcp.f32 %v1744_v41  ;;  %v823_v3 = vrot.slane %v1740_v39, 1 }
  0x86   :  { %v1746_v6 = vpop.eup %1091  ;;  %v593_v13 = vmul.f32 %v1090_v32, %v1705_v25  ;;  %vm598_vm12 = vweird.f32 %v1090_v32  ;;  %v714_v62 = vsel %vm713_vm6, %v1665_v43, %v712_v1  ;;  %v604_v18 = vor.u32 1.1754944e-38, %v603_v56 }
  0x87   :  { %v489_v4 = vsel %vm1731_vm8, %v1086_v24, %v485_v54  ;;  %v1094_v2 = vpop.eup %1093  ;;  %v717_v5 = vsel %vm715_vm7, %v716_v60, %v714_v62  ;;  %v719_v8 = vmul.f32 %v1746_v6, %v1707_v30  ;;  %v699_v37 = vadd.f32 %v693_v0, %v684_v46  ;;  %v1771_v24 = vld [vmem:[#allocation2 + $0x58] sm:$0x3e]  ;;  %vm1775_vm13 = vmor %vm597_vm10, %vm598_vm12 }
  0x88   :  { %v494_v50 = vsel %vm491_vm9, %v493_v40, %v489_v4  ;;  %v594_v14 = vsub.f32 1.0, %v593_v13  ;;  %v728_v21 = vand.u32 2147483648, %v1707_v30  ;;  %v1779_v43 = vadd.f32 1.0, %v1094_v2 }
  0x89   :  { %v498_v10 = vperm.slane %v494_v50, 6  ;;  %v1001_v17 = vmul.f32 -1.442695, %v717_v5  ;;  %v720_v34 = vmul.f32 %v1746_v6, %v719_v8  ;;  %v702_v11 = vmul.f32 0.4472136, %v699_v37 }
  0x8a   :  { %v595_v42 = vmul.f32 %v1090_v32, %v594_v14  ;;  %v829_v26 = vadd.f32 %v823_v3, %v1740_v39  ;;  %v832_v25 = vrot.slane %v1740_v39, 2  ;;  %vm612_vm14 = vweird.f32 %v1744_v41 }
  0x8b   :  { %v501_v20 = vmul.f32 %v498_v10, %v1382_v15  ;;  %v504_v57 = vmul.f32 %v498_v10, %v1388_v16  ;;  %v1784_v15 = vmul.f32 %v1762_v27, %v1762_v27  ;;  %v1096_v28 = vpop.eup %1095  ;;  %v616_v29 = vand.u32 2147483647, %v1744_v41 }
  0x8c   :  { %v596_v16 = vadd.f32 %v1090_v32, %v595_v42  ;;  %1097 = vrcp.f32 %v1779_v43  ;;  %vm725_vm15 = vcmp.eq.f32.partialorder %v1707_v30, inf  ;;  %v1794_v61 = vmul.f32 %v1771_v24, %v1771_v24 }
  0x8d   :  { %507 = vst [vmem:[#allocation5 + $0x28] sm:$0xc0] %v501_v20  ;;  %v608_v49 = vmul.f32 %v1096_v28, %v1744_v41  ;;  %v618_v38 = vand.u32 2147483648, %v1744_v41  ;;  %1099 = vpow2.f32 %v1001_v17  ;;  %vm727_vm0 = vcmp.eq.f32.partialorder %v1707_v30, 0.0 }
  0x8e   :  { %510 = vst [vmem:[#allocation5 + $0x40] sm:$0x1] %v504_v57  ;;  %v600_v36 = vsel %vm1775_vm13, %v1090_v32, %v596_v16  ;;  %vm613_vm1 = vweird.f32 %v1096_v28  ;;  %v721_v44 = vmul.f32 0.5, %v720_v34  ;;  %v841_v40 = vrot.slane %v1740_v39, 3 }
  0x8f   :  { %v605_v12 = vsel %vm1753_vm11, %v604_v18, %v600_v36  ;;  %v609_v7 = vsub.f32 1.0, %v608_v49  ;;  %v1804_v45 = vadd.f32 1e-08, %v702_v11  ;;  %v838_v51 = vadd.f32 %v832_v25, %v829_v26  ;;  %vm1817_vm3 = vmor %vm612_vm14, %vm613_vm1 }
  0x90   :  { %v637_v33 = vperm.slane %v605_v12, 1  ;;  %vm1806_vm2 = vcmp.eq.f32.partialorder %v616_v29, 8.507059e+37  ;;  %v722_v54 = vsub.f32 1.5, %v721_v44  ;;  %v850_v55 = vrot.slane %v1740_v39, 4 }
  0x91   :  { %v824_v60 = vrot.slane %v1784_v15, 1  ;;  %v610_v56 = vmul.f32 %v1096_v28, %v609_v7  ;;  %v619_v46 = vor.u32 1.1754944e-38, %v618_v38  ;;  %1101 = vrsqrt.f32 %v1804_v45 }
  0x92   :  { %v640_v32 = vmul.f32 %v637_v33, %v1526_v53  ;;  %v1098_v0 = vpop.eup %1097  ;;  %vm627_vm4 = vweird.f32 %v1779_v43  ;;  %v723_v39 = vmul.f32 %v1746_v6, %v722_v54  ;;  %v847_v13 = vadd.f32 %v841_v40, %v838_v51 }
  0x93   :  { %v833_v1 = vrot.slane %v1784_v15, 2  ;;  %v1100_v53 = vpop.eup %1099  ;;  %v611_v50 = vadd.f32 %v1096_v28, %v610_v56  ;;  %v623_v63 = vmul.f32 %v1098_v0, %v1779_v43  ;;  %v631_v3 = vand.u32 2147483647, %v1779_v43 }
  0x94   :  { %643 = vst [vmem:[#allocation5 + $0x30] sm:$0xe] %v640_v32  ;;  %v830_v41 = vadd.f32 %v824_v60, %v1784_v15  ;;  %v633_v10 = vand.u32 2147483648, %v1779_v43  ;;  %v1828_v14 = vadd.f32 1.0, %v1100_v53  ;;  %v724_v62 = vmul.f32 %v723_v39, %v1707_v30 }
  0x95   :  { %v856_v2 = vadd.f32 %v850_v55, %v847_v13  ;;  %v615_v6 = vsel %vm1817_vm3, %v1096_v28, %v611_v50  ;;  %v624_v18 = vsub.f32 1.0, %v623_v63  ;;  %vm628_vm5 = vweird.f32 %v1098_v0 }
  0x96   :  { %v842_v5 = vrot.slane %v1784_v15, 3  ;;  %v620_v8 = vsel %vm1806_vm2, %v619_v46, %v615_v6  ;;  %1103 = vrcp.f32 %v1828_v14  ;;  %v839_v37 = vadd.f32 %v833_v1, %v830_v41  ;;  %vm1847_vm7 = vmor %vm627_vm4, %vm628_vm5 }
  0x97   :  { %v825_v20 = vrot.slane %v1794_v61, 1  ;;  %v1102_v57 = vpop.eup %1101  ;;  %v638_v42 = vperm.slane %v620_v8, 1  ;;  %v625_v58 = vmul.f32 %v1098_v0, %v624_v18  ;;  %vm1838_vm6 = vcmp.eq.f32.partialorder %v631_v3, 8.507059e+37 }
  0x98   :  { %v726_v34 = vsel %vm725_vm15, %v1707_v30, %v724_v62  ;;  %v634_v11 = vor.u32 1.1754944e-38, %v633_v10  ;;  %v731_v25 = vmul.f32 %v1102_v57, %v1804_v45  ;;  %v859_v28 = vmul.f32 0.4472136, %v856_v2 }
  0x99   :  { %v729_v26 = vsel %vm727_vm0, %v728_v21, %v726_v34  ;;  %v641_v29 = vmul.f32 %v638_v42, %v1545_v22  ;;  %v626_v36 = vadd.f32 %v1098_v0, %v625_v58  ;;  %v851_v38 = vrot.slane %v1784_v15, 4 }
  0x9a   :  { %v1002_v49 = vmul.f32 -1.442695, %v729_v26  ;;  %v732_v43 = vmul.f32 %v1102_v57, %v731_v25  ;;  %v1858_v12 = vadd.f32 1e-08, %v859_v28  ;;  %v848_v44 = vadd.f32 %v842_v5, %v839_v37 }
  0x9b   :  { %v831_v40 = vadd.f32 %v825_v20, %v1794_v61  ;;  %644 = vst [vmem:[#allocation5 + $0x38] sm:$0xe] %v641_v29  ;;  %v630_v30 = vsel %vm1847_vm7, %v1098_v0, %v626_v36  ;;  %v834_v21 = vrot.slane %v1794_v61, 2  ;;  %v843_v15 = vrot.slane %v1794_v61, 3 }
  0x9c   :  { %1105 = vpow2.f32 %v1002_v49  ;;  %v1104_v33 = vpop.eup %1103  ;;  %v635_v22 = vsel %vm1838_vm6, %v634_v11, %v630_v30  ;;  %v733_v7 = vmul.f32 0.5, %v732_v43  ;;  %vm759_vm8 = vweird.f32 %v1828_v14 }
  0x9d   :  { %1107 = vrsqrt.f32 %v1858_v12  ;;  %v639_v51 = vperm.slane %v635_v22, 1  ;;  %v755_v52 = vmul.f32 %v1104_v33, %v1828_v14  ;;  %v765_v54 = vand.u32 2147483648, %v1828_v14 }
  0x9e   :  { %v734_v55 = vsub.f32 1.5, %v733_v7  ;;  %v857_v60 = vadd.f32 %v851_v38, %v848_v44  ;;  %v840_v32 = vadd.f32 %v834_v21, %v831_v40  ;;  %vm760_vm9 = vweird.f32 %v1104_v33 }
  0x9f   :  { %v642_v56 = vmul.f32 %v639_v51, %v1577_v48  ;;  %v756_v46 = vsub.f32 1.0, %v755_v52  ;;  %v763_v0 = vand.u32 2147483647, %v1828_v14  ;;  %v852_v1 = vrot.slane %v1794_v61, 4  ;;  %vm1878_vm11 = vmor %vm759_vm8, %vm760_vm9 }
  0xa0   :  { %v735_v4 = vmul.f32 %v1102_v57, %v734_v55  ;;  %v860_v39 = vmul.f32 0.4472136, %v857_v60  ;;  %v849_v13 = vadd.f32 %v843_v15, %v840_v32  ;;  %vm737_vm10 = vcmp.eq.f32.partialorder %v1804_v45, inf }
  0xa1   :  { %645 = vst [vmem:[#allocation5 + $0x40] sm:$0xe] %v642_v56  ;;  %v757_v50 = vmul.f32 %v1104_v33, %v756_v46  ;;  %v740_v63 = vand.u32 2147483648, %v1804_v45  ;;  %v766_v41 = vor.u32 1.1754944e-38, %v765_v54  ;;  %vm764_vm12 = vcmp.eq.f32.partialorder %v763_v0, 8.507059e+37 }
  0xa2   :  { %v1106_v53 = vpop.eup %1105  ;;  %v736_v62 = vmul.f32 %v735_v4, %v1804_v45  ;;  %v1883_v2 = vadd.f32 1e-08, %v860_v39  ;;  %vm739_vm13 = vcmp.eq.f32.partialorder %v1804_v45, 0.0  ;;  %v858_v18 = vadd.f32 %v852_v1, %v849_v13 }
  0xa3   :  { %v1108_v3 = vpop.eup %1107  ;;  %v752_v10 = vadd.f32 1.0, %v1106_v53  ;;  %v758_v61 = vadd.f32 %v1104_v33, %v757_v50  ;;  %vm872_vm14 = vcmp.eq.f32.partialorder %v1858_v12, inf  ;;  %vm874_vm15 = vcmp.eq.f32.partialorder %v1858_v12, 0.0 }
  0xa4   :  { %v866_v6 = vmul.f32 %v1108_v3, %v1858_v12  ;;  %v738_v5 = vsel %vm737_vm10, %v1804_v45, %v736_v62  ;;  %v861_v17 = vmul.f32 0.4472136, %v858_v18  ;;  %v875_v36 = vand.u32 2147483648, %v1858_v12 }
  0xa5   :  { %1109 = vrcp.f32 %v752_v10  ;;  %v762_v14 = vsel %vm1878_vm11, %v1104_v33, %v758_v61  ;;  %v741_v20 = vsel %vm739_vm13, %v740_v63, %v738_v5  ;;  %vm774_vm0 = vweird.f32 %v752_v10 }
  0xa6   :  { %v867_v8 = vmul.f32 %v1108_v3, %v866_v6  ;;  %1111 = vrsqrt.f32 %v1883_v2  ;;  %v767_v37 = vsel %vm764_vm12, %v766_v41, %v762_v14  ;;  %v1003_v42 = vmul.f32 -1.442695, %v741_v20 }
  0xa7   :  { %v799_v57 = vperm.slane %v767_v37, 4  ;;  %v1894_v25 = vadd.f32 1e-08, %v861_v17  ;;  %v780_v49 = vand.u32 2147483648, %v752_v10  ;;  %v778_v38 = vand.u32 2147483647, %v752_v10 }
  0xa8   :  { %v868_v58 = vmul.f32 0.5, %v867_v8  ;;  %1113 = vpow2.f32 %v1003_v42  ;;  %vm884_vm4 = vcmp.eq.f32.partialorder %v1883_v2, inf  ;;  %vm886_vm5 = vcmp.eq.f32.partialorder %v1883_v2, 0.0 }
  0xa9   :  { %v802_v34 = vmul.f32 %v799_v57, %v1587_v59  ;;  %v805_v16 = vmul.f32 %v799_v57, %v1604_v23  ;;  %1115 = vrsqrt.f32 %v1894_v25  ;;  %v781_v33 = vor.u32 1.1754944e-38, %v780_v49 }
  0xaa   :  { %v869_v11 = vsub.f32 1.5, %v868_v58  ;;  %vm779_vm3 = vcmp.eq.f32.partialorder %v778_v38, 8.507059e+37  ;;  %vm896_vm8 = vcmp.eq.f32.partialorder %v1894_v25, inf  ;;  %v899_v14 = vand.u32 2147483648, %v1894_v25 }
  0xab   :  { %v1110_v26 = vpop.eup %1109  ;;  %808 = vst [vmem:[#allocation5 + $0x30] sm:$0xf0] %v802_v34  ;;  %vm898_vm9 = vcmp.eq.f32.partialorder %v1894_v25, 0.0 }
  0xac   :  { %v1112_v45 = vpop.eup %1111  ;;  %v770_v28 = vmul.f32 %v1110_v26, %v752_v10  ;;  %v870_v29 = vmul.f32 %v1108_v3, %v869_v11  ;;  %811 = vst [vmem:[#allocation5 + $0x48] sm:$0x1] %v805_v16  ;;  %vm775_vm1 = vweird.f32 %v1110_v26 }
  0xad   :  { %v878_v59 = vmul.f32 %v1112_v45, %v1883_v2  ;;  %vm776_vm2 = vmor %vm774_vm0, %vm775_vm1 }
  0xae   :  { %v771_v23 = vsub.f32 1.0, %v770_v28  ;;  %v871_v43 = vmul.f32 %v870_v29, %v1858_v12  ;;  %v1114_v40 = vpop.eup %1113 }
  0xaf   :  { %v879_v44 = vmul.f32 %v1112_v45, %v878_v59  ;;  %v753_v22 = vadd.f32 1.0, %v1114_v40  ;;  %v1116_v54 = vpop.eup %1115 }
  0xb0   :  { %v772_v30 = vmul.f32 %v1110_v26, %v771_v23  ;;  %v873_v21 = vsel %vm872_vm14, %v1858_v12, %v871_v43  ;;  %v890_v32 = vmul.f32 %v1116_v54, %v1894_v25  ;;  %v887_v12 = vand.u32 2147483648, %v1883_v2 }
  0xb1   :  { %v876_v7 = vsel %vm874_vm15, %v875_v36, %v873_v21  ;;  %v880_v15 = vmul.f32 0.5, %v879_v44  ;;  %1117 = vrcp.f32 %v753_v22  ;;  %vm789_vm6 = vweird.f32 %v753_v22 }
  0xb2   :  { %v773_v51 = vadd.f32 %v1110_v26, %v772_v30  ;;  %v1004_v52 = vmul.f32 -1.442695, %v876_v7  ;;  %v891_v4 = vmul.f32 %v1116_v54, %v890_v32  ;;  %v793_v10 = vand.u32 2147483647, %v753_v22 }
  0xb3   :  { %v881_v60 = vsub.f32 1.5, %v880_v15  ;;  %v795_v62 = vand.u32 2147483648, %v753_v22 }
  0xb4   :  { %v777_v55 = vsel %vm776_vm2, %v1110_v26, %v773_v51  ;;  %1119 = vpow2.f32 %v1004_v52  ;;  %v892_v53 = vmul.f32 0.5, %v891_v4  ;;  %vm794_vm11 = vcmp.eq.f32.partialorder %v793_v10, 8.507059e+37 }
  0xb5   :  { %v782_v56 = vsel %vm779_vm3, %v781_v33, %v777_v55  ;;  %v882_v0 = vmul.f32 %v1112_v45, %v881_v60  ;;  %v796_v37 = vor.u32 1.1754944e-38, %v795_v62 }
  0xb6   :  { %v800_v46 = vperm.slane %v782_v56, 4  ;;  %v893_v41 = vsub.f32 1.5, %v892_v53 }
  0xb7   :  { %v883_v1 = vmul.f32 %v882_v0, %v1883_v2  ;;  %v1118_v50 = vpop.eup %1117 }
  0xb8   :  { %v803_v39 = vmul.f32 %v800_v46, %v1609_v19  ;;  %v806_v13 = vmul.f32 %v800_v46, %v1650_v9  ;;  %v785_v3 = vmul.f32 %v1118_v50, %v753_v22  ;;  %vm790_vm7 = vweird.f32 %v1118_v50 }
  0xb9   :  { %v885_v48 = vsel %vm884_vm4, %v1883_v2, %v883_v1  ;;  %v894_v18 = vmul.f32 %v1116_v54, %v893_v41  ;;  %vm791_vm10 = vmor %vm789_vm6, %vm790_vm7 }
  0xba   :  { %v1120_v63 = vpop.eup %1119  ;;  %809 = vst [vmem:[#allocation5 + $0x38] sm:$0xf0] %v803_v39  ;;  %v888_v19 = vsel %vm886_vm5, %v887_v12, %v885_v48  ;;  %v786_v6 = vsub.f32 1.0, %v785_v3 }
  0xbb   :  { %812 = vst [vmem:[#allocation5 + $0x50] sm:$0x1] %v806_v13  ;;  %v910_v61 = vadd.f32 1.0, %v1120_v63  ;;  %v1005_v9 = vmul.f32 -1.442695, %v888_v19  ;;  %v895_v8 = vmul.f32 %v894_v18, %v1894_v25 }
  0xbc   :  { %v787_v5 = vmul.f32 %v1118_v50, %v786_v6 }
  0xbd   :  { %1121 = vrcp.f32 %v910_v61  ;;  %v897_v20 = vsel %vm896_vm8, %v1894_v25, %v895_v8  ;;  %vm918_vm12 = vweird.f32 %v910_v61  ;;  %v922_v45 = vand.u32 2147483647, %v910_v61 }
  0xbe   :  { %1123 = vpow2.f32 %v1005_v9  ;;  %v788_v2 = vadd.f32 %v1118_v50, %v787_v5  ;;  %v900_v57 = vsel %vm898_vm9, %v899_v14, %v897_v20  ;;  %v924_v28 = vand.u32 2147483648, %v910_v61 }
  0xbf   :  { %v1006_v58 = vmul.f32 -1.442695, %v900_v57  ;;  %vm923_vm15 = vcmp.eq.f32.partialorder %v922_v45, 8.507059e+37 }
  0xc0   :  { %v792_v42 = vsel %vm791_vm10, %v1118_v50, %v788_v2  ;;  %v925_v23 = vor.u32 1.1754944e-38, %v924_v28 }
  0xc1   :  { %v797_v34 = vsel %vm794_vm11, %v796_v37, %v792_v42  ;;  %1125 = vpow2.f32 %v1006_v58 }
  0xc2   :  { %v801_v11 = vperm.slane %v797_v34, 4 }
  0xc3   :  { %v1122_v17 = vpop.eup %1121 }
  0xc4   :  { %v1124_v16 = vpop.eup %1123  ;;  %v914_v26 = vmul.f32 %v1122_v17, %v910_v61  ;;  %v804_v36 = vmul.f32 %v801_v11, %v1657_v31  ;;  %v807_v49 = vmul.f32 %v801_v11, %v1721_v35  ;;  %vm919_vm13 = vweird.f32 %v1122_v17 }
  0xc5   :  { %v911_v29 = vadd.f32 1.0, %v1124_v16  ;;  %vm920_vm14 = vmor %vm918_vm12, %vm919_vm13 }
  0xc6   :  { %v915_v59 = vsub.f32 1.0, %v914_v26  ;;  %810 = vst [vmem:[#allocation5 + $0x40] sm:$0xf0] %v804_v36 }
  0xc7   :  { %1127 = vrcp.f32 %v911_v29  ;;  %813 = vst [vmem:[#allocation5 + $0x58] sm:$0x1] %v807_v49  ;;  %v1126_v38 = vpop.eup %1125  ;;  %vm933_vm0 = vweird.f32 %v911_v29  ;;  %v939_v35 = vand.u32 2147483648, %v911_v29  ;;  %v937_v15 = vand.u32 2147483647, %v911_v29 }
  0xc8   :  { %v916_v25 = vmul.f32 %v1122_v17, %v915_v59  ;;  %v912_v44 = vadd.f32 1.0, %v1126_v38 }
  0xc9   :  { %v940_v54 = vor.u32 1.1754944e-38, %v939_v35  ;;  %vm938_vm3 = vcmp.eq.f32.partialorder %v937_v15, 8.507059e+37 }
  0xca   :  { %v917_v43 = vadd.f32 %v1122_v17, %v916_v25  ;;  %1129 = vrcp.f32 %v912_v44  ;;  %vm948_vm4 = vweird.f32 %v912_v44  ;;  %v954_v32 = vand.u32 2147483648, %v912_v44 }
  0xcb   :  { %v952_v0 = vand.u32 2147483647, %v912_v44 }
  0xcc   :  { %v921_v40 = vsel %vm920_vm14, %v1122_v17, %v917_v43  ;;  %v955_v39 = vor.u32 1.1754944e-38, %v954_v32 }
  0xcd   :  { %v1128_v30 = vpop.eup %1127  ;;  %v926_v21 = vsel %vm923_vm15, %v925_v23, %v921_v40  ;;  %vm953_vm7 = vcmp.eq.f32.partialorder %v952_v0, 8.507059e+37 }
  0xce   :  { %v958_v33 = vperm.slane %v926_v21, 1  ;;  %v929_v31 = vmul.f32 %v1128_v30, %v911_v29  ;;  %vm934_vm1 = vweird.f32 %v1128_v30 }
  0xcf   :  { %vm935_vm2 = vmor %vm933_vm0, %vm934_vm1 }
  0xd0   :  { %v961_v22 = vmul.f32 %v958_v33, %v1723_v47  ;;  %v930_v7 = vsub.f32 1.0, %v929_v31  ;;  %v1130_v52 = vpop.eup %1129 }
  0xd1   :  { %v944_v60 = vmul.f32 %v1130_v52, %v912_v44  ;;  %vm949_vm5 = vweird.f32 %v1130_v52 }
  0xd2   :  { %964 = vst [vmem:[#allocation5 + $0x48] sm:$0x3e] %v961_v22  ;;  %v931_v51 = vmul.f32 %v1128_v30, %v930_v7  ;;  %vm950_vm6 = vmor %vm948_vm4, %vm949_vm5 }
  0xd3   :  { %v945_v46 = vsub.f32 1.0, %v944_v60 }
  0xd4   :  { %v932_v55 = vadd.f32 %v1128_v30, %v931_v51 }
  0xd5   :  { %v946_v47 = vmul.f32 %v1130_v52, %v945_v46 }
  0xd6   :  { %v936_v56 = vsel %vm935_vm2, %v1128_v30, %v932_v55 }
  0xd7   :  { %v941_v4 = vsel %vm938_vm3, %v940_v54, %v936_v56  ;;  %v947_v1 = vadd.f32 %v1130_v52, %v946_v47 }
  0xd8   :  { %v959_v12 = vperm.slane %v941_v4, 1 }
  0xd9   :  { %v951_v53 = vsel %vm950_vm6, %v1130_v52, %v947_v1 }
  0xda   :  { %v962_v13 = vmul.f32 %v959_v12, %v1762_v27  ;;  %v956_v50 = vsel %vm953_vm7, %v955_v39, %v951_v53 }
  0xdb   :  { %v960_v63 = vperm.slane %v956_v50, 1 }
  0xdc   :  { %965 = vst [vmem:[#allocation5 + $0x50] sm:$0x3e] %v962_v13 }
  0xdd   :  { %v963_v3 = vmul.f32 %v960_v63, %v1771_v24 }
  0xdf   :  { %966 = vst [vmem:[#allocation5 + $0x58] sm:$0x3e] %v963_v3 }
  0xe0   :  { %979 = dma.vmem_to_hbm [thread:$0]  %s972_s13, 1536, %s974_s16, [#allocation4], %s1184_s11, %s1184_s11, %s1185_s12  }
  0xe1   :  { %1181 = dma.done.wait [#allocation4], 1536  }
  0xe2   :  { %1182 = vsyncadd [#allocation4], 4294965760 }
  0xe3   :  { %984 = vsyncpa [#allocation3], 1 }
  0xe4   :  { %985 = vsyncpa [#allocation4], 1 }

</bundles_post_ra>
